<compile_context>
chip_gen: v5e
topology: v5e:2x2
jax: 0.10.0
libtpu: 0.0.40
codegen_flags: <defaults>
</compile_context>

<pallas_src>
import jax
import jax.numpy as jnp
from jax.experimental import pallas as pl
from jax.experimental.pallas import tpu as pltpu

_LANE = 128
_SUBLANE = 8
_MAX_BLOCK_ROWS = 8192                 # 8192 x 128 x 4 B = 4 MiB per f32 block
_TINY_BYTES = 64 * 1024                # below this, skip Pallas entirely
_VMEM_LIMIT_BYTES = 32 * 1024 * 1024   # > v5e's 16 MiB default, << v7x's 64 MiB


def _safesin_kernel(x_ref, o_ref):
    # sin lowers to range-reduction + polynomial on the VALU; compute in f32.
    # TODO(synk): on v6e/v7x a bf16-native path would halve VALU work for bf16
    # streams; kept in f32 pending accuracy validation against torch.sin.
    x = x_ref[...].astype(jnp.float32)
    o_ref[...] = jnp.sin(x).astype(o_ref.dtype)


def safe_sin(x):
    """Elementwise sin. Accepts any shape/float dtype; preserves shape & dtype."""
    orig_shape = x.shape
    orig_dtype = x.dtype
    n = x.size
    nbytes = n * jnp.dtype(orig_dtype).itemsize

    # Tiny tensors: pallas_call launch + DMA setup dominates; let XLA fuse it.
    if n == 0 or nbytes < _TINY_BYTES:
        return jnp.sin(x)

    flat = x.reshape(-1)

    # Pad only to LANE (=128) granularity so the slab is (rows, 128).
    # sin(0) == 0 and the tail is sliced off, so zero-padding is safe.
    # NOTE: the pad + final slice are one extra HBM pass each; they only fire
    # when n % 128 != 0 (rare for NN-shaped tensors).
    n_pad = pl.cdiv(n, _LANE) * _LANE
    padded = n_pad != n
    if padded:
        flat = jnp.pad(flat, (0, n_pad - n))

    rows = n_pad // _LANE
    x2d = flat.reshape(rows, _LANE)

    # Biggest tile that fits VMEM comfortably (4 MiB f32 blocks -> ~16 MiB
    # double-buffered in+out), but always >= 2 grid blocks so v7x's second
    # TensorCore is not idle.  block_rows is a multiple of 8 ((8,128) rule);
    # a partial last block is clipped by Pallas on the write side.
    block_rows = min(_MAX_BLOCK_ROWS, pl.cdiv(rows, 2))
    block_rows = pl.cdiv(block_rows, _SUBLANE) * _SUBLANE
    grid = (pl.cdiv(rows, block_rows),)

    out2d = pl.pallas_call(
        _safesin_kernel,
        out_shape=jax.ShapeDtypeStruct((rows, _LANE), orig_dtype),
        grid_spec=pltpu.PrefetchScalarGridSpec(
            num_scalar_prefetch=0,
            grid=grid,
            in_specs=[pl.BlockSpec((block_rows, _LANE), lambda i: (i, 0))],
            out_specs=pl.BlockSpec((block_rows, _LANE), lambda i: (i, 0)),
        ),
        compiler_params=pltpu.CompilerParams(
            dimension_semantics=("parallel",),
            vmem_limit_bytes=_VMEM_LIMIT_BYTES,
        ),
    )(x2d)

    out_flat = out2d.reshape(-1)
    if padded:
        out_flat = out_flat[:n]
    return out_flat.reshape(orig_shape)


if __name__ == "__main__":
    key = jax.random.PRNGKey(0)
    k1, k2, k3, k4 = jax.random.split(key, 4)

    # 1) Module-consistent small input (2,4,16,16) = 8 KiB -> tiny-input bypass.
    x_small = jax.random.normal(k1, (2, 4, 16, 16), dtype=jnp.float32) * 2.0
    y_small = jax.block_until_ready(safe_sin(x_small))
    assert y_small.shape == x_small.shape and y_small.dtype == x_small.dtype
    assert jnp.allclose(y_small, jnp.sin(x_small), atol=1e-5, rtol=1e-5)

    # 2) Pallas grid path: 2*4*64*64 = 32768 elems (128 KiB f32) -> grid=(2,).
    x_big = jax.random.normal(k2, (2, 4, 64, 64), dtype=jnp.float32) * 3.0
    y_big = jax.block_until_ready(safe_sin(x_big))
    assert y_big.shape == x_big.shape and y_big.dtype == x_big.dtype
    assert jnp.allclose(y_big, jnp.sin(x_big), atol=1e-5, rtol=1e-5)

    # 3) Padded grid path: length not a multiple of 128.
    x_rag = jax.random.normal(k3, (17001,), dtype=jnp.float32) * 2.0
    y_rag = jax.block_until_ready(safe_sin(x_rag))
    assert y_rag.shape == x_rag.shape and y_rag.dtype == x_rag.dtype
    assert jnp.allclose(y_rag, jnp.sin(x_rag), atol=1e-5, rtol=1e-5)

    # 4) bf16 stream through the grid path (compute in f32, cast back).
    x_bf = (jax.random.normal(k4, (2, 4, 128, 128), dtype=jnp.float32) * 2.0
            ).astype(jnp.bfloat16)
    y_bf = jax.block_until_ready(safe_sin(x_bf))
    assert y_bf.shape == x_bf.shape and y_bf.dtype == jnp.bfloat16
    assert jnp.allclose(y_bf.astype(jnp.float32),
                        jnp.sin(x_bf.astype(jnp.float32)),
                        atol=1e-2, rtol=1e-2)

    print("KERNEL_OK")
</pallas_src>

<mosaic_0001>
module attributes {stable_mosaic.version = 11 : i64} {
  func.func @_safesin_kernel(%arg0: i32, %arg1: memref<128x128xf32, #tpu.memory_space<vmem>>, %arg2: memref<128x128xf32, #tpu.memory_space<vmem>>) attributes {dimension_semantics = [#tpu.dimension_semantics<parallel>], iteration_bounds = array<i64: 2>, scalar_prefetch = 0 : i64, scratch_operands = 0 : i64, tpu.core_type = #tpu.core_type<tc>, window_params = [{transform_indices = @transform_0, window_bounds = array<i64: 128, 128>}, {transform_indices = @transform_1, window_bounds = array<i64: 128, 128>}]} {
    %c0 = arith.constant 0 : index
    %c0_0 = arith.constant 0 : index
    %0 = vector.load %arg1[%c0, %c0_0] : memref<128x128xf32, #tpu.memory_space<vmem>>, vector<128x128xf32>
    %1 = math.sin %0 : vector<128x128xf32>
    %c0_1 = arith.constant 0 : index
    %c0_2 = arith.constant 0 : index
    %2 = vector.load %arg2[%c0_1, %c0_2] : memref<128x128xf32, #tpu.memory_space<vmem>>, vector<128x128xf32>
    tpu.vector_store %arg2[%c0_1, %c0_2], %1 {strides = array<i32>} : memref<128x128xf32, #tpu.memory_space<vmem>>, vector<128x128xf32>,
    return
  }
  func.func @transform_0(%arg0: i32) -> (i32, i32) {
    %c0_i32 = arith.constant 0 : i32
    %c0_i32_0 = arith.constant 0 : i32
    return %arg0, %c0_i32 : i32, i32
  }
  func.func @transform_1(%arg0: i32) -> (i32, i32) {
    %c0_i32 = arith.constant 0 : i32
    %c0_i32_0 = arith.constant 0 : i32
    return %arg0, %c0_i32 : i32, i32
  }
}

</mosaic_0001>

<bundles_post_ra>
// kernel: tpu_custom_call.1
= control target key start
LH: loop header
LB: loop body
LE: loop exit
PB: predicated region body
PF: predicated region fallthrough
CT: control target
= control target key end

     0   :  { %6 = vsyncpa [#allocation3], 0  ;;  %s4978_s0 = inlined_call_operand.hbm [shape: f32[256,128], index: 0, kind: input, shape index: {}]   ;;  %s4979_s1 = inlined_call_operand.hbm [shape: f32[256,128], index: 1, kind: output, shape index: {}]  }
   0x1   :  { %8 = vsyncpa [#allocation3 + $0x1], 0 }
   0x2   :  { %9 = vsyncpa [#allocation4], 0 }
   0x3   :  { %11 = vsyncpa [#allocation4 + $0x1], 0  ;;  %s2984_s6 = smov 0   ;;  %s2986_s7 = smov 0  }
   0x4   :  { %s2988_s8 = smov 0   ;;  %s2990_s9 = smov 0  }
   0x5 LB: > { %s3005_s10 = sadd.s32 4294967295, %s2961_s9   ;;  %s2740_s11 = sadd.s32 4294967294, %s2961_s9   ;;  %s2961_s9 = sphi %s2990_s9, %s5017_s9   ;;  %s2957_s8 = sphi %s2988_s8, %s5016_s8   ;;  %s2953_s7 = sphi %s2986_s7, %s5015_s7   ;;  %s2949_s6 = sphi %s2984_s6, %s5014_s6  }
   0x6   : > { %s3009_s12 = sadd.s32 1, %s2961_s9   ;;  %s24_s13 = sadd.s32 1, %s2957_s8 }
   0x7   : > { %s21_s14 = ssub.s32 %s2961_s9, %s3009_s12  ;;  %p31_p0 = scmp.ne.s32.totalorder %s2957_s8, %s2953_s7 }
   0x8   : > { %p22_p1 = scmp.eq.s32.totalorder %s21_s14, 0  ;;  %p32_p2 = scmp.eq.s32.totalorder %s2961_s9, 0 }
   0x9   : > { %p37_p3 = scmp.ne.s32.totalorder %s2953_s7, %s2949_s6  ;;  %p38_p4 = scmp.eq.s32.totalorder %s3005_s10, 0 }
   0xa   : > { %s3021_s15 = scalar_select %p22_p1, %s2957_s8, %s24_s13  }
   0xb   : > { %p3023_p5 = por %p32_p2, %p31_p0  ;;  %p3027_p6 = por %p38_p4, %p37_p3 }
   0xc   : > { %p61_p7 = scmp.eq.s32.totalorder %s3005_s10, 1  ;;  %p67_p8 = scmp.eq.s32.totalorder %s2740_s11, 1 }
   0xd   : > { %p2816_p10 = scmp.lt.s32.totalorder %s2961_s9, 2  ;;  %s87_s20 = sand.u32 1, %s2957_s8  }
   0xe   : > { %p3034_p11 = por %p61_p7, %p31_p0  ;;  %p3038_p12 = por %p67_p8, %p37_p3 }
   0xf   : > { %s2802_s21 = sshll.u32 %s2961_s9, 7  ;;  %s2743_s22 = sshll.u32 %s87_s20, 7 }
  0x10   : > { %s96_s25 = scalar_lea.hbm %s4978_s0, %s2802_s21  ;;  %s91_s27 = scalar_lea.vmem [#allocation2], %s2743_s22 }
  0x11   : > { %s97_s26 = sshll.u32 %s96_s25, 4  ;;  %s99_s28 = sshll.u32 %s91_s27, 4  ;;  %s98_s26 = int_to_ptr.hbm [resolvable:$true] %s97_s26  ;;  %s100_s28 = int_to_ptr.vmem [resolvable:$true] %s99_s28 }
  0x12   : > { %p3049_p13 = pnand %p2816_p10, %p3023_p5  ;;  %p2746_p0 = scmp.ge.s32.totalorder %s2961_s9, 1 }
  0x13   : > { %p107_p1 = scmp.lt.s32.totalorder %s2961_s9, 3  ;;  %s88_s30 = scalar_lea.sflag [#allocation3], %s87_s20 }
  0x14   : > { %s2865_s2 = sshra.s32 %s98_s26, 4  ;;  %p2869_p3 = pneg %p3049_p13  ;;  %s2866_s2 = int_to_ptr.hbm [resolvable:$true] %s2865_s2 }
  0x15   : > { %s2867_s3 = scalar_lea.hbm %s2866_s2, 128  ;;  %s2872_s11 = scalar_lea.hbm %s4978_s0, 256 }
  0x16   : > { %p2868_p2 = scmp.ne.s32.totalorder %s2866_s2, %s2867_s3  ;;  %p2873_p5 = scmp.lt.s32.totalorder %s2866_s2, %s4978_s0 }
  0x17   : > { %p2874_p8 = scmp.lt.s32.totalorder %s2872_s11, %s2867_s3 }
  0x18   : > { %p2870_p4 = pnand %p2869_p3, %p2868_p2 }
  0x19   : > { %p2875_p10 = por %p2874_p8, %p2873_p5 }
  0x1a   : > { %p2871_p7 = pneg %p2870_p4 }
  0x1c   : > { %p2876_p9 = pnand %p2875_p10, %p2871_p7 }
  0x1e   : > { %2879 = shalt.err (!%p2876_p9)
}
  0x1f   : > { %s2963_s16 = smov 128   ;;  %s2964_s20 = smov 8  }
  0x20   : > { %2811 = dma.hbm_to_vmem [thread:$0]  (!%p3049_p13), %s98_s26, 2048, %s100_s28, %s88_s30, %s2963_s16, %s2963_s16, %s2964_s20  }
  0x21   : > { %p108_p2 = pnand %p2746_p0, %p107_p1 }
  0x22   : > { %s3070_s21 = sand.u32 (!%p108_p2), 1, %s2953_s7  }
  0x23   : > { %111 = sbr.rel (%p108_p2) target bundleno = 683 (0x2ab), region = 24  ;;  %s2747_s22 = sshll.u32 (!%p108_p2), %s3070_s21, 7 }
  0x24   : > { %s114_s23 = scalar_lea.sflag (!%p108_p2), [#allocation3], %s3070_s21  ;;  %s3076_s24 = scalar_lea.vmem (!%p108_p2), [#allocation2], %s2747_s22 }
  0x28   : > { %2940 = dma.done.wait (%p3027_p6), %s114_s23, 2048  }
  0x29   : > { %2942 = vsyncadd (%p3027_p6), %s114_s23, 4294965248  ;;  %v3083_v0 = vld [vmem:[%s3076_s24] sm:$0xff]  ;;  %v3086_v1 = vld [vmem:[%s3076_s24 + $0x8] sm:$0xff]  ;;  %v2965_v27 = vmov 683565275   ;;  %s3378_s17 = scalar_lea.vmem [#allocation5], %s2747_s22 }
  0x2a   : > { %v155_v2 = vand.u32 2147483647, %v3083_v0  ;;  %v158_v3 = vand.u32 2139095040, %v3083_v0  ;;  %v310_v4 = vand.u32 2147483647, %v3086_v1  ;;  %v313_v5 = vand.u32 2139095040, %v3086_v1 }
  0x2b   : > { %v3095_v8 = vld [vmem:[%s3076_s24 + $0x10] sm:$0xff]  ;;  %v2966_v29 = vmov 2475754826   ;;  %v2967_v31 = vmov 2131351028   ;;  %s2803_s25 = sshll.u32 %s3005_s10, 7 }
  0x2c   : > { %v159_v6 = vshrl.u32 %v158_v3, 23  ;;  %v162_v7 = vand.u32 8388607, %v155_v2  ;;  %v314_v9 = vshrl.u32 %v313_v5, 23  ;;  %v317_v10 = vand.u32 8388607, %v310_v4  ;;  %s2663_s28 = scalar_lea.hbm %s4979_s1, %s2803_s25 }
  0x2d   : > { %v468_v15 = vand.u32 2139095040, %v3095_v8  ;;  %v2968_v33 = vmov 2102212464   ;;  %v2969_v35 = vmov 920167782   ;;  %s2664_s29 = sshll.u32 %s3378_s17, 4  ;;  %s2665_s29 = int_to_ptr.vmem [resolvable:$true] %s2664_s29 }
  0x2e   : > { %v2749_v11 = vadd.s32 4294967169, %v159_v6  ;;  %v163_v12 = vor.u32 8388608, %v162_v7  ;;  %v2752_v13 = vadd.s32 4294967169, %v314_v9  ;;  %v318_v16 = vor.u32 8388608, %v317_v10  ;;  %s2666_s30 = sshll.u32 %s2663_s28, 4  ;;  %s2652_s10 = scalar_lea.sflag [#allocation4], %s3070_s21  ;;  %s2667_s30 = int_to_ptr.hbm [resolvable:$true] %s2666_s30 }
  0x2f   : > { %v469_v22 = vshrl.u32 %v468_v15, 23  ;;  %v2970_v44 = vmov 1326507024   ;;  %s2909_s2 = sshra.s32 %s2667_s30, 4  ;;  %s2915_s11 = scalar_lea.hbm %s4979_s1, 256  ;;  %s2910_s2 = int_to_ptr.hbm [resolvable:$true] %s2909_s2 }
  0x30   : > { %v165_v14 = vadd.s32 1, %v2749_v11  ;;  %v320_v17 = vadd.s32 1, %v2752_v13  ;;  %v3100_v19 = vshll.u32 %v163_v12, 8  ;;  %v3106_v25 = vshll.u32 %v318_v16, 8  ;;  %s2911_s3 = scalar_lea.hbm %s2910_s2, 128  ;;  %p2916_p0 = scmp.lt.s32.totalorder %s2910_s2, %s4979_s1 }
  0x31   : > { %v3118_v42 = vadd.s32 4294967169, %v469_v22  ;;  %p2912_p6 = scmp.ne.s32.totalorder %s2910_s2, %s2911_s3  ;;  %p2917_p1 = scmp.lt.s32.totalorder %s2915_s11, %s2911_s3 }
  0x32   : > { %vm166_vm0 = vcmp.gt.s32.totalorder %v165_v14, 0  ;;  %vm321_vm1 = vcmp.gt.s32.totalorder %v320_v17, 0  ;;  %v204_v37 = vand.u32 65535, %v3100_v19  ;;  %v205_v38 = vshrl.u32 %v3100_v19, 16 }
  0x33   : > { %v167_v18 = vsel %vm166_vm0, %v165_v14, 0  ;;  %v322_v21 = vsel %vm321_vm1, %v320_v17, 0  ;;  %p2913_p9 = pnand %p2912_p6, %p3034_p11  ;;  %p2918_p3 = por %p2917_p1, %p2916_p0 }
  0x34   : > { %v169_v20 = vand.u32 31, %v167_v18  ;;  %v3102_v23 = vshrl.u32 %v167_v18, 5  ;;  %v3104_v24 = vand.u32 31, %v322_v21  ;;  %v3134_v55 = vshrl.u32 %v322_v21, 5 }
  0x35   : > { %p2914_p13 = pneg %p2913_p9 }
  0x36   : > { %v170_v26 = vsub.s32 32, %v169_v20  ;;  %v172_v28 = vshll.u32 %v2965_v27, %v169_v20  ;;  %v175_v30 = vshll.u32 %v2966_v29, %v169_v20  ;;  %v178_v32 = vshll.u32 %v2967_v31, %v169_v20 }
  0x37   : > { %v181_v34 = vshll.u32 %v2968_v33, %v169_v20  ;;  %v184_v36 = vshll.u32 %v2969_v35, %v169_v20  ;;  %vm187_vm2 = vcmp.lt.s32.totalorder %v3102_v23, 1  ;;  %vm190_vm3 = vcmp.lt.s32.totalorder %v3102_v23, 4  ;;  %p2919_p4 = pnand %p2918_p3, %p2914_p13 }
  0x38   : > { %v173_v39 = vshrl.u32 %v2966_v29, %v170_v26  ;;  %v176_v40 = vshrl.u32 %v2967_v31, %v170_v26  ;;  %v179_v41 = vshrl.u32 %v2968_v33, %v170_v26  ;;  %v182_v43 = vshrl.u32 %v2969_v35, %v170_v26 }
  0x39   : > { %v185_v45 = vshrl.u32 %v2970_v44, %v170_v26  ;;  %v3125_v49 = vsub.s32 32, %v3104_v24  ;;  %v171_v50 = vshrl.u32 %v2965_v27, %v170_v26  ;;  %vm189_vm4 = vcmp.lt.s32.totalorder %v3102_v23, 3 }
  0x3a   : > { %v174_v46 = vor.u32 %v173_v39, %v172_v28  ;;  %v177_v47 = vor.u32 %v176_v40, %v175_v30  ;;  %v180_v48 = vor.u32 %v179_v41, %v178_v32  ;;  %v183_v51 = vor.u32 %v182_v43, %v181_v34 }
  0x3b   : > { %v186_v52 = vor.u32 %v185_v45, %v184_v36  ;;  %vm188_vm5 = vcmp.lt.s32.totalorder %v3102_v23, 2  ;;  %v327_v58 = vshll.u32 %v2965_v27, %v3104_v24  ;;  %v330_v59 = vshll.u32 %v2966_v29, %v3104_v24 }
  0x3c   : > { %v195_v53 = vsel %vm187_vm2, %v174_v46, %v177_v47  ;;  %v199_v54 = vsel %vm187_vm2, %v177_v47, %v180_v48  ;;  %v196_v56 = vsel %vm190_vm3, %v183_v51, 920167782  ;;  %v192_v60 = vsel %vm190_vm3, %v180_v48, 2102212464 }
  0x3d   : > { %v200_v57 = vsel %vm190_vm3, %v186_v52, 1326507024  ;;  %v197_v61 = vsel %vm189_vm4, %v180_v48, %v196_v56  ;;  %v328_v63 = vshrl.u32 %v2966_v29, %v3125_v49  ;;  %v191_v3 = vsel %vm187_vm2, %v171_v50, %v174_v46 }
  0x3e   : > { %v201_v62 = vsel %vm189_vm4, %v183_v51, %v200_v57  ;;  %v198_v5 = vsel %vm188_vm5, %v195_v53, %v197_v61  ;;  %v331_v7 = vshrl.u32 %v2967_v31, %v3125_v49  ;;  %v193_v13 = vsel %vm189_vm4, %v177_v47, %v192_v60 }
  0x3f   : > { %v202_v6 = vsel %vm188_vm5, %v199_v54, %v201_v62  ;;  %v228_v11 = vand.u32 65535, %v198_v5  ;;  %v229_v12 = vshrl.u32 %v198_v5, 16  ;;  %v3162_v14 = vor.u32 %v328_v63, %v327_v58 }
  0x40   : > { %v206_v9 = vand.u32 65535, %v202_v6  ;;  %v207_v10 = vshrl.u32 %v202_v6, 16  ;;  %v3164_v15 = vor.u32 %v331_v7, %v330_v59  ;;  %v333_v16 = vshll.u32 %v2967_v31, %v3104_v24 }
  0x41   : > { %v334_v21 = vshrl.u32 %v2968_v33, %v3125_v49  ;;  %v230_v26 = vmul.u32 %v228_v11, %v204_v37  ;;  %v231_v28 = vmul.u32 %v229_v12, %v204_v37  ;;  %v232_v30 = vmul.u32 %v228_v11, %v205_v38 }
  0x42   : > { %v208_v17 = vmul.u32 %v206_v9, %v204_v37  ;;  %v209_v18 = vmul.u32 %v207_v10, %v204_v37  ;;  %v210_v20 = vmul.u32 %v206_v9, %v205_v38  ;;  %v211_v22 = vmul.u32 %v207_v10, %v205_v38 }
  0x43   : > { %v233_v39 = vmul.u32 %v229_v12, %v205_v38  ;;  %v234_v41 = vshll.u32 %v231_v28, 16  ;;  %v235_v43 = vshrl.u32 %v231_v28, 16  ;;  %v236_v45 = vshll.u32 %v232_v30, 16 }
  0x44   : > { %v212_v32 = vshll.u32 %v209_v18, 16  ;;  %v213_v34 = vshrl.u32 %v209_v18, 16  ;;  %v214_v36 = vshll.u32 %v210_v20, 16  ;;  %v215_v40 = vshrl.u32 %v210_v20, 16 }
  0x45   : > { %v237_v47 = vshrl.u32 %v232_v30, 16  ;;  %v336_v48 = vshll.u32 %v2968_v33, %v3104_v24  ;;  %v2971_v50 = vmov 0   ;;  %vm238_vm7 = vc.u32 %v230_v26, %v234_v41 }
  0x46   : > { %vm216_vm6 = vc.u32 %v208_v17, %v212_v32  ;;  %v218_v46 = vadd.s32 %v212_v32, %v208_v17  ;;  %v240_v37 = vadd.s32 %v234_v41, %v230_v26  ;;  %v337_v52 = vshrl.u32 %v2969_v35, %v3125_v49 }
  0x47   : > { %v217_v51 = vsel %vm216_vm6, 1, %v2971_v50  ;;  %v239_v38 = vsel %vm238_vm7, 1, %v2971_v50  ;;  %v339_v54 = vshll.u32 %v2969_v35, %v3104_v24  ;;  %v335_v58 = vor.u32 %v334_v21, %v333_v16 }
  0x48   : > { %v219_v53 = vadd.s32 %v217_v51, %v211_v22  ;;  %vm220_vm8 = vc.u32 %v218_v46, %v214_v36  ;;  %v241_v57 = vadd.s32 %v239_v38, %v233_v39  ;;  %vm242_vm9 = vc.u32 %v240_v37, %v236_v45 }
  0x49   : > { %v221_v56 = vsel %vm220_vm8, 1, %v2971_v50  ;;  %v243_v60 = vsel %vm242_vm9, 1, %v2971_v50  ;;  %v338_v61 = vor.u32 %v337_v52, %v336_v48  ;;  %v340_v62 = vshrl.u32 %v2970_v44, %v3125_v49 }
  0x4a   : > { %v223_v59 = vadd.s32 %v221_v56, %v219_v53  ;;  %v3182_v63 = vadd.s32 %v240_v37, %v236_v45  ;;  %v245_v5 = vadd.s32 %v243_v60, %v241_v57  ;;  %vm342_vm10 = vcmp.lt.s32.totalorder %v3134_v55, 1 }
  0x4b   : > { %vm344_vm11 = vcmp.lt.s32.totalorder %v3134_v55, 3  ;;  %v341_v6 = vor.u32 %v340_v62, %v339_v54  ;;  %vm343_vm12 = vcmp.lt.s32.totalorder %v3134_v55, 2  ;;  %vm345_vm13 = vcmp.lt.s32.totalorder %v3134_v55, 4 }
  0x4c   : > { %v224_v24 = vadd.s32 %v223_v59, %v213_v34  ;;  %v194_v7 = vsel %vm188_vm5, %v191_v3, %v193_v13  ;;  %v246_v9 = vadd.s32 %v245_v5, %v235_v43  ;;  %v350_v10 = vsel %vm342_vm10, %v3162_v14, %v3164_v15 }
  0x4d   : > { %v351_v11 = vsel %vm345_vm13, %v338_v61, 920167782  ;;  %v354_v17 = vsel %vm342_vm10, %v3164_v15, %v335_v58  ;;  %v359_v23 = vand.u32 65535, %v3106_v25  ;;  %v355_v18 = vsel %vm345_vm13, %v341_v6, 1326507024 }
  0x4e   : > { %v3196_v12 = vadd.s32 %v224_v24, %v215_v40  ;;  %v352_v16 = vsel %vm344_vm11, %v335_v58, %v351_v11  ;;  %v247_v3 = vadd.s32 %v246_v9, %v237_v47  ;;  %v360_v20 = vshrl.u32 %v3106_v25, 16 }
  0x4f   : > { %v353_v13 = vsel %vm343_vm12, %v350_v10, %v352_v16  ;;  %v248_v21 = vmul.u32 %v3100_v19, %v194_v7  ;;  %v356_v22 = vsel %vm344_vm11, %v338_v61, %v355_v18  ;;  %v326_v30 = vshrl.u32 %v2965_v27, %v3125_v49 }
  0x50   : > { %vm250_vm14 = vc.u32 %v3196_v12, %v3182_v63  ;;  %v383_v26 = vand.u32 65535, %v353_v13  ;;  %v251_v28 = vadd.s32 1, %v247_v3  ;;  %v357_v32 = vsel %vm343_vm12, %v354_v17, %v356_v22 }
  0x51   : > { %v384_v34 = vshrl.u32 %v353_v13, 16  ;;  %v347_v36 = vsel %vm345_vm13, %v335_v58, 2102212464  ;;  %v361_v39 = vand.u32 65535, %v357_v32  ;;  %v362_v19 = vshrl.u32 %v357_v32, 16 }
  0x52   : > { %v475_v40 = vadd.s32 1, %v3118_v42  ;;  %v252_v41 = vsel %vm250_vm14, %v251_v28, %v247_v3  ;;  %v385_v43 = vmul.u32 %v383_v26, %v359_v23  ;;  %v387_v46 = vmul.u32 %v383_v26, %v360_v20 }
  0x53   : > { %v386_v45 = vmul.u32 %v384_v34, %v359_v23  ;;  %v253_v47 = vadd.s32 %v252_v41, %v248_v21  ;;  %v363_v48 = vmul.u32 %v361_v39, %v359_v23  ;;  %v364_v51 = vmul.u32 %v362_v19, %v359_v23 }
  0x54   : > { %v365_v37 = vmul.u32 %v361_v39, %v360_v20  ;;  %v346_v49 = vsel %vm342_vm10, %v326_v30, %v3162_v14  ;;  %v348_v38 = vsel %vm344_vm11, %v3164_v15, %v347_v36  ;;  %v366_v54 = vmul.u32 %v362_v19, %v360_v20 }
  0x55   : > { %v389_v52 = vshll.u32 %v386_v45, 16  ;;  %v254_v53 = vadd.s32 536870912, %v253_v47  ;;  %v367_v42 = vshll.u32 %v364_v51, 16  ;;  %v388_v57 = vmul.u32 %v384_v34, %v360_v20 }
  0x56   : > { %v369_v56 = vshll.u32 %v365_v37, 16  ;;  %v391_v58 = vshll.u32 %v387_v46, 16  ;;  %vm476_vm15 = vcmp.gt.s32.totalorder %v475_v40, 0  ;;  %v368_v61 = vshrl.u32 %v364_v51, 16 }
  0x57   : > { %v255_v59 = vshrl.u32 %v254_v53, 30  ;;  %vm371_vm0 = vc.u32 %v363_v48, %v367_v42  ;;  %v373_v60 = vadd.s32 %v367_v42, %v363_v48  ;;  %vm393_vm1 = vc.u32 %v385_v43, %v389_v52 }
  0x58   : > { %v372_v62 = vsel %vm371_vm0, 1, %v2971_v50  ;;  %v394_v14 = vsel %vm393_vm1, 1, %v2971_v50  ;;  %v395_v5 = vadd.s32 %v389_v52, %v385_v43  ;;  %v477_v15 = vsel %vm476_vm15, %v475_v40, 0 }
  0x59   : > { %v256_v24 = vshll.u32 %v255_v59, 30  ;;  %v374_v6 = vadd.s32 %v372_v62, %v366_v54  ;;  %vm375_vm2 = vc.u32 %v373_v60, %v369_v56  ;;  %v390_v9 = vshrl.u32 %v386_v45, 16 }
  0x5a   : > { %v376_v7 = vsel %vm375_vm2, 1, %v2971_v50  ;;  %v396_v10 = vadd.s32 %v394_v14, %v388_v57  ;;  %vm397_vm3 = vc.u32 %v395_v5, %v391_v58  ;;  %v370_v16 = vshrl.u32 %v365_v37, 16 }
  0x5b   : > { %v257_v11 = vsub.s32 %v253_v47, %v256_v24  ;;  %v378_v17 = vadd.s32 %v376_v7, %v374_v6  ;;  %v398_v23 = vsel %vm397_vm3, 1, %v2971_v50  ;;  %v392_v3 = vshrl.u32 %v387_v46, 16 }
  0x5c   : > { %v400_v13 = vadd.s32 %v398_v23, %v396_v10  ;;  %v465_v18 = vand.u32 2147483647, %v3095_v8  ;;  %v479_v20 = vand.u32 31, %v477_v15  ;;  %v3232_v26 = vadd.s32 %v395_v5, %v391_v58 }
  0x5d   : > { %vm258_vm4 = vcmp.lt.s32.totalorder %v257_v11, 0  ;;  %v259_v21 = vsub.s32 0, %v257_v11  ;;  %v379_v22 = vadd.s32 %v378_v17, %v368_v61  ;;  %v349_v28 = vsel %vm343_vm12, %v346_v49, %v348_v38 }
  0x5e   : > { %v401_v30 = vadd.s32 %v400_v13, %v390_v9  ;;  %vm157_vm5 = vcmp.lt.s32.totalorder %v3083_v0, 0  ;;  %v480_v19 = vsub.s32 32, %v479_v20  ;;  %v249_v40 = vadd.s32 %v3182_v63, %v3196_v12 }
  0x5f   : > { %v260_v32 = vsel %vm258_vm4, %v259_v21, %v257_v11  ;;  %v3236_v34 = vadd.s32 %v379_v22, %v370_v16  ;;  %v403_v41 = vmul.u32 %v3106_v25, %v349_v28  ;;  %v472_v55 = vand.u32 8388607, %v465_v18 }
  0x60   : > { %v261_v36 = vclz %v260_v32  ;;  %v402_v39 = vadd.s32 %v401_v30, %v392_v3  ;;  %vm3248_vm7 = vcmp.le.f32.partialorder %v155_v2, 0.7853982  ;;  %v279_v46 = vsub.s32 4, %v255_v59 }
  0x61   : > { %vm405_vm6 = vc.u32 %v3236_v34, %v3232_v26  ;;  %v3252_v48 = vshrl.u32 %v477_v15, 5  ;;  %v482_v63 = vshll.u32 %v2965_v27, %v479_v20  ;;  %v485_v25 = vshll.u32 %v2966_v29, %v479_v20 }
  0x62   : > { %v2750_v45 = vadd.s32 4294967294, %v261_v36  ;;  %v406_v47 = vadd.s32 1, %v402_v39  ;;  %v488_v12 = vshll.u32 %v2967_v31, %v479_v20  ;;  %v491_v51 = vshll.u32 %v2968_v33, %v479_v20 }
  0x63   : > { %v483_v2 = vshrl.u32 %v2966_v29, %v480_v19  ;;  %v492_v49 = vshrl.u32 %v2969_v35, %v480_v19  ;;  %v486_v38 = vshrl.u32 %v2967_v31, %v480_v19  ;;  %v489_v54 = vshrl.u32 %v2968_v33, %v480_v19 }
  0x64   : > { %vm2751_vm8 = vcmp.lt.s32.totalorder %v2750_v45, 0  ;;  %v407_v37 = vsel %vm405_vm6, %v406_v47, %v402_v39  ;;  %v473_v58 = vor.u32 8388608, %v472_v55  ;;  %v280_v60 = vsel %vm157_vm5, %v279_v46, %v255_v59 }
  0x65   : > { %v264_v52 = vsel %vm2751_vm8, 0, %v2750_v45  ;;  %v408_v53 = vadd.s32 %v407_v37, %v403_v41  ;;  %v494_v62 = vshll.u32 %v2969_v35, %v479_v20  ;;  %v495_v14 = vshrl.u32 %v2970_v44, %v480_v19 }
  0x66   : > { %v265_v42 = vsub.s32 32, %v264_v52  ;;  %v266_v56 = vshll.u32 %v257_v11, %v264_v52  ;;  %v269_v57 = vsub.s32 4294967266, %v264_v52  ;;  %v484_v6 = vor.u32 %v483_v2, %v482_v63 }
  0x67   : > { %v409_v61 = vadd.s32 536870912, %v408_v53  ;;  %v493_v15 = vor.u32 %v492_v49, %v491_v51  ;;  %v487_v9 = vor.u32 %v486_v38, %v485_v25  ;;  %v490_v10 = vor.u32 %v489_v54, %v488_v12 }
  0x68   : > { %v267_v5 = vshrl.u32 %v249_v40, %v265_v42  ;;  %v270_v24 = vadd.s32 127, %v269_v57  ;;  %vm497_vm9 = vcmp.lt.s32.totalorder %v3252_v48, 1  ;;  %vm499_vm10 = vcmp.lt.s32.totalorder %v3252_v48, 3 }
  0x69   : > { %v410_v7 = vshrl.u32 %v409_v61, 30  ;;  %vm500_vm11 = vcmp.lt.s32.totalorder %v3252_v48, 4  ;;  %v282_v59 = vsel %vm3248_vm7, 0, %v280_v60  ;;  %v496_v23 = vor.u32 %v495_v14, %v494_v62 }
  0x6a   : > { %v268_v11 = vor.u32 %v267_v5, %v266_v56  ;;  %v271_v16 = vshll.u32 %v270_v24, 23  ;;  %v506_v20 = vsel %vm500_vm11, %v493_v15, 920167782  ;;  %v3273_v21 = vshll.u32 %v473_v58, 8 }
  0x6b   : > { %v411_v17 = vshll.u32 %v410_v7, 30  ;;  %vm312_vm12 = vcmp.lt.s32.totalorder %v3086_v1, 0  ;;  %vm498_vm13 = vcmp.lt.s32.totalorder %v3252_v48, 2  ;;  %v505_v28 = vsel %vm497_vm9, %v484_v6, %v487_v9 }
  0x6c   : > { %v272_v3 = vor.u32 4788187, %v271_v16  ;;  %v275_v13 = vcvt.s32.f32 %v268_v11  ;;  %v507_v30 = vsel %vm499_vm10, %v490_v10, %v506_v20  ;;  %v299_v36 = vadd.s32 3, %v282_v59 }
  0x6d   : > { %v3276_v22 = vsub.s32 %v408_v53, %v411_v17  ;;  %v481_v39 = vshrl.u32 %v2965_v27, %v480_v19  ;;  %v509_v40 = vsel %vm497_vm9, %v487_v9, %v490_v10  ;;  %v434_v55 = vsub.s32 4, %v410_v7 }
  0x6e   : > { %v273_v32 = vand.u32 2147483647, %v272_v3  ;;  %v510_v45 = vsel %vm500_vm11, %v496_v23, 1326507024  ;;  %v508_v47 = vsel %vm498_vm13, %v505_v28, %v507_v30  ;;  %v514_v19 = vand.u32 65535, %v3273_v21 }
  0x6f   : > { %vm413_vm14 = vcmp.lt.s32.totalorder %v3276_v22, 0  ;;  %v414_v41 = vsub.s32 0, %v3276_v22  ;;  %v511_v63 = vsel %vm499_vm10, %v493_v15, %v510_v45  ;;  %v502_v12 = vsel %vm500_vm11, %v490_v10, 2102212464 }
  0x70   : > { %v276_v46 = vmul.f32 %v275_v13, %v273_v32  ;;  %v512_v51 = vsel %vm498_vm13, %v509_v40, %v511_v63  ;;  %v515_v37 = vshrl.u32 %v3273_v21, 16  ;;  %vm3303_vm15 = vcmp.le.f32.partialorder %v310_v4, 0.7853982 }
  0x71   : > { %v415_v25 = vsel %vm413_vm14, %v414_v41, %v3276_v22  ;;  %v516_v53 = vand.u32 65535, %v512_v51  ;;  %v517_v38 = vshrl.u32 %v512_v51, 16  ;;  %v404_v54 = vadd.s32 %v3232_v26, %v3236_v34  ;;  %v3347_v51 = vld [vmem:[%s3076_s24 + $0x18] sm:$0xff] }
  0x72   : > { %v277_v2 = vxor.u32 2147483648, %v276_v46  ;;  %v416_v52 = vclz %v415_v25  ;;  %v501_v42 = vsel %vm497_vm9, %v481_v39, %v484_v6  ;;  %v538_v56 = vand.u32 65535, %v508_v47 }
  0x73   : > { %v539_v57 = vshrl.u32 %v508_v47, 16  ;;  %v503_v4 = vsel %vm499_vm10, %v487_v9, %v502_v12  ;;  %v519_v61 = vmul.u32 %v517_v38, %v514_v19  ;;  %v3320_v14 = vand.u32 3, %v299_v36 }
  0x74   : > { %v278_v58 = vsel %vm157_vm5, %v277_v2, %v276_v46  ;;  %v2753_v60 = vadd.s32 4294967294, %v416_v52  ;;  %v518_v26 = vmul.u32 %v516_v53, %v514_v19  ;;  %v3322_v34 = vmul.u32 %v516_v53, %v515_v37 }
  0x75   : > { %v3318_v62 = vsel %vm3248_vm7, %v3083_v0, %v278_v58  ;;  %v435_v24 = vsel %vm312_vm12, %v434_v55, %v410_v7  ;;  %v522_v6 = vshll.u32 %v519_v61, 16  ;;  %v3330_v9 = vsel %vm498_vm13, %v501_v42, %v503_v4 }
  0x76   : > { %v283_v5 = vmul.f32 %v3318_v62, %v3318_v62  ;;  %vm2754_vm0 = vcmp.lt.s32.totalorder %v2753_v60, 0  ;;  %v3332_v43 = vmul.u32 %v539_v57, %v514_v19  ;;  %v3334_v10 = vmul.u32 %v538_v56, %v515_v37 }
  0x77   : > { %v419_v15 = vsel %vm2754_vm0, 0, %v2753_v60  ;;  %v521_v3 = vmul.u32 %v517_v38, %v515_v37  ;;  %v524_v13 = vshll.u32 %v3322_v34, 16  ;;  %vm526_vm1 = vc.u32 %v518_v26, %v522_v6 }
  0x78   : > { %v284_v11 = vmul.f32 -0.001358992, %v283_v5  ;;  %v291_v16 = vmul.f32 -0.00019511016, %v283_v5  ;;  %v420_v59 = vsub.s32 32, %v419_v15  ;;  %v421_v17 = vshll.u32 %v3276_v22, %v419_v15 }
  0x79   : > { %v424_v23 = vsub.s32 4294967266, %v419_v15  ;;  %v527_v48 = vsel %vm526_vm1, 1, %v2971_v50  ;;  %vm305_vm2 = vcmp.eq.s32.totalorder %v3320_v14, 2  ;;  %v437_v32 = vsel %vm3303_vm15, 0, %v435_v24 }
  0x7a   : > { %v285_v7 = vadd.f32 0.041655596, %v284_v11  ;;  %v292_v20 = vadd.f32 0.008332121, %v291_v16  ;;  %v422_v28 = vshrl.u32 %v404_v54, %v420_v59  ;;  %v540_v36 = vmul.u32 %v538_v56, %v514_v19 }
  0x7b   : > { %v425_v30 = vadd.s32 127, %v424_v23  ;;  %v544_v22 = vshll.u32 %v3332_v43, 16  ;;  %v528_v55 = vadd.s32 %v522_v6, %v518_v26  ;;  %vm302_vm3 = vcmp.eq.s32.totalorder %v3320_v14, 0 }
  0x7c   : > { %v286_v39 = vmul.f32 %v285_v7, %v283_v5  ;;  %v293_v40 = vmul.f32 %v292_v20, %v283_v5  ;;  %v423_v41 = vor.u32 %v422_v28, %v421_v17  ;;  %v523_v46 = vshrl.u32 %v519_v61, 16 }
  0x7d   : > { %v426_v45 = vshll.u32 %v425_v30, 23  ;;  %v529_v47 = vadd.s32 %v527_v48, %v521_v3  ;;  %v543_v63 = vmul.u32 %v539_v57, %v515_v37  ;;  %vm301_vm4 = vcmp.lt.s32.totalorder %v3320_v14, 2 }
  0x7e   : > { %v287_v25 = vadd.f32 -0.4999988, %v286_v39  ;;  %v294_v12 = vadd.f32 -0.16666654, %v293_v40  ;;  %vm530_vm5 = vc.u32 %v528_v55, %v524_v13  ;;  %v546_v19 = vshll.u32 %v3334_v10, 16 }
  0x7f   : > { %v427_v2 = vor.u32 4788187, %v426_v45  ;;  %v430_v52 = vcvt.s32.f32 %v423_v41  ;;  %v531_v53 = vsel %vm530_vm5, 1, %v2971_v50  ;;  %vm548_vm6 = vc.u32 %v540_v36, %v544_v22 }
  0x80   : > { %v288_v38 = vmul.f32 %v287_v25, %v283_v5  ;;  %v295_v54 = vmul.f32 %v294_v12, %v283_v5  ;;  %v533_v42 = vadd.s32 %v531_v53, %v529_v47  ;;  %v549_v56 = vsel %vm548_vm6, 1, %v2971_v50 }
  0x81   : > { %v428_v37 = vand.u32 2147483647, %v427_v2  ;;  %v525_v57 = vshrl.u32 %v3322_v34, 16  ;;  %v550_v58 = vadd.s32 %v544_v22, %v540_v36  ;;  %v551_v60 = vadd.s32 %v549_v56, %v543_v63  ;;  %v3387_v56 = vld [vmem:[%s3076_s24 + $0x20] sm:$0xff] }
  0x82   : > { %v289_v4 = vadd.f32 1.0, %v288_v38  ;;  %v296_v61 = vadd.f32 1.0, %v295_v54  ;;  %v534_v26 = vadd.s32 %v533_v42, %v523_v46  ;;  %v623_v24 = vand.u32 2139095040, %v3347_v51 }
  0x83   : > { %v431_v6 = vmul.f32 %v430_v52, %v428_v37  ;;  %v454_v15 = vadd.s32 3, %v437_v32  ;;  %v545_v11 = vshrl.u32 %v3332_v43, 16  ;;  %vm552_vm7 = vc.u32 %v550_v58, %v546_v19 }
  0x84   : > { %v297_v5 = vmul.f32 %v296_v61, %v3318_v62  ;;  %v306_v16 = vxor.u32 2147483648, %v289_v4  ;;  %v547_v59 = vshrl.u32 %v3334_v10, 16  ;;  %v553_v17 = vsel %vm552_vm7, 1, %v2971_v50 }
  0x85   : > { %v432_v34 = vxor.u32 2147483648, %v431_v6  ;;  %v555_v23 = vadd.s32 %v553_v17, %v551_v60  ;;  %v620_v3 = vand.u32 2147483647, %v3347_v51  ;;  %v624_v13 = vshrl.u32 %v623_v24, 23 }
  0x86   : > { %v303_v7 = vxor.u32 2147483648, %v297_v5  ;;  %v307_v20 = vsel %vm305_vm2, %v306_v16, %v297_v5  ;;  %v535_v28 = vadd.s32 %v534_v26, %v525_v57  ;;  %v554_v48 = vadd.s32 %v550_v58, %v546_v19 }
  0x87   : > { %vm298_vm8 = vweird.f32 %v3083_v0  ;;  %v433_v62 = vsel %vm312_vm12, %v432_v34, %v431_v6  ;;  %v556_v43 = vadd.s32 %v555_v23, %v545_v11  ;;  %v2758_v10 = vadd.s32 4294967169, %v624_v13 }
  0x88   : > { %v304_v30 = vsel %vm302_vm3, %v289_v4, %v303_v7  ;;  %v436_v32 = vsel %vm3303_vm15, %v3086_v1, %v433_v62  ;;  %v558_v36 = vmul.u32 %v3273_v21, %v3330_v9  ;;  %v3372_v55 = vand.u32 3, %v454_v15 }
  0x89   : > { %v308_v22 = vsel %vm301_vm4, %v304_v30, %v307_v20  ;;  %v438_v0 = vmul.f32 %v436_v32, %v436_v32  ;;  %v557_v39 = vadd.s32 %v556_v43, %v547_v59  ;;  %v630_v40 = vadd.s32 1, %v2758_v10 }
  0x8a   : > { %v309_v41 = vsel %vm298_vm8, nan, %v308_v22  ;;  %vm560_vm9 = vc.u32 %v535_v28, %v554_v48  ;;  %v627_v45 = vand.u32 8388607, %v620_v3  ;;  %vm460_vm11 = vcmp.eq.s32.totalorder %v3372_v55, 2 }
  0x8b   : > { %v439_v46 = vmul.f32 -0.001358992, %v438_v0  ;;  %v446_v47 = vmul.f32 -0.00019511016, %v438_v0  ;;  %v561_v49 = vadd.s32 1, %v557_v39  ;;  %vm631_vm10 = vcmp.gt.s32.totalorder %v630_v40, 0  ;;  %2635 = vst [vmem:[%s3378_s17] sm:$0xff] %v309_v41 }
  0x8c   : > { %v632_v21 = vsel %vm631_vm10, %v630_v40, 0  ;;  %v628_v52 = vor.u32 8388608, %v627_v45  ;;  %vm457_vm12 = vcmp.eq.s32.totalorder %v3372_v55, 0  ;;  %vm456_vm13 = vcmp.lt.s32.totalorder %v3372_v55, 2 }
  0x8d   : > { %v440_v14 = vadd.f32 0.041655596, %v439_v46  ;;  %v447_v9 = vadd.f32 0.008332121, %v446_v47  ;;  %v562_v63 = vsel %vm560_vm9, %v561_v49, %v557_v39  ;;  %v634_v12 = vand.u32 31, %v632_v21 }
  0x8e   : > { %v563_v25 = vadd.s32 %v562_v63, %v558_v36  ;;  %v3383_v38 = vshrl.u32 %v632_v21, 5  ;;  %vm453_vm14 = vweird.f32 %v3086_v1  ;;  %v559_v16 = vadd.s32 %v554_v48, %v535_v28 }
  0x8f   : > { %v441_v19 = vmul.f32 %v440_v14, %v438_v0  ;;  %v448_v2 = vmul.f32 %v447_v9, %v438_v0  ;;  %v635_v54 = vsub.s32 32, %v634_v12  ;;  %v637_v42 = vshll.u32 %v2965_v27, %v634_v12 }
  0x90   : > { %v564_v53 = vadd.s32 536870912, %v563_v25  ;;  %v640_v58 = vshll.u32 %v2966_v29, %v634_v12  ;;  %v643_v60 = vshll.u32 %v2967_v31, %v634_v12  ;;  %v646_v24 = vshll.u32 %v2968_v33, %v634_v12 }
  0x91   : > { %v442_v37 = vadd.f32 -0.4999988, %v441_v19  ;;  %v449_v57 = vadd.f32 -0.16666654, %v448_v2  ;;  %v638_v61 = vshrl.u32 %v2966_v29, %v635_v54  ;;  %v641_v26 = vshrl.u32 %v2967_v31, %v635_v54 }
  0x92   : > { %v3393_v4 = vshrl.u32 %v564_v53, 30  ;;  %v644_v11 = vshrl.u32 %v2968_v33, %v635_v54  ;;  %v647_v5 = vshrl.u32 %v2969_v35, %v635_v54  ;;  %v3401_v17 = vshll.u32 %v628_v52, 8 }
  0x93   : > { %v443_v6 = vmul.f32 %v442_v37, %v438_v0  ;;  %v450_v15 = vmul.f32 %v449_v57, %v438_v0  ;;  %v778_v34 = vand.u32 2139095040, %v3387_v56  ;;  %v639_v7 = vor.u32 %v638_v61, %v637_v42 }
  0x94   : > { %v566_v59 = vshll.u32 %v3393_v4, 30  ;;  %v642_v20 = vor.u32 %v641_v26, %v640_v58  ;;  %v648_v43 = vor.u32 %v647_v5, %v646_v24  ;;  %v649_v10 = vshll.u32 %v2969_v35, %v634_v12 }
  0x95   : > { %v444_v23 = vadd.f32 1.0, %v443_v6  ;;  %v451_v13 = vadd.f32 1.0, %v450_v15  ;;  %v650_v30 = vshrl.u32 %v2970_v44, %v635_v54  ;;  %v645_v28 = vor.u32 %v644_v11, %v643_v60 }
  0x96   : > { %v3404_v62 = vsub.s32 %v563_v25, %v566_v59  ;;  %vm652_vm15 = vcmp.lt.s32.totalorder %v3383_v38, 1  ;;  %vm654_vm1 = vcmp.lt.s32.totalorder %v3383_v38, 3  ;;  %vm655_vm2 = vcmp.lt.s32.totalorder %v3383_v38, 4 }
  0x97   : > { %v452_v36 = vmul.f32 %v451_v13, %v436_v32  ;;  %v461_v22 = vxor.u32 2147483648, %v444_v23  ;;  %v651_v40 = vor.u32 %v650_v30, %v649_v10  ;;  %v779_v41 = vshrl.u32 %v778_v34, 23 }
  0x98   : > { %vm568_vm0 = vcmp.lt.s32.totalorder %v3404_v62, 0  ;;  %v569_v48 = vsub.s32 0, %v3404_v62  ;;  %vm653_vm3 = vcmp.lt.s32.totalorder %v3383_v38, 2  ;;  %v660_v45 = vsel %vm652_vm15, %v639_v7, %v642_v20 }
  0x99   : > { %v458_v0 = vxor.u32 2147483648, %v452_v36  ;;  %v462_v39 = vsel %vm460_vm11, %v461_v22, %v452_v36  ;;  %v661_v46 = vsel %vm655_vm2, %v648_v43, 920167782  ;;  %vm467_vm4 = vcmp.lt.s32.totalorder %v3095_v8, 0 }
  0x9a   : > { %v570_v32 = vsel %vm568_vm0, %v569_v48, %v3404_v62  ;;  %v662_v21 = vsel %vm654_vm1, %v645_v28, %v661_v46  ;;  %v775_v14 = vand.u32 2147483647, %v3387_v56  ;;  %v664_v63 = vsel %vm652_vm15, %v642_v20, %v645_v28 }
  0x9b   : > { %v459_v47 = vsel %vm457_vm12, %v444_v23, %v458_v0  ;;  %v571_v49 = vclz %v570_v32  ;;  %v669_v25 = vand.u32 65535, %v3401_v17  ;;  %v670_v12 = vshrl.u32 %v3401_v17, 16 }
  0x9c   : > { %v463_v9 = vsel %vm456_vm13, %v459_v47, %v462_v39  ;;  %v663_v52 = vsel %vm653_vm3, %v660_v45, %v662_v21  ;;  %v665_v53 = vsel %vm655_vm2, %v651_v40, 1326507024  ;;  %v589_v55 = vsub.s32 4, %v3393_v4 }
  0x9d   : > { %v464_v19 = vsel %vm453_vm14, nan, %v463_v9  ;;  %v2756_v2 = vadd.s32 4294967294, %v571_v49  ;;  %v636_v42 = vshrl.u32 %v2965_v27, %v635_v54  ;;  %v666_v37 = vsel %vm654_vm1, %v648_v43, %v665_v53 }
  0x9e   : > { %v2761_v57 = vadd.s32 4294967169, %v779_v41  ;;  %2636 = vst [vmem:[%s3378_s17 + $0x8] sm:$0xff] %v464_v19  ;;  %v657_v1 = vsel %vm655_vm2, %v645_v28, 2102212464  ;;  %v667_v58 = vsel %vm653_vm3, %v664_v63, %v666_v37  ;;  %v693_v60 = vand.u32 65535, %v663_v52 }
  0x9f   : > { %vm2757_vm5 = vcmp.lt.s32.totalorder %v2756_v2, 0  ;;  %v671_v26 = vand.u32 65535, %v667_v58  ;;  %v672_v24 = vshrl.u32 %v667_v58, 16  ;;  %v694_v6 = vshrl.u32 %v663_v52, 16 }
  0xa0   : > { %v574_v61 = vsel %vm2757_vm5, 0, %v2756_v2  ;;  %v3451_v5 = vand.u32 8388607, %v775_v14  ;;  %v656_v59 = vsel %vm652_vm15, %v636_v42, %v639_v7  ;;  %v658_v34 = vsel %vm654_vm1, %v642_v20, %v657_v1 }
  0xa1   : > { %v575_v15 = vsub.s32 32, %v574_v61  ;;  %v576_v54 = vshll.u32 %v3404_v62, %v574_v61  ;;  %v579_v11 = vsub.s32 4294967266, %v574_v61  ;;  %v673_v23 = vmul.u32 %v671_v26, %v669_v25 }
  0xa2   : > { %v785_v13 = vadd.s32 1, %v2761_v57  ;;  %v674_v30 = vmul.u32 %v672_v24, %v669_v25  ;;  %v675_v36 = vmul.u32 %v671_v26, %v670_v12  ;;  %vm3459_vm6 = vcmp.le.f32.partialorder %v465_v18, 0.7853982 }
  0xa3   : > { %v577_v43 = vshrl.u32 %v559_v16, %v575_v15  ;;  %v580_v10 = vadd.s32 127, %v579_v11  ;;  %v3466_v22 = vsel %vm467_vm4, %v589_v55, %v3393_v4  ;;  %v695_v7 = vmul.u32 %v693_v60, %v669_v25 }
  0xa4   : > { %v696_v28 = vmul.u32 %v694_v6, %v669_v25  ;;  %v697_v20 = vmul.u32 %v693_v60, %v670_v12  ;;  %v676_v16 = vmul.u32 %v672_v24, %v670_v12  ;;  %v677_v39 = vshll.u32 %v674_v30, 16 }
  0xa5   : > { %v578_v48 = vor.u32 %v577_v43, %v576_v54  ;;  %v581_v0 = vshll.u32 %v580_v10, 23  ;;  %v3470_v40 = vsel %vm653_vm3, %v656_v59, %v658_v34  ;;  %v679_v18 = vshll.u32 %v675_v36, 16  ;;  %v3493_v34 = vld [vmem:[%s3076_s24 + $0x10] sm:$0xff] }
  0xa6   : > { %v698_v41 = vmul.u32 %v694_v6, %v670_v12  ;;  %v699_v32 = vshll.u32 %v696_v28, 16  ;;  %vm681_vm7 = vc.u32 %v673_v23, %v677_v39  ;;  %v683_v47 = vadd.s32 %v677_v39, %v673_v23 }
  0xa7   : > { %v582_v45 = vor.u32 4788187, %v581_v0  ;;  %v585_v46 = vcvt.s32.f32 %v578_v48  ;;  %v678_v4 = vshrl.u32 %v674_v30, 16  ;;  %v682_v49 = vsel %vm681_vm7, 1, %v2971_v50 }
  0xa8   : > { %v701_v21 = vshll.u32 %v697_v20, 16  ;;  %vm703_vm8 = vc.u32 %v695_v7, %v699_v32  ;;  %v684_v63 = vadd.s32 %v682_v49, %v676_v16  ;;  %vm685_vm9 = vc.u32 %v683_v47, %v679_v18 }
  0xa9   : > { %v583_v9 = vand.u32 2147483647, %v582_v45  ;;  %v704_v25 = vsel %vm703_vm8, 1, %v2971_v50  ;;  %v686_v38 = vsel %vm685_vm9, 1, %v2971_v50  ;;  %v705_v19 = vadd.s32 %v699_v32, %v695_v7 }
  0xaa   : > { %v706_v2 = vadd.s32 %v704_v25, %v698_v41  ;;  %vm786_vm10 = vcmp.gt.s32.totalorder %v785_v13, 0  ;;  %v680_v52 = vshrl.u32 %v675_v36, 16  ;;  %v688_v53 = vadd.s32 %v686_v38, %v684_v63 }
  0xab   : > { %v586_v12 = vmul.f32 %v585_v46, %v583_v9  ;;  %v787_v55 = vsel %vm786_vm10, %v785_v13, 0  ;;  %v700_v42 = vshrl.u32 %v696_v28, 16  ;;  %vm707_vm11 = vc.u32 %v705_v19, %v701_v21 }
  0xac   : > { %v783_v37 = vor.u32 8388608, %v3451_v5  ;;  %v789_v57 = vand.u32 31, %v787_v55  ;;  %v592_v58 = vsel %vm3459_vm6, 0, %v3466_v22  ;;  %v689_v60 = vadd.s32 %v688_v53, %v678_v4 }
  0xad   : > { %v587_v1 = vxor.u32 2147483648, %v586_v12  ;;  %v708_v61 = vsel %vm707_vm11, 1, %v2971_v50  ;;  %v702_v26 = vshrl.u32 %v697_v20, 16  ;;  %v713_v6 = vmul.u32 %v3401_v17, %v3470_v40 }
  0xae   : > { %v710_v24 = vadd.s32 %v708_v61, %v706_v2  ;;  %v3482_v15 = vsub.s32 32, %v789_v57  ;;  %v3486_v11 = vadd.s32 %v689_v60, %v680_v52  ;;  %v3488_v5 = vadd.s32 %v705_v19, %v701_v21 }
  0xaf   : > { %v588_v54 = vsel %vm467_vm4, %v587_v1, %v586_v12  ;;  %v3490_v59 = vshrl.u32 %v787_v55, 5  ;;  %v792_v17 = vshll.u32 %v2965_v27, %v789_v57  ;;  %v795_v10 = vshll.u32 %v2966_v29, %v789_v57 }
  0xb0   : > { %v591_v23 = vsel %vm3459_vm6, %v3493_v34, %v588_v54  ;;  %v711_v13 = vadd.s32 %v710_v24, %v700_v42  ;;  %v793_v43 = vshrl.u32 %v2966_v29, %v3482_v15  ;;  %v796_v30 = vshrl.u32 %v2967_v31, %v3482_v15 }
  0xb1   : > { %v593_v8 = vmul.f32 %v591_v23, %v591_v23  ;;  %v798_v36 = vshll.u32 %v2967_v31, %v789_v57  ;;  %v799_v7 = vshrl.u32 %v2968_v33, %v3482_v15  ;;  %v801_v62 = vshll.u32 %v2968_v33, %v789_v57 }
  0xb2   : > { %v712_v22 = vadd.s32 %v711_v13, %v702_v26  ;;  %v802_v28 = vshrl.u32 %v2969_v35, %v3482_v15  ;;  %vm715_vm12 = vc.u32 %v3486_v11, %v3488_v5  ;;  %v804_v0 = vshll.u32 %v2969_v35, %v789_v57 }
  0xb3   : > { %v594_v20 = vmul.f32 -0.001358992, %v593_v8  ;;  %v601_v48 = vmul.f32 -0.00019511016, %v593_v8  ;;  %v609_v16 = vadd.s32 3, %v592_v58  ;;  %v3513_v40 = vor.u32 %v793_v43, %v792_v17 }
  0xb4   : > { %v716_v39 = vadd.s32 1, %v712_v22  ;;  %v805_v18 = vshrl.u32 %v2970_v44, %v3482_v15  ;;  %v3517_v45 = vor.u32 %v796_v30, %v795_v10  ;;  %v3519_v46 = vor.u32 %v799_v7, %v798_v36 }
  0xb5   : > { %v595_v41 = vadd.f32 0.041655596, %v594_v20  ;;  %v602_v32 = vadd.f32 0.008332121, %v601_v48  ;;  %v803_v4 = vor.u32 %v802_v28, %v801_v62  ;;  %vm807_vm13 = vcmp.lt.s32.totalorder %v3490_v59, 1 }
  0xb6   : > { %v717_v47 = vsel %vm715_vm12, %v716_v39, %v712_v22  ;;  %v806_v49 = vor.u32 %v805_v18, %v804_v0  ;;  %vm810_vm14 = vcmp.lt.s32.totalorder %v3490_v59, 4  ;;  %v610_v25 = vand.u32 3, %v609_v16 }
  0xb7   : > { %v596_v21 = vmul.f32 %v595_v41, %v593_v8  ;;  %v603_v9 = vmul.f32 %v602_v32, %v593_v8  ;;  %v718_v63 = vadd.s32 %v717_v47, %v713_v6  ;;  %vm808_vm15 = vcmp.lt.s32.totalorder %v3490_v59, 2 }
  0xb8   : > { %vm809_vm0 = vcmp.lt.s32.totalorder %v3490_v59, 3  ;;  %v815_v12 = vsel %vm807_vm13, %v3513_v40, %v3517_v45  ;;  %v816_v52 = vsel %vm810_vm14, %v803_v4, 920167782  ;;  %v819_v53 = vsel %vm807_vm13, %v3517_v45, %v3519_v46 }
  0xb9   : > { %v597_v38 = vadd.f32 -0.4999988, %v596_v21  ;;  %v604_v19 = vadd.f32 -0.16666654, %v603_v9  ;;  %v719_v2 = vadd.s32 536870912, %v718_v63  ;;  %v3537_v42 = vshll.u32 %v783_v37, 8 }
  0xba   : > { %v820_v55 = vsel %vm810_vm14, %v806_v49, 1326507024  ;;  %v817_v60 = vsel %vm809_vm0, %v3519_v46, %v816_v52  ;;  %vm615_vm1 = vcmp.eq.s32.totalorder %v610_v25, 2  ;;  %vm611_vm2 = vcmp.lt.s32.totalorder %v610_v25, 2 }
  0xbb   : > { %v598_v57 = vmul.f32 %v597_v38, %v593_v8  ;;  %v605_v1 = vmul.f32 %v604_v19, %v593_v8  ;;  %v3539_v58 = vshrl.u32 %v719_v2, 30  ;;  %v818_v61 = vsel %vm808_vm15, %v815_v12, %v817_v60 }
  0xbc   : > { %v821_v26 = vsel %vm809_vm0, %v803_v4, %v820_v55  ;;  %v824_v13 = vand.u32 65535, %v3537_v42  ;;  %v825_v17 = vshrl.u32 %v3537_v42, 16  ;;  %v849_v30 = vshrl.u32 %v818_v61, 16 }
  0xbd   : > { %v599_v24 = vadd.f32 1.0, %v598_v57  ;;  %v606_v6 = vadd.f32 1.0, %v605_v1  ;;  %v721_v54 = vshll.u32 %v3539_v58, 30  ;;  %v822_v37 = vsel %vm808_vm15, %v819_v53, %v821_v26  ;;  %v3572_v57 = vld [vmem:[%s3076_s24 + $0x28] sm:$0xff] }
  0xbe   : > { %vm612_vm3 = vcmp.eq.s32.totalorder %v610_v25, 0  ;;  %v826_v36 = vand.u32 65535, %v822_v37  ;;  %v827_v22 = vshrl.u32 %v822_v37, 16  ;;  %vm608_vm5 = vweird.f32 %v3493_v34 }
  0xbf   : > { %v607_v43 = vmul.f32 %v606_v6, %v591_v23  ;;  %v616_v8 = vxor.u32 2147483648, %v599_v24  ;;  %v722_v10 = vsub.s32 %v718_v63, %v721_v54  ;;  %v848_v39 = vand.u32 65535, %v818_v61 }
  0xc0   : > { %v828_v20 = vmul.u32 %v826_v36, %v824_v13  ;;  %v829_v48 = vmul.u32 %v827_v22, %v824_v13  ;;  %v3554_v0 = vmul.u32 %v826_v36, %v825_v17  ;;  %v3556_v18 = vmul.u32 %v849_v30, %v824_v13 }
  0xc1   : > { %v613_v7 = vxor.u32 2147483648, %v607_v43  ;;  %v617_v62 = vsel %vm615_vm1, %v616_v8, %v607_v43  ;;  %vm723_vm4 = vcmp.lt.s32.totalorder %v722_v10, 0  ;;  %v724_v28 = vsub.s32 0, %v722_v10 }
  0xc2   : > { %v831_v47 = vmul.u32 %v827_v22, %v825_v17  ;;  %v832_v4 = vshll.u32 %v829_v48, 16  ;;  %v791_v21 = vshrl.u32 %v2965_v27, %v3482_v15  ;;  %v834_v34 = vshll.u32 %v3554_v0, 16 }
  0xc3   : > { %v614_v16 = vsel %vm612_vm3, %v599_v24, %v613_v7  ;;  %v725_v23 = vsel %vm723_vm4, %v724_v28, %v722_v10  ;;  %v714_v9 = vadd.s32 %v3488_v5, %v3486_v11  ;;  %v850_v19 = vmul.u32 %v848_v39, %v824_v13 }
  0xc4   : > { %v618_v41 = vsel %vm611_vm2, %v614_v16, %v617_v62  ;;  %v726_v32 = vclz %v725_v23  ;;  %vm836_vm6 = vc.u32 %v828_v20, %v832_v4  ;;  %v838_v38 = vadd.s32 %v832_v4, %v828_v20 }
  0xc5   : > { %v619_v49 = vsel %vm608_vm5, nan, %v618_v41  ;;  %v837_v25 = vsel %vm836_vm6, 1, %v2971_v50  ;;  %v852_v2 = vmul.u32 %v848_v39, %v825_v17  ;;  %v854_v12 = vshll.u32 %v3556_v18, 16 }
  0xc6   : > { %v2759_v63 = vadd.s32 4294967294, %v726_v32  ;;  %2637 = vst [vmem:[%s3378_s17 + $0x10] sm:$0xff] %v619_v49  ;;  %v812_v15 = vsel %vm810_vm14, %v3519_v46, 2102212464  ;;  %v839_v52 = vadd.s32 %v837_v25, %v831_v47  ;;  %vm840_vm8 = vc.u32 %v838_v38, %v834_v34  ;;  %v3604_v34 = vld [vmem:[%s3076_s24 + $0x30] sm:$0xff] }
  0xc7   : > { %v833_v11 = vshrl.u32 %v829_v48, 16  ;;  %v841_v5 = vsel %vm840_vm8, 1, %v2971_v50  ;;  %v853_v55 = vmul.u32 %v849_v30, %v825_v17  ;;  %vm622_vm9 = vcmp.lt.s32.totalorder %v3347_v51, 0 }
  0xc8   : > { %vm2760_vm7 = vcmp.lt.s32.totalorder %v2759_v63, 0  ;;  %v843_v26 = vadd.s32 %v841_v5, %v839_v52  ;;  %v811_v24 = vsel %vm807_vm13, %v791_v21, %v3513_v40  ;;  %v856_v46 = vshll.u32 %v852_v2, 16 }
  0xc9   : > { %v729_v53 = vsel %vm2760_vm7, 0, %v2759_v63  ;;  %vm858_vm10 = vc.u32 %v850_v19, %v854_v12  ;;  %v744_v37 = vsub.s32 4, %v3539_v58  ;;  %v813_v17 = vsel %vm809_vm0, %v3517_v45, %v812_v15 }
  0xca   : > { %v730_v1 = vsub.s32 32, %v729_v53  ;;  %v731_v60 = vshll.u32 %v722_v10, %v729_v53  ;;  %v734_v61 = vsub.s32 4294967266, %v729_v53  ;;  %v859_v13 = vsel %vm858_vm10, 1, %v2971_v50 }
  0xcb   : > { %v860_v43 = vadd.s32 %v854_v12, %v850_v19  ;;  %v861_v8 = vadd.s32 %v859_v13, %v853_v55  ;;  %v933_v10 = vand.u32 2139095040, %v3572_v57  ;;  %v835_v40 = vshrl.u32 %v3554_v0, 16 }
  0xcc   : > { %v732_v6 = vshrl.u32 %v714_v9, %v730_v1  ;;  %v735_v54 = vadd.s32 127, %v734_v61  ;;  %v844_v22 = vadd.s32 %v843_v26, %v833_v11  ;;  %v855_v7 = vshrl.u32 %v3556_v18, 16 }
  0xcd   : > { %vm862_vm11 = vc.u32 %v860_v43, %v856_v46  ;;  %v930_v62 = vand.u32 2147483647, %v3572_v57  ;;  %v934_v28 = vshrl.u32 %v933_v10, 23  ;;  %v745_v45 = vsel %vm622_vm9, %v744_v37, %v3539_v58 }
  0xce   : > { %v733_v30 = vor.u32 %v732_v6, %v731_v60  ;;  %v736_v36 = vshll.u32 %v735_v54, 23  ;;  %v863_v16 = vsel %vm862_vm11, 1, %v2971_v50  ;;  %vm3593_vm12 = vcmp.le.f32.partialorder %v620_v3, 0.7853982 }
  0xcf   : > { %v857_v23 = vshrl.u32 %v852_v2, 16  ;;  %v865_v39 = vadd.s32 %v863_v16, %v861_v8  ;;  %v2764_v18 = vadd.s32 4294967169, %v934_v28  ;;  %v814_v32 = vsel %vm808_vm15, %v811_v24, %v813_v17 }
  0xd0   : > { %v737_v20 = vor.u32 4788187, %v736_v36  ;;  %v740_v48 = vcvt.s32.f32 %v733_v30  ;;  %v845_v47 = vadd.s32 %v844_v22, %v835_v40  ;;  %v864_v4 = vadd.s32 %v860_v43, %v856_v46 }
  0xd1   : > { %v747_v58 = vsel %vm3593_vm12, 0, %v745_v45  ;;  %v866_v49 = vadd.s32 %v865_v39, %v855_v7  ;;  %v937_v21 = vand.u32 8388607, %v930_v62  ;;  %v940_v3 = vadd.s32 1, %v2764_v18 }
  0xd2   : > { %v738_v41 = vand.u32 2147483647, %v737_v20  ;;  %v868_v38 = vmul.u32 %v3537_v42, %v814_v32  ;;  %v764_v59 = vadd.s32 3, %v747_v58  ;;  %vm870_vm14 = vc.u32 %v845_v47, %v864_v4 }
  0xd3   : > { %v867_v63 = vadd.s32 %v866_v49, %v857_v23  ;;  %vm941_vm13 = vcmp.gt.s32.totalorder %v940_v3, 0  ;;  %v938_v12 = vor.u32 8388608, %v937_v21  ;;  %v1088_v52 = vand.u32 2139095040, %v3604_v34 }
  0xd4   : > { %v741_v9 = vmul.f32 %v740_v48, %v738_v41  ;;  %v942_v19 = vsel %vm941_vm13, %v940_v3, 0  ;;  %v3619_v1 = vand.u32 3, %v764_v59  ;;  %v1085_v61 = vand.u32 2147483647, %v3604_v34 }
  0xd5   : > { %v871_v2 = vadd.s32 1, %v867_v63  ;;  %v944_v15 = vand.u32 31, %v942_v19  ;;  %v3622_v26 = vadd.s32 %v864_v4, %v845_v47  ;;  %v3624_v24 = vshrl.u32 %v942_v19, 5 }
  0xd6   : > { %v742_v25 = vxor.u32 2147483648, %v741_v9  ;;  %v3626_v46 = vshll.u32 %v938_v12, 8  ;;  %v1089_v6 = vshrl.u32 %v1088_v52, 23  ;;  %vm770_vm15 = vcmp.eq.s32.totalorder %v3619_v1, 2 }
  0xd7   : > { %v872_v5 = vsel %vm870_vm14, %v871_v2, %v867_v63  ;;  %v3615_v42 = vsub.s32 32, %v944_v15  ;;  %v950_v17 = vshll.u32 %v2966_v29, %v944_v15  ;;  %v953_v8 = vshll.u32 %v2967_v31, %v944_v15 }
  0xd8   : > { %v743_v53 = vsel %vm622_vm9, %v742_v25, %v741_v9  ;;  %v873_v60 = vadd.s32 %v872_v5, %v868_v38  ;;  %v956_v30 = vshll.u32 %v2968_v33, %v944_v15  ;;  %v947_v28 = vshll.u32 %v2965_v27, %v944_v15 }
  0xd9   : > { %v3613_v11 = vsel %vm3593_vm12, %v3347_v51, %v743_v53  ;;  %v951_v43 = vshrl.u32 %v2967_v31, %v3615_v42  ;;  %v954_v10 = vshrl.u32 %v2968_v33, %v3615_v42  ;;  %v957_v7 = vshrl.u32 %v2969_v35, %v3615_v42 }
  0xda   : > { %v748_v55 = vmul.f32 %v3613_v11, %v3613_v11  ;;  %v874_v13 = vadd.s32 536870912, %v873_v60  ;;  %v948_v20 = vshrl.u32 %v2966_v29, %v3615_v42  ;;  %v959_v48 = vshll.u32 %v2969_v35, %v944_v15 }
  0xdb   : > { %v960_v45 = vshrl.u32 %v2970_v44, %v3615_v42  ;;  %v3648_v39 = vand.u32 65535, %v3626_v46  ;;  %vm767_vm0 = vcmp.eq.s32.totalorder %v3619_v1, 0  ;;  %v3651_v18 = vor.u32 %v951_v43, %v950_v17 }
  0xdc   : > { %v749_v54 = vmul.f32 -0.001358992, %v748_v55  ;;  %v756_v37 = vmul.f32 -0.00019511016, %v748_v55  ;;  %v3635_v22 = vshrl.u32 %v874_v13, 30  ;;  %v955_v41 = vor.u32 %v954_v10, %v953_v8 }
  0xdd   : > { %v958_v32 = vor.u32 %v957_v7, %v956_v30  ;;  %v961_v47 = vor.u32 %v960_v45, %v959_v48  ;;  %vm766_vm1 = vcmp.lt.s32.totalorder %v3619_v1, 2  ;;  %vm962_vm2 = vcmp.lt.s32.totalorder %v3624_v24, 1 }
  0xde   : > { %v750_v36 = vadd.f32 0.041655596, %v749_v54  ;;  %v757_v40 = vadd.f32 0.008332121, %v756_v37  ;;  %v876_v23 = vshll.u32 %v3635_v22, 30  ;;  %vm763_vm3 = vweird.f32 %v3347_v51 }
  0xdf   : > { %v949_v21 = vor.u32 %v948_v20, %v947_v28  ;;  %vm964_vm4 = vcmp.lt.s32.totalorder %v3624_v24, 3  ;;  %vm965_vm5 = vcmp.lt.s32.totalorder %v3624_v24, 4  ;;  %v2767_v3 = vadd.s32 4294967169, %v1089_v6 }
  0xe0   : > { %v751_v16 = vmul.f32 %v750_v36, %v748_v55  ;;  %v758_v0 = vmul.f32 %v757_v40, %v748_v55  ;;  %v3654_v49 = vsub.s32 %v873_v60, %v876_v23  ;;  %vm777_vm7 = vcmp.lt.s32.totalorder %v3387_v56, 0 }
  0xe1   : > { %vm963_vm8 = vcmp.lt.s32.totalorder %v3624_v24, 2  ;;  %v971_v25 = vsel %vm965_vm5, %v958_v32, 920167782  ;;  %v974_v59 = vsel %vm962_vm2, %v3651_v18, %v955_v41  ;;  %v975_v19 = vsel %vm965_vm5, %v961_v47, 1326507024 }
  0xe2   : > { %v752_v4 = vadd.f32 -0.4999988, %v751_v16  ;;  %v759_v58 = vadd.f32 -0.16666654, %v758_v0  ;;  %vm878_vm6 = vcmp.lt.s32.totalorder %v3654_v49, 0  ;;  %v879_v38 = vsub.s32 0, %v3654_v49 }
  0xe3   : > { %v980_v52 = vshrl.u32 %v3626_v46, 16  ;;  %v970_v5 = vsel %vm962_vm2, %v949_v21, %v3651_v18  ;;  %v3678_v60 = vadd.s32 1, %v2767_v3  ;;  %v972_v37 = vsel %vm964_vm4, %v955_v41, %v971_v25 }
  0xe4   : > { %v753_v9 = vmul.f32 %v752_v4, %v748_v55  ;;  %v760_v63 = vmul.f32 %v759_v58, %v748_v55  ;;  %v880_v15 = vsel %vm878_vm6, %v879_v38, %v3654_v49  ;;  %v976_v55 = vsel %vm964_vm4, %v958_v32, %v975_v19 }
  0xe5   : > { %v881_v53 = vclz %v880_v15  ;;  %v977_v13 = vsel %vm963_vm8, %v974_v59, %v976_v55  ;;  %v3687_v10 = vand.u32 8388607, %v1085_v61  ;;  %v946_v40 = vshrl.u32 %v2965_v27, %v3615_v42 }
  0xe6   : > { %v754_v2 = vadd.f32 1.0, %v753_v9  ;;  %v761_v12 = vadd.f32 1.0, %v760_v63  ;;  %v981_v43 = vand.u32 65535, %v977_v13  ;;  %v982_v8 = vshrl.u32 %v977_v13, 16 }
  0xe7   : > { %v2762_v17 = vadd.s32 4294967294, %v881_v53  ;;  %v967_v7 = vsel %vm965_vm5, %v955_v41, 2102212464  ;;  %v973_v28 = vsel %vm963_vm8, %v970_v5, %v972_v37  ;;  %vm1096_vm10 = vcmp.gt.s32.totalorder %v3678_v60, 0 }
  0xe8   : > { %v762_v6 = vmul.f32 %v761_v12, %v3613_v11  ;;  %v771_v54 = vxor.u32 2147483648, %v754_v2  ;;  %v899_v11 = vsub.s32 4, %v3635_v22  ;;  %v984_v20 = vmul.u32 %v982_v8, %v3648_v39 }
  0xe9   : > { %vm2763_vm9 = vcmp.lt.s32.totalorder %v2762_v17, 0  ;;  %vm3704_vm11 = vcmp.le.f32.partialorder %v775_v14, 0.7853982  ;;  %v983_v16 = vmul.u32 %v981_v43, %v3648_v39  ;;  %v985_v0 = vmul.u32 %v981_v43, %v980_v52 }
  0xea   : > { %v768_v30 = vxor.u32 2147483648, %v762_v6  ;;  %v772_v36 = vsel %vm770_vm15, %v771_v54, %v762_v6  ;;  %v884_v42 = vsel %vm2763_vm9, 0, %v2762_v17  ;;  %v900_v14 = vsel %vm777_vm7, %v899_v11, %v3635_v22 }
  0xeb   : > { %v885_v41 = vsub.s32 32, %v884_v42  ;;  %v886_v32 = vshll.u32 %v3654_v49, %v884_v42  ;;  %v889_v47 = vsub.s32 4294967266, %v884_v42  ;;  %v1003_v58 = vand.u32 65535, %v973_v28 }
  0xec   : > { %v769_v48 = vsel %vm767_vm0, %v754_v2, %v768_v30  ;;  %v1004_v3 = vshrl.u32 %v973_v28, 16  ;;  %v986_v38 = vmul.u32 %v982_v8, %v980_v52  ;;  %v987_v25 = vshll.u32 %v984_v20, 16 }
  0xed   : > { %v773_v23 = vsel %vm766_vm1, %v769_v48, %v772_v36  ;;  %v887_v9 = vshrl.u32 %v3622_v26, %v885_v41  ;;  %v890_v63 = vadd.s32 127, %v889_v47  ;;  %v966_v1 = vsel %vm962_vm2, %v946_v40, %v949_v21 }
  0xee   : > { %v774_v4 = vsel %vm763_vm3, nan, %v773_v23  ;;  %v968_v51 = vsel %vm964_vm4, %v3651_v18, %v967_v7  ;;  %v988_v49 = vshrl.u32 %v984_v20, 16  ;;  %v989_v59 = vshll.u32 %v985_v0, 16 }
  0xef   : > { %2638 = vst [vmem:[%s3378_s17 + $0x18] sm:$0xff] %v774_v4  ;;  %v888_v19 = vor.u32 %v887_v9, %v886_v32  ;;  %v891_v2 = vshll.u32 %v890_v63, 23  ;;  %vm991_vm12 = vc.u32 %v983_v16, %v987_v25  ;;  %v993_v22 = vadd.s32 %v987_v25, %v983_v16 }
  0xf0   : > { %v992_v12 = vsel %vm991_vm12, 1, %v2971_v50  ;;  %v1005_v26 = vmul.u32 %v1003_v58, %v3648_v39  ;;  %v1006_v15 = vmul.u32 %v1004_v3, %v3648_v39  ;;  %v1007_v53 = vmul.u32 %v1003_v58, %v980_v52 }
  0xf1   : > { %v892_v5 = vor.u32 4788187, %v891_v2  ;;  %v895_v55 = vcvt.s32.f32 %v888_v19  ;;  %v994_v21 = vadd.s32 %v992_v12, %v986_v38  ;;  %vm995_vm13 = vc.u32 %v993_v22, %v989_v59 }
  0xf2   : > { %v996_v6 = vsel %vm995_vm13, 1, %v2971_v50  ;;  %v1008_v18 = vmul.u32 %v1004_v3, %v980_v52  ;;  %v1009_v54 = vshll.u32 %v1006_v15, 16  ;;  %v1011_v37 = vshll.u32 %v1007_v53, 16 }
  0xf3   : > { %v893_v13 = vand.u32 2147483647, %v892_v5  ;;  %v902_v17 = vsel %vm3704_vm11, 0, %v900_v14  ;;  %v998_v43 = vadd.s32 %v996_v6, %v994_v21  ;;  %v1093_v8 = vor.u32 8388608, %v3687_v10 }
  0xf4   : > { %v969_v39 = vsel %vm963_vm8, %v966_v1, %v968_v51  ;;  %vm1013_vm14 = vc.u32 %v1005_v26, %v1009_v54  ;;  %v1015_v30 = vadd.s32 %v1009_v54, %v1005_v26  ;;  %v1097_v36 = vsel %vm1096_vm10, %v3678_v60, 0 }
  0xf5   : > { %v896_v11 = vmul.f32 %v895_v55, %v893_v13  ;;  %v990_v52 = vshrl.u32 %v985_v0, 16  ;;  %v999_v40 = vadd.s32 %v998_v43, %v988_v49  ;;  %v1014_v7 = vsel %vm1013_vm14, 1, %v2971_v50 }
  0xf6   : > { %v1010_v28 = vshrl.u32 %v1006_v15, 16  ;;  %v1016_v20 = vadd.s32 %v1014_v7, %v1008_v18  ;;  %vm1017_vm15 = vc.u32 %v1015_v30, %v1011_v37  ;;  %v1099_v48 = vand.u32 31, %v1097_v36 }
  0xf7   : > { %v897_v42 = vxor.u32 2147483648, %v896_v11  ;;  %v919_v10 = vadd.s32 3, %v902_v17  ;;  %v1012_v16 = vshrl.u32 %v1007_v53, 16  ;;  %v1018_v24 = vsel %vm1017_vm15, 1, %v2971_v50 }
  0xf8   : > { %v1020_v23 = vadd.s32 %v1018_v24, %v1016_v20  ;;  %v1023_v41 = vmul.u32 %v3626_v46, %v969_v39  ;;  %v3739_v32 = vshrl.u32 %v1097_v36, 5  ;;  %v3741_v60 = vsub.s32 32, %v1099_v48 }
  0xf9   : > { %v898_v0 = vsel %vm777_vm7, %v897_v42, %v896_v11  ;;  %v3745_v47 = vadd.s32 %v999_v40, %v990_v52  ;;  %v3747_v4 = vadd.s32 %v1015_v30, %v1011_v37  ;;  %v1102_v14 = vshll.u32 %v2965_v27, %v1099_v48 }
  0xfa   : > { %v901_v58 = vsel %vm3704_vm11, %v3387_v56, %v898_v0  ;;  %v1021_v3 = vadd.s32 %v1020_v23, %v1010_v28  ;;  %v1103_v46 = vshrl.u32 %v2966_v29, %v3741_v60  ;;  %v1105_v9 = vshll.u32 %v2966_v29, %v1099_v48 }
  0xfb   : > { %v903_v63 = vmul.f32 %v901_v58, %v901_v58  ;;  %v1106_v38 = vshrl.u32 %v2967_v31, %v3741_v60  ;;  %v1108_v25 = vshll.u32 %v2967_v31, %v1099_v48  ;;  %v1111_v1 = vshll.u32 %v2968_v33, %v1099_v48 }
  0xfc   : > { %v1022_v51 = vadd.s32 %v1021_v3, %v1012_v16  ;;  %v1109_v49 = vshrl.u32 %v2968_v33, %v3741_v60  ;;  %v1112_v45 = vshrl.u32 %v2969_v35, %v3741_v60  ;;  %v1114_v59 = vshll.u32 %v2969_v35, %v1099_v48 }
  0xfd   : > { %v904_v19 = vmul.f32 -0.001358992, %v903_v63  ;;  %v911_v2 = vmul.f32 -0.00019511016, %v903_v63  ;;  %vm1025_vm0 = vc.u32 %v3745_v47, %v3747_v4  ;;  %v3767_v22 = vor.u32 %v1103_v46, %v1102_v14 }
  0xfe   : > { %v1026_v12 = vadd.s32 1, %v1022_v51  ;;  %v3769_v26 = vor.u32 %v1106_v38, %v1105_v9  ;;  %v1113_v15 = vor.u32 %v1112_v45, %v1111_v1  ;;  %v1115_v53 = vshrl.u32 %v2970_v44, %v3741_v60 }
  0xff   : > { %v905_v5 = vadd.f32 0.041655596, %v904_v19  ;;  %v912_v55 = vadd.f32 0.008332121, %v911_v2  ;;  %vm1117_vm1 = vcmp.lt.s32.totalorder %v3739_v32, 1  ;;  %vm1120_vm2 = vcmp.lt.s32.totalorder %v3739_v32, 4 }
 0x100   : > { %v1027_v21 = vsel %vm1025_vm0, %v1026_v12, %v1022_v51  ;;  %v3775_v6 = vor.u32 %v1109_v49, %v1108_v25  ;;  %v1116_v18 = vor.u32 %v1115_v53, %v1114_v59  ;;  %v3777_v54 = vshll.u32 %v1093_v8, 8 }
 0x101   : > { %v906_v37 = vmul.f32 %v905_v5, %v903_v63  ;;  %v913_v13 = vmul.f32 %v912_v55, %v903_v63  ;;  %v1028_v17 = vadd.s32 %v1027_v21, %v1023_v41  ;;  %vm1119_vm3 = vcmp.lt.s32.totalorder %v3739_v32, 3 }
 0x102   : > { %vm1118_vm4 = vcmp.lt.s32.totalorder %v3739_v32, 2  ;;  %v1125_v43 = vsel %vm1117_vm1, %v3767_v22, %v3769_v26  ;;  %v1126_v39 = vsel %vm1120_vm2, %v1113_v15, 920167782  ;;  %v920_v11 = vand.u32 3, %v919_v10 }
 0x103   : > { %v907_v30 = vadd.f32 -0.4999988, %v906_v37  ;;  %v914_v36 = vadd.f32 -0.16666654, %v913_v13  ;;  %v1029_v8 = vadd.s32 536870912, %v1028_v17  ;;  %v1127_v52 = vsel %vm1119_vm3, %v3775_v6, %v1126_v39 }
 0x104   : > { %v1129_v40 = vsel %vm1117_vm1, %v3769_v26, %v3775_v6  ;;  %v1130_v7 = vsel %vm1120_vm2, %v1116_v18, 1326507024  ;;  %v1134_v28 = vand.u32 65535, %v3777_v54  ;;  %v1128_v10 = vsel %vm1118_vm4, %v1125_v43, %v1127_v52 }
 0x105   : > { %v908_v20 = vmul.f32 %v907_v30, %v903_v63  ;;  %v915_v48 = vmul.f32 %v914_v36, %v903_v63  ;;  %v3797_v42 = vshrl.u32 %v1029_v8, 30  ;;  %v1131_v16 = vsel %vm1119_vm3, %v1113_v15, %v1130_v7 }
 0x106   : > { %v1159_v24 = vshrl.u32 %v1128_v10, 16  ;;  %vm918_vm5 = vweird.f32 %v3387_v56  ;;  %vm925_vm6 = vcmp.eq.s32.totalorder %v920_v11, 2  ;;  %v1132_v14 = vsel %vm1118_vm4, %v1129_v40, %v1131_v16 }
 0x107   : > { %v909_v23 = vadd.f32 1.0, %v908_v20  ;;  %v916_v41 = vadd.f32 1.0, %v915_v48  ;;  %v1031_v0 = vshll.u32 %v3797_v42, 30  ;;  %v1135_v3 = vshrl.u32 %v3777_v54, 16 }
 0x108   : > { %v1158_v46 = vand.u32 65535, %v1128_v10  ;;  %v3810_v25 = vmul.u32 %v1159_v24, %v1134_v28  ;;  %vm921_vm7 = vcmp.lt.s32.totalorder %v920_v11, 2  ;;  %vm922_vm8 = vcmp.eq.s32.totalorder %v920_v11, 0 }
 0x109   : > { %v917_v9 = vmul.f32 %v916_v41, %v901_v58  ;;  %v926_v63 = vxor.u32 2147483648, %v909_v23  ;;  %v3808_v38 = vsub.s32 %v1028_v17, %v1031_v0  ;;  %v1136_v1 = vand.u32 65535, %v1132_v14 }
 0x10a   : > { %v1137_v51 = vshrl.u32 %v1132_v14, 16  ;;  %v1160_v15 = vmul.u32 %v1158_v46, %v1134_v28  ;;  %v3815_v5 = vmul.u32 %v1158_v46, %v1135_v3  ;;  %v1164_v55 = vshll.u32 %v3810_v25, 16 }
 0x10b   : > { %v923_v49 = vxor.u32 2147483648, %v917_v9  ;;  %v927_v45 = vsel %vm925_vm6, %v926_v63, %v917_v9  ;;  %vm1033_vm9 = vcmp.lt.s32.totalorder %v3808_v38, 0  ;;  %v1034_v59 = vsub.s32 0, %v3808_v38 }
 0x10c   : > { %v1138_v19 = vmul.u32 %v1136_v1, %v1134_v28  ;;  %v1139_v2 = vmul.u32 %v1137_v51, %v1134_v28  ;;  %v1140_v12 = vmul.u32 %v1136_v1, %v1135_v3  ;;  %v1141_v37 = vmul.u32 %v1137_v51, %v1135_v3 }
 0x10d   : > { %v924_v58 = vsel %vm922_vm8, %v909_v23, %v923_v49  ;;  %v1035_v53 = vsel %vm1033_vm9, %v1034_v59, %v3808_v38  ;;  %v1024_v43 = vadd.s32 %v3747_v4, %v3745_v47  ;;  %v1101_v39 = vshrl.u32 %v2965_v27, %v3741_v60 }
 0x10e   : > { %v928_v21 = vsel %vm921_vm7, %v924_v58, %v927_v45  ;;  %v1036_v18 = vclz %v1035_v53  ;;  %v1142_v13 = vshll.u32 %v1139_v2, 16  ;;  %v1144_v30 = vshll.u32 %v1140_v12, 16 }
 0x10f   : > { %v929_v17 = vsel %vm918_vm5, nan, %v928_v21  ;;  %v1163_v52 = vmul.u32 %v1159_v24, %v1135_v3  ;;  %v1143_v11 = vshrl.u32 %v1139_v2, 16  ;;  %v1166_v7 = vshll.u32 %v3815_v5, 16  ;;  %v3840_v3 = vld [vmem:[%s3076_s24 + $0x38] sm:$0xff] }
 0x110   : > { %v2765_v36 = vadd.s32 4294967294, %v1036_v18  ;;  %vm1146_vm10 = vc.u32 %v1138_v19, %v1142_v13  ;;  %v1148_v8 = vadd.s32 %v1142_v13, %v1138_v19  ;;  %2639 = vst [vmem:[%s3378_s17 + $0x20] sm:$0xff] %v929_v17  ;;  %vm1168_vm11 = vc.u32 %v1160_v15, %v1164_v55 }
 0x111   : > { %v1147_v40 = vsel %vm1146_vm10, 1, %v2971_v50  ;;  %vm932_vm12 = vcmp.lt.s32.totalorder %v3572_v57, 0  ;;  %v1170_v60 = vadd.s32 %v1164_v55, %v1160_v15  ;;  %v1122_v4 = vsel %vm1120_vm2, %v3775_v6, 2102212464  ;;  %v3843_v6 = vld [vmem:[%s3076_s24 + $0x40] sm:$0xff] }
 0x112   : > { %vm2766_vm13 = vcmp.lt.s32.totalorder %v2765_v36, 0  ;;  %v1149_v56 = vadd.s32 %v1147_v40, %v1141_v37  ;;  %vm1150_vm14 = vc.u32 %v1148_v8, %v1144_v30  ;;  %v1169_v20 = vsel %vm1168_vm11, 1, %v2971_v50 }
 0x113   : > { %v1039_v47 = vsel %vm2766_vm13, 0, %v2765_v36  ;;  %v1151_v28 = vsel %vm1150_vm14, 1, %v2971_v50  ;;  %v1121_v23 = vsel %vm1117_vm1, %v1101_v39, %v3767_v22  ;;  %v1145_v41 = vshrl.u32 %v1140_v12, 16 }
 0x114   : > { %v1040_v48 = vsub.s32 32, %v1039_v47  ;;  %v1041_v10 = vshll.u32 %v3808_v38, %v1039_v47  ;;  %v1044_v16 = vsub.s32 4294967266, %v1039_v47  ;;  %v1153_v24 = vadd.s32 %v1151_v28, %v1149_v56 }
 0x115   : > { %v1165_v0 = vshrl.u32 %v3810_v25, 16  ;;  %v1171_v14 = vadd.s32 %v1169_v20, %v1163_v52  ;;  %vm1172_vm15 = vc.u32 %v1170_v60, %v1166_v7  ;;  %v1054_v38 = vsub.s32 4, %v3797_v42 }
 0x116   : > { %v1042_v46 = vshrl.u32 %v1024_v43, %v1040_v48  ;;  %v1045_v9 = vadd.s32 127, %v1044_v16  ;;  %v1154_v63 = vadd.s32 %v1153_v24, %v1143_v11  ;;  %v1123_v1 = vsel %vm1119_vm3, %v3769_v26, %v1122_v4 }
 0x117   : > { %v1173_v22 = vsel %vm1172_vm15, 1, %v2971_v50  ;;  %v1240_v51 = vand.u32 2147483647, %v3840_v3  ;;  %v1167_v45 = vshrl.u32 %v3815_v5, 16  ;;  %v1174_v2 = vadd.s32 %v1170_v60, %v1166_v7 }
 0x118   : > { %v1043_v25 = vor.u32 %v1042_v46, %v1041_v10  ;;  %v1046_v49 = vshll.u32 %v1045_v9, 23  ;;  %v1175_v59 = vadd.s32 %v1173_v22, %v1171_v14  ;;  %v1155_v19 = vadd.s32 %v1154_v63, %v1145_v41 }
 0x119   : > { %v1243_v12 = vand.u32 2139095040, %v3840_v3  ;;  %v1398_v15 = vand.u32 2139095040, %v3843_v6  ;;  %v1124_v26 = vsel %vm1118_vm4, %v1121_v23, %v1123_v1  ;;  %v1055_v21 = vsel %vm932_vm12, %v1054_v38, %v3797_v42 }
 0x11a   : > { %v1047_v58 = vor.u32 4788187, %v1046_v49  ;;  %v1050_v53 = vcvt.s32.f32 %v1043_v25  ;;  %v1176_v55 = vadd.s32 %v1175_v59, %v1165_v0  ;;  %v1247_v5 = vand.u32 8388607, %v1240_v51 }
 0x11b   : > { %v1244_v18 = vshrl.u32 %v1243_v12, 23  ;;  %v1399_v37 = vshrl.u32 %v1398_v15, 23  ;;  %vm3863_vm0 = vcmp.le.f32.partialorder %v930_v62, 0.7853982  ;;  %v1178_v32 = vmul.u32 %v3777_v54, %v1124_v26 }
 0x11c   : > { %v1048_v17 = vand.u32 2147483647, %v1047_v58  ;;  %v1177_v43 = vadd.s32 %v1176_v55, %v1167_v45  ;;  %vm1180_vm1 = vc.u32 %v1155_v19, %v1174_v2  ;;  %v1057_v42 = vsel %vm3863_vm0, 0, %v1055_v21 }
 0x11d   : > { %v2770_v39 = vadd.s32 4294967169, %v1244_v18  ;;  %v2773_v30 = vadd.s32 4294967169, %v1399_v37  ;;  %v1248_v52 = vor.u32 8388608, %v1247_v5  ;;  %v1074_v62 = vadd.s32 3, %v1057_v42 }
 0x11e   : > { %v1051_v36 = vmul.f32 %v1050_v53, %v1048_v17  ;;  %v1181_v8 = vadd.s32 1, %v1177_v43  ;;  %v1395_v4 = vand.u32 2147483647, %v3843_v6  ;;  %v3882_v14 = vadd.s32 %v1174_v2, %v1155_v19 }
 0x11f   : > { %v1250_v11 = vadd.s32 1, %v2770_v39  ;;  %v1405_v60 = vadd.s32 1, %v2773_v30  ;;  %v3876_v10 = vshll.u32 %v1248_v52, 8  ;;  %v3878_v24 = vand.u32 3, %v1074_v62 }
 0x120   : > { %v1052_v40 = vxor.u32 2147483648, %v1051_v36  ;;  %v1182_v7 = vsel %vm1180_vm1, %v1181_v8, %v1177_v43  ;;  %v3893_v1 = vand.u32 8388607, %v1395_v4  ;;  %vm1087_vm8 = vcmp.lt.s32.totalorder %v3604_v34, 0 }
 0x121   : > { %v1183_v56 = vadd.s32 %v1182_v7, %v1178_v32  ;;  %vm1251_vm2 = vcmp.gt.s32.totalorder %v1250_v11, 0  ;;  %vm1406_vm3 = vcmp.gt.s32.totalorder %v1405_v60, 0  ;;  %v3886_v63 = vand.u32 65535, %v3876_v10 }
 0x122   : > { %v1053_v47 = vsel %vm932_vm12, %v1052_v40, %v1051_v36  ;;  %v1252_v54 = vsel %vm1251_vm2, %v1250_v11, 0  ;;  %v3889_v38 = vshrl.u32 %v3876_v10, 16  ;;  %v3897_v45 = vsel %vm1406_vm3, %v1405_v60, 0 }
 0x123   : > { %v1056_v28 = vsel %vm3863_vm0, %v3572_v57, %v1053_v47  ;;  %v1184_v20 = vadd.s32 536870912, %v1183_v56  ;;  %v1254_v48 = vand.u32 31, %v1252_v54  ;;  %v3895_v49 = vshrl.u32 %v1252_v54, 5 }
 0x124   : > { %v1058_v16 = vmul.f32 %v1056_v28, %v1056_v28  ;;  %vm1080_vm4 = vcmp.eq.s32.totalorder %v3878_v24, 2  ;;  %v3905_v12 = vshrl.u32 %v3897_v45, 5  ;;  %vm1077_vm5 = vcmp.eq.s32.totalorder %v3878_v24, 0 }
 0x125   : > { %v3880_v23 = vshrl.u32 %v1184_v20, 30  ;;  %v1255_v46 = vsub.s32 32, %v1254_v48  ;;  %v1257_v19 = vshll.u32 %v2965_v27, %v1254_v48  ;;  %v1260_v2 = vshll.u32 %v2966_v29, %v1254_v48 }
 0x126   : > { %v1059_v41 = vmul.f32 -0.001358992, %v1058_v16  ;;  %v1066_v0 = vmul.f32 -0.00019511016, %v1058_v16  ;;  %v1266_v53 = vshll.u32 %v2968_v33, %v1254_v48  ;;  %vm1076_vm7 = vcmp.lt.s32.totalorder %v3878_v24, 2 }
 0x127   : > { %v1186_v9 = vshll.u32 %v3880_v23, 30  ;;  %v1267_v26 = vshrl.u32 %v2969_v35, %v1255_v46  ;;  %v1258_v21 = vshrl.u32 %v2966_v29, %v1255_v46  ;;  %v1261_v18 = vshrl.u32 %v2967_v31, %v1255_v46 }
 0x128   : > { %v1060_v22 = vadd.f32 0.041655596, %v1059_v41  ;;  %v1067_v25 = vadd.f32 0.008332121, %v1066_v0  ;;  %v1269_v13 = vshll.u32 %v2969_v35, %v1254_v48  ;;  %v1270_v17 = vshrl.u32 %v2970_v44, %v1255_v46 }
 0x129   : > { %v3900_v59 = vsub.s32 %v1183_v56, %v1186_v9  ;;  %vm1073_vm9 = vweird.f32 %v3572_v57  ;;  %v1209_v32 = vsub.s32 4, %v3880_v23  ;;  %v1263_v39 = vshll.u32 %v2967_v31, %v1254_v48 }
 0x12a   : > { %v1061_v15 = vmul.f32 %v1060_v22, %v1058_v16  ;;  %v1068_v58 = vmul.f32 %v1067_v25, %v1058_v16  ;;  %v1264_v30 = vshrl.u32 %v2968_v33, %v1255_v46  ;;  %v1268_v52 = vor.u32 %v1267_v26, %v1266_v53 }
 0x12b   : > { %vm1188_vm6 = vcmp.lt.s32.totalorder %v3900_v59, 0  ;;  %v1189_v55 = vsub.s32 0, %v3900_v59  ;;  %v1259_v11 = vor.u32 %v1258_v21, %v1257_v19  ;;  %v1262_v40 = vor.u32 %v1261_v18, %v1260_v2 }
 0x12c   : > { %v1062_v5 = vadd.f32 -0.4999988, %v1061_v15  ;;  %v1069_v37 = vadd.f32 -0.16666654, %v1068_v58  ;;  %v1271_v7 = vor.u32 %v1270_v17, %v1269_v13  ;;  %vm1275_vm10 = vcmp.lt.s32.totalorder %v3895_v49, 4 }
 0x12d   : > { %v1190_v43 = vsel %vm1188_vm6, %v1189_v55, %v3900_v59  ;;  %vm1272_vm11 = vcmp.lt.s32.totalorder %v3895_v49, 1  ;;  %vm3927_vm12 = vcmp.le.f32.partialorder %v1085_v61, 0.7853982  ;;  %v1256_v54 = vshrl.u32 %v2965_v27, %v1255_v46 }
 0x12e   : > { %v1063_v36 = vmul.f32 %v1062_v5, %v1058_v16  ;;  %v1070_v42 = vmul.f32 %v1069_v37, %v1058_v16  ;;  %v1191_v8 = vclz %v1190_v43  ;;  %v1265_v20 = vor.u32 %v1264_v30, %v1263_v39 }
 0x12f   : > { %vm1273_vm13 = vcmp.lt.s32.totalorder %v3895_v49, 2  ;;  %vm1274_vm14 = vcmp.lt.s32.totalorder %v3895_v49, 3  ;;  %v1281_v41 = vsel %vm1275_vm10, %v1268_v52, 920167782  ;;  %v1280_v9 = vsel %vm1272_vm11, %v1259_v11, %v1262_v40 }
 0x130   : > { %v1064_v62 = vadd.f32 1.0, %v1063_v36  ;;  %v1071_v56 = vadd.f32 1.0, %v1070_v42  ;;  %v2768_v60 = vadd.s32 4294967294, %v1191_v8  ;;  %v1277_v61 = vsel %vm1275_vm10, %v1265_v20, 2102212464 }
 0x131   : > { %v1285_v46 = vsel %vm1275_vm10, %v1271_v7, 1326507024  ;;  %v1210_v15 = vsel %vm1087_vm8, %v1209_v32, %v3880_v23  ;;  %v1282_v58 = vsel %vm1274_vm14, %v1265_v20, %v1281_v41  ;;  %v1284_v53 = vsel %vm1272_vm11, %v1262_v40, %v1265_v20 }
 0x132   : > { %v1072_v48 = vmul.f32 %v1071_v56, %v1056_v28  ;;  %v1081_v16 = vxor.u32 2147483648, %v1064_v62  ;;  %vm2769_vm15 = vcmp.lt.s32.totalorder %v2768_v60, 0  ;;  %v1286_v21 = vsel %vm1274_vm14, %v1268_v52, %v1285_v46 }
 0x133   : > { %v1194_v0 = vsel %vm2769_vm15, 0, %v2768_v60  ;;  %v1278_v5 = vsel %vm1274_vm14, %v1262_v40, %v1277_v61  ;;  %v1283_v37 = vsel %vm1273_vm13, %v1280_v9, %v1282_v58  ;;  %v1287_v17 = vsel %vm1273_vm13, %v1284_v53, %v1286_v21 }
 0x134   : > { %v1078_v22 = vxor.u32 2147483648, %v1072_v48  ;;  %v1082_v25 = vsel %vm1080_vm4, %v1081_v16, %v1072_v48  ;;  %v1195_v28 = vsub.s32 32, %v1194_v0  ;;  %v1196_v19 = vshll.u32 %v3900_v59, %v1194_v0 }
 0x135   : > { %v1199_v2 = vsub.s32 4294967266, %v1194_v0  ;;  %v1276_v59 = vsel %vm1272_vm11, %v1256_v54, %v1259_v11  ;;  %v3970_v43 = vand.u32 31, %v3897_v45  ;;  %v1291_v24 = vand.u32 65535, %v1287_v17 }
 0x136   : > { %v1079_v26 = vsel %vm1077_vm5, %v1064_v62, %v1078_v22  ;;  %v1197_v55 = vshrl.u32 %v3882_v14, %v1195_v28  ;;  %v1292_v39 = vshrl.u32 %v1287_v17, 16  ;;  %v1313_v30 = vand.u32 65535, %v1283_v37 }
 0x137   : > { %v1083_v23 = vsel %vm1076_vm7, %v1079_v26, %v1082_v25  ;;  %v1200_v18 = vadd.s32 127, %v1199_v2  ;;  %v1212_v42 = vsel %vm3927_vm12, 0, %v1210_v15  ;;  %v3977_v57 = vsel %vm1273_vm13, %v1276_v59, %v1278_v5 }
 0x138   : > { %v1084_v13 = vsel %vm1073_vm9, nan, %v1083_v23  ;;  %v1198_v14 = vor.u32 %v1197_v55, %v1196_v19  ;;  %v1314_v8 = vshrl.u32 %v1283_v37, 16  ;;  %v1293_v11 = vmul.u32 %v1291_v24, %v3886_v63 }
 0x139   : > { %v1201_v32 = vshll.u32 %v1200_v18, 23  ;;  %2640 = vst [vmem:[%s3378_s17 + $0x28] sm:$0xff] %v1084_v13  ;;  %v1294_v45 = vmul.u32 %v1292_v39, %v3886_v63  ;;  %v1295_v40 = vmul.u32 %v1291_v24, %v3889_v38  ;;  %v1315_v7 = vmul.u32 %v1313_v30, %v3886_v63 }
 0x13a   : > { %v1205_v36 = vcvt.s32.f32 %v1198_v14  ;;  %v1316_v62 = vmul.u32 %v1314_v8, %v3886_v63  ;;  %v1317_v56 = vmul.u32 %v1313_v30, %v3889_v38  ;;  %v3986_v60 = vsub.s32 32, %v3970_v43 }
 0x13b   : > { %v1202_v52 = vor.u32 4788187, %v1201_v32  ;;  %v1296_v54 = vmul.u32 %v1292_v39, %v3889_v38  ;;  %v1297_v20 = vshll.u32 %v1294_v45, 16  ;;  %v1299_v48 = vshll.u32 %v1295_v40, 16 }
 0x13c   : > { %v3989_v16 = vadd.s32 3, %v1212_v42  ;;  %v1318_v41 = vmul.u32 %v1314_v8, %v3889_v38  ;;  %v1319_v0 = vshll.u32 %v1316_v62, 16  ;;  %v1333_v61 = vmul.u32 %v3876_v10, %v3977_v57 }
 0x13d   : > { %v1203_v49 = vand.u32 2147483647, %v1202_v52  ;;  %vm1301_vm0 = vc.u32 %v1293_v11, %v1297_v20  ;;  %v1303_v63 = vadd.s32 %v1297_v20, %v1293_v11  ;;  %v1321_v46 = vshll.u32 %v1317_v56, 16 }
 0x13e   : > { %v1298_v22 = vshrl.u32 %v1294_v45, 16  ;;  %v1302_v25 = vsel %vm1301_vm0, 1, %v2971_v50  ;;  %vm1323_vm1 = vc.u32 %v1315_v7, %v1319_v0  ;;  %v1325_v28 = vadd.s32 %v1319_v0, %v1315_v7 }
 0x13f   : > { %v1206_v9 = vmul.f32 %v1205_v36, %v1203_v49  ;;  %v1304_v2 = vadd.s32 %v1302_v25, %v1296_v54  ;;  %vm1305_vm2 = vc.u32 %v1303_v63, %v1299_v48  ;;  %v1324_v15 = vsel %vm1323_vm1, 1, %v2971_v50 }
 0x140   : > { %v1306_v38 = vsel %vm1305_vm2, 1, %v2971_v50  ;;  %v1320_v58 = vshrl.u32 %v1316_v62, 16  ;;  %v1326_v53 = vadd.s32 %v1324_v15, %v1318_v41  ;;  %vm1327_vm3 = vc.u32 %v1325_v28, %v1321_v46 }
 0x141   : > { %v1207_v19 = vxor.u32 2147483648, %v1206_v9  ;;  %v1300_v26 = vshrl.u32 %v1295_v40, 16  ;;  %v1308_v55 = vadd.s32 %v1306_v38, %v1304_v2  ;;  %v1328_v59 = vsel %vm1327_vm3, 1, %v2971_v50 }
 0x142   : > { %v1322_v23 = vshrl.u32 %v1317_v56, 16  ;;  %v4003_v18 = vadd.s32 %v1325_v28, %v1321_v46  ;;  %v1330_v5 = vadd.s32 %v1328_v59, %v1326_v53  ;;  %v1412_v14 = vshll.u32 %v2965_v27, %v3970_v43 }
 0x143   : > { %v1208_v10 = vsel %vm1087_vm8, %v1207_v19, %v1206_v9  ;;  %v1309_v13 = vadd.s32 %v1308_v55, %v1298_v22  ;;  %v1413_v17 = vshrl.u32 %v2966_v29, %v3986_v60  ;;  %v1415_v24 = vshll.u32 %v2966_v29, %v3970_v43 }
 0x144   : > { %v1211_v21 = vsel %vm3927_vm12, %v3604_v34, %v1208_v10  ;;  %v1331_v32 = vadd.s32 %v1330_v5, %v1320_v58  ;;  %v1416_v47 = vshrl.u32 %v2967_v31, %v3986_v60  ;;  %v1421_v34 = vshll.u32 %v2968_v33, %v3970_v43 }
 0x145   : > { %v1213_v37 = vmul.f32 %v1211_v21, %v1211_v21  ;;  %v4015_v36 = vadd.s32 %v1309_v13, %v1300_v26  ;;  %v1418_v42 = vshll.u32 %v2967_v31, %v3970_v43  ;;  %v1419_v8 = vshrl.u32 %v2968_v33, %v3986_v60 }
 0x146   : > { %v1332_v57 = vadd.s32 %v1331_v32, %v1322_v23  ;;  %v1422_v52 = vshrl.u32 %v2969_v35, %v3986_v60  ;;  %v1424_v11 = vshll.u32 %v2969_v35, %v3970_v43  ;;  %v4027_v7 = vor.u32 %v1413_v17, %v1412_v14 }
 0x147   : > { %v1214_v39 = vmul.f32 -0.001358992, %v1213_v37  ;;  %v1221_v30 = vmul.f32 -0.00019511016, %v1213_v37  ;;  %vm1335_vm4 = vc.u32 %v4015_v36, %v4003_v18  ;;  %v4029_v56 = vor.u32 %v1416_v47, %v1415_v24 }
 0x148   : > { %v1336_v62 = vadd.s32 1, %v1332_v57  ;;  %v1423_v49 = vor.u32 %v1422_v52, %v1421_v34  ;;  %v1425_v54 = vshrl.u32 %v2970_v44, %v3986_v60  ;;  %v1403_v41 = vor.u32 8388608, %v3893_v1 }
 0x149   : > { %v1215_v45 = vadd.f32 0.041655596, %v1214_v39  ;;  %v1222_v40 = vadd.f32 0.008332121, %v1221_v30  ;;  %vm1427_vm5 = vcmp.lt.s32.totalorder %v3905_v12, 1  ;;  %v1420_v0 = vor.u32 %v1419_v8, %v1418_v42  ;;  %v2862_v30 = vld [vmem:[%s3076_s24 + $0x30] sm:$0xff] }
 0x14a   : > { %v1337_v43 = vsel %vm1335_vm4, %v1336_v62, %v1332_v57  ;;  %v1426_v9 = vor.u32 %v1425_v54, %v1424_v11  ;;  %vm1430_vm6 = vcmp.lt.s32.totalorder %v3905_v12, 4  ;;  %vm1429_vm7 = vcmp.lt.s32.totalorder %v3905_v12, 3 }
 0x14b   : > { %v1216_v20 = vmul.f32 %v1215_v45, %v1213_v37  ;;  %v1223_v48 = vmul.f32 %v1222_v40, %v1213_v37  ;;  %v1338_v22 = vadd.s32 %v1337_v43, %v1333_v61  ;;  %v1230_v25 = vand.u32 3, %v3989_v16 }
 0x14c   : > { %vm1428_vm8 = vcmp.lt.s32.totalorder %v3905_v12, 2  ;;  %v1435_v1 = vsel %vm1427_vm5, %v4027_v7, %v4029_v56  ;;  %v1436_v28 = vsel %vm1430_vm6, %v1423_v49, 920167782  ;;  %v1439_v16 = vsel %vm1427_vm5, %v4029_v56, %v1420_v0 }
 0x14d   : > { %v1217_v63 = vadd.f32 -0.4999988, %v1216_v20  ;;  %v1224_v46 = vadd.f32 -0.16666654, %v1223_v48  ;;  %v1339_v15 = vadd.s32 536870912, %v1338_v22  ;;  %v1437_v61 = vsel %vm1429_vm7, %v1420_v0, %v1436_v28 }
 0x14e   : > { %v1440_v38 = vsel %vm1430_vm6, %v1426_v9, 1326507024  ;;  %v1438_v26 = vsel %vm1428_vm8, %v1435_v1, %v1437_v61  ;;  %vm1231_vm9 = vcmp.lt.s32.totalorder %v1230_v25, 2  ;;  %vm1235_vm10 = vcmp.eq.s32.totalorder %v1230_v25, 2 }
 0x14f   : > { %v1218_v19 = vmul.f32 %v1217_v63, %v1213_v37  ;;  %v1225_v2 = vmul.f32 %v1224_v46, %v1213_v37  ;;  %v4052_v10 = vshrl.u32 %v1339_v15, 30  ;;  %v1441_v55 = vsel %vm1429_vm7, %v1423_v49, %v1440_v38 }
 0x150   : > { %v4058_v59 = vshll.u32 %v1403_v41, 8  ;;  %v1469_v13 = vshrl.u32 %v1438_v26, 16  ;;  %vm1232_vm11 = vcmp.eq.s32.totalorder %v1230_v25, 0  ;;  %v1442_v14 = vsel %vm1428_vm8, %v1439_v16, %v1441_v55 }
 0x151   : > { %v1219_v58 = vadd.f32 1.0, %v1218_v19  ;;  %v1226_v53 = vadd.f32 1.0, %v1225_v2  ;;  %v1341_v37 = vshll.u32 %v4052_v10, 30  ;;  %v1468_v39 = vand.u32 65535, %v1438_v26 }
 0x152   : > { %v1444_v17 = vand.u32 65535, %v4058_v59  ;;  %v1445_v32 = vshrl.u32 %v4058_v59, 16  ;;  %vm1228_vm12 = vweird.f32 %v2862_v30  ;;  %v1446_v42 = vand.u32 65535, %v1442_v14 }
 0x153   : > { %v1227_v23 = vmul.f32 %v1226_v53, %v1211_v21  ;;  %v1236_v5 = vxor.u32 2147483648, %v1219_v58  ;;  %v1342_v34 = vsub.s32 %v1338_v22, %v1341_v37  ;;  %v1447_v21 = vshrl.u32 %v1442_v14, 16  ;;  %v4082_v53 = vld [vmem:[%s3076_s24 + $0x48] sm:$0xff] }
 0x154   : > { %v4066_v52 = vmul.u32 %v1469_v13, %v1444_v17  ;;  %v1448_v45 = vmul.u32 %v1446_v42, %v1444_v17  ;;  %v1450_v62 = vmul.u32 %v1446_v42, %v1445_v32  ;;  %v1470_v20 = vmul.u32 %v1468_v39, %v1444_v17 }
 0x155   : > { %v1233_v24 = vxor.u32 2147483648, %v1227_v23  ;;  %v1237_v47 = vsel %vm1235_vm10, %v1236_v5, %v1227_v23  ;;  %vm1343_vm13 = vcmp.lt.s32.totalorder %v1342_v34, 0  ;;  %v1344_v8 = vsub.s32 0, %v1342_v34 }
 0x156   : > { %v1449_v40 = vmul.u32 %v1447_v21, %v1444_v17  ;;  %v1451_v41 = vmul.u32 %v1447_v21, %v1445_v32  ;;  %v1454_v9 = vshll.u32 %v1450_v62, 16  ;;  %v1334_v63 = vadd.s32 %v4003_v18, %v4015_v36 }
 0x157   : > { %v1234_v57 = vsel %vm1232_vm11, %v1219_v58, %v1233_v24  ;;  %v1345_v54 = vsel %vm1343_vm13, %v1344_v8, %v1342_v34  ;;  %v1411_v46 = vshrl.u32 %v2965_v27, %v3986_v60  ;;  %v1472_v22 = vmul.u32 %v1468_v39, %v1445_v32 }
 0x158   : > { %v1238_v11 = vsel %vm1231_vm9, %v1234_v57, %v1237_v47  ;;  %v1346_v48 = vclz %v1345_v54  ;;  %v1452_v43 = vshll.u32 %v1449_v40, 16  ;;  %v1474_v25 = vshll.u32 %v4066_v52, 16 }
 0x159   : > { %v1239_v49 = vsel %vm1228_vm12, nan, %v1238_v11  ;;  %v1432_v28 = vsel %vm1430_vm6, %v1420_v0, 2102212464  ;;  %v1364_v2 = vsub.s32 4, %v4052_v10  ;;  %v1453_v15 = vshrl.u32 %v1449_v40, 16 }
 0x15a   : > { %2641 = vst [vmem:[%s3378_s17 + $0x30] sm:$0xff] %v1239_v49  ;;  %v2771_v1 = vadd.s32 4294967294, %v1346_v48  ;;  %vm1456_vm14 = vc.u32 %v1448_v45, %v1452_v43  ;;  %v1458_v19 = vadd.s32 %v1452_v43, %v1448_v45  ;;  %vm1478_vm15 = vc.u32 %v1470_v20, %v1474_v25 }
 0x15b   : > { %v1457_v61 = vsel %vm1456_vm14, 1, %v2971_v50  ;;  %v1473_v60 = vmul.u32 %v1469_v13, %v1445_v32  ;;  %v1476_v38 = vshll.u32 %v1472_v22, 16  ;;  %v1479_v58 = vsel %vm1478_vm15, 1, %v2971_v50 }
 0x15c   : > { %vm2772_vm0 = vcmp.lt.s32.totalorder %v2771_v1, 0  ;;  %v1459_v18 = vadd.s32 %v1457_v61, %v1451_v41  ;;  %vm1460_vm1 = vc.u32 %v1458_v19, %v1454_v9  ;;  %vm1242_vm2 = vcmp.lt.s32.totalorder %v3840_v3, 0 }
 0x15d   : > { %v1349_v36 = vsel %vm2772_vm0, 0, %v2771_v1  ;;  %v1461_v16 = vsel %vm1460_vm1, 1, %v2971_v50  ;;  %v1431_v5 = vsel %vm1427_vm5, %v1411_v46, %v4027_v7  ;;  %v1455_v37 = vshrl.u32 %v1450_v62, 16  ;;  %v4116_v1 = vld [vmem:[%s3076_s24 + $0x50] sm:$0xff] }
 0x15e   : > { %v1350_v0 = vsub.s32 32, %v1349_v36  ;;  %v1351_v26 = vshll.u32 %v1342_v34, %v1349_v36  ;;  %v1354_v55 = vsub.s32 4294967266, %v1349_v36  ;;  %v1463_v23 = vadd.s32 %v1461_v16, %v1459_v18 }
 0x15f   : > { %v1480_v13 = vadd.s32 %v1474_v25, %v1470_v20  ;;  %v1481_v24 = vadd.s32 %v1479_v58, %v1473_v60  ;;  %v1433_v47 = vsel %vm1429_vm7, %v4029_v56, %v1432_v28  ;;  %v1475_v34 = vshrl.u32 %v4066_v52, 16 }
 0x160   : > { %v1352_v14 = vshrl.u32 %v1334_v63, %v1350_v0  ;;  %v1355_v17 = vadd.s32 127, %v1354_v55  ;;  %v1464_v32 = vadd.s32 %v1463_v23, %v1453_v15  ;;  %v1553_v39 = vand.u32 2139095040, %v4082_v53 }
 0x161   : > { %vm1482_vm3 = vc.u32 %v1480_v13, %v1476_v38  ;;  %v1365_v7 = vsel %vm1242_vm2, %v1364_v2, %v4052_v10  ;;  %vm4099_vm4 = vcmp.le.f32.partialorder %v1240_v51, 0.7853982  ;;  %v1477_v56 = vshrl.u32 %v1472_v22, 16 }
 0x162   : > { %v1353_v30 = vor.u32 %v1352_v14, %v1351_v26  ;;  %v1356_v42 = vshll.u32 %v1355_v17, 23  ;;  %v1483_v21 = vsel %vm1482_vm3, 1, %v2971_v50  ;;  %v1554_v52 = vshrl.u32 %v1553_v39, 23 }
 0x163   : > { %v1485_v8 = vadd.s32 %v1483_v21, %v1481_v24  ;;  %v4103_v40 = vadd.s32 %v1464_v32, %v1455_v37  ;;  %v4105_v62 = vadd.s32 %v1480_v13, %v1476_v38  ;;  %v1367_v10 = vsel %vm4099_vm4, 0, %v1365_v7 }
 0x164   : > { %v1357_v11 = vor.u32 4788187, %v1356_v42  ;;  %v1360_v45 = vcvt.s32.f32 %v1353_v30  ;;  %v1434_v49 = vsel %vm1428_vm8, %v1431_v5, %v1433_v47  ;;  %v2776_v54 = vadd.s32 4294967169, %v1554_v52 }
 0x165   : > { %v1486_v51 = vadd.s32 %v1485_v8, %v1475_v34  ;;  %v1384_v9 = vadd.s32 3, %v1367_v10  ;;  %v1488_v63 = vmul.u32 %v4058_v59, %v1434_v49  ;;  %vm1490_vm5 = vc.u32 %v4103_v40, %v4105_v62 }
 0x166   : > { %v1358_v20 = vand.u32 2147483647, %v1357_v11  ;;  %v1560_v41 = vadd.s32 1, %v2776_v54  ;;  %v1550_v22 = vand.u32 2147483647, %v4082_v53  ;;  %v1708_v0 = vand.u32 2139095040, %v4116_v1 }
 0x167   : > { %v1487_v48 = vadd.s32 %v1486_v51, %v1477_v56  ;;  %v4120_v15 = vand.u32 3, %v1384_v9  ;;  %v1705_v36 = vand.u32 2147483647, %v4116_v1  ;;  %vm1397_vm8 = vcmp.lt.s32.totalorder %v3843_v6, 0 }
 0x168   : > { %v1361_v43 = vmul.f32 %v1360_v45, %v1358_v20  ;;  %vm1561_vm6 = vcmp.gt.s32.totalorder %v1560_v41, 0  ;;  %v1557_v18 = vand.u32 8388607, %v1550_v22  ;;  %v1709_v8 = vshrl.u32 %v1708_v0, 23 }
 0x169   : > { %v1491_v46 = vadd.s32 1, %v1487_v48  ;;  %v1562_v12 = vsel %vm1561_vm6, %v1560_v41, 0  ;;  %vm1390_vm7 = vcmp.eq.s32.totalorder %v4120_v15, 2  ;;  %vm1387_vm9 = vcmp.eq.s32.totalorder %v4120_v15, 0 }
 0x16a   : > { %v1362_v25 = vxor.u32 2147483648, %v1361_v43  ;;  %v1564_v19 = vand.u32 31, %v1562_v12  ;;  %v4144_v32 = vshrl.u32 %v1562_v12, 5  ;;  %v1558_v7 = vor.u32 8388608, %v1557_v18 }
 0x16b   : > { %v1492_v28 = vsel %vm1490_vm5, %v1491_v46, %v1487_v48  ;;  %vm1386_vm12 = vcmp.lt.s32.totalorder %v4120_v15, 2  ;;  %vm1383_vm14 = vweird.f32 %v3840_v3  ;;  %vm4169_vm15 = vcmp.le.f32.partialorder %v1395_v4, 0.7853982 }
 0x16c   : > { %v1363_v2 = vsel %vm1242_vm2, %v1362_v25, %v1361_v43  ;;  %v1493_v61 = vadd.s32 %v1492_v28, %v1488_v63  ;;  %v4129_v60 = vsub.s32 32, %v1564_v19  ;;  %v1567_v58 = vshll.u32 %v2965_v27, %v1564_v19 }
 0x16d   : > { %v4125_v59 = vsel %vm4099_vm4, %v3840_v3, %v1363_v2  ;;  %v1570_v55 = vshll.u32 %v2966_v29, %v1564_v19  ;;  %v1576_v5 = vshll.u32 %v2968_v33, %v1564_v19  ;;  %v1573_v24 = vshll.u32 %v2967_v31, %v1564_v19 }
 0x16e   : > { %v1368_v16 = vmul.f32 %v4125_v59, %v4125_v59  ;;  %v1494_v38 = vadd.s32 536870912, %v1493_v61  ;;  %v1568_v26 = vshrl.u32 %v2966_v29, %v4129_v60  ;;  %v1571_v23 = vshrl.u32 %v2967_v31, %v4129_v60 }
 0x16f   : > { %v1577_v17 = vshrl.u32 %v2969_v35, %v4129_v60  ;;  %v1574_v47 = vshrl.u32 %v2968_v33, %v4129_v60  ;;  %v1579_v34 = vshll.u32 %v2969_v35, %v1564_v19  ;;  %v1580_v56 = vshrl.u32 %v2970_v44, %v4129_v60 }
 0x170   : > { %v1369_v37 = vmul.f32 -0.001358992, %v1368_v16  ;;  %v1376_v13 = vmul.f32 -0.00019511016, %v1368_v16  ;;  %v1495_v14 = vshrl.u32 %v1494_v38, 30  ;;  %v4151_v21 = vor.u32 %v1568_v26, %v1567_v58 }
 0x171   : > { %v1578_v57 = vor.u32 %v1577_v17, %v1576_v5  ;;  %v4158_v10 = vor.u32 %v1571_v23, %v1570_v55  ;;  %v1575_v49 = vor.u32 %v1574_v47, %v1573_v24  ;;  %v1581_v51 = vor.u32 %v1580_v56, %v1579_v34 }
 0x172   : > { %v1370_v39 = vadd.f32 0.041655596, %v1369_v37  ;;  %v1377_v30 = vadd.f32 0.008332121, %v1376_v13  ;;  %v1496_v42 = vshll.u32 %v1495_v14, 30  ;;  %vm1582_vm10 = vcmp.lt.s32.totalorder %v4144_v32, 1 }
 0x173   : > { %vm1585_vm11 = vcmp.lt.s32.totalorder %v4144_v32, 4  ;;  %v1489_v43 = vadd.s32 %v4105_v62, %v4103_v40  ;;  %vm1584_vm0 = vcmp.lt.s32.totalorder %v4144_v32, 3  ;;  %v4178_v63 = vshll.u32 %v1558_v7, 8 }
 0x174   : > { %v1371_v52 = vmul.f32 %v1370_v39, %v1368_v16  ;;  %v1378_v11 = vmul.f32 %v1377_v30, %v1368_v16  ;;  %v4156_v45 = vsub.s32 %v1493_v61, %v1496_v42  ;;  %v1591_v9 = vsel %vm1585_vm11, %v1578_v57, 920167782 }
 0x175   : > { %v2779_v28 = vadd.s32 4294967169, %v1709_v8  ;;  %v1519_v4 = vsub.s32 4, %v1495_v14  ;;  %vm1583_vm1 = vcmp.lt.s32.totalorder %v4144_v32, 2  ;;  %v1590_v40 = vsel %vm1582_vm10, %v4151_v21, %v4158_v10 }
 0x176   : > { %v1372_v54 = vadd.f32 -0.4999988, %v1371_v52  ;;  %v1379_v20 = vadd.f32 -0.16666654, %v1378_v11  ;;  %vm1498_vm13 = vcmp.lt.s32.totalorder %v4156_v45, 0  ;;  %v1499_v48 = vsub.s32 0, %v4156_v45 }
 0x177   : > { %v1592_v61 = vsel %vm1584_vm0, %v1575_v49, %v1591_v9  ;;  %v1595_v18 = vsel %vm1585_vm11, %v1581_v51, 1326507024  ;;  %v1594_v38 = vsel %vm1582_vm10, %v4158_v10, %v1575_v49  ;;  %v1599_v0 = vand.u32 65535, %v4178_v63 }
 0x178   : > { %v1373_v46 = vmul.f32 %v1372_v54, %v1368_v16  ;;  %v1380_v25 = vmul.f32 %v1379_v20, %v1368_v16  ;;  %v1500_v12 = vsel %vm1498_vm13, %v1499_v48, %v4156_v45  ;;  %v1596_v58 = vsel %vm1584_vm0, %v1578_v57, %v1595_v18 }
 0x179   : > { %v1501_v19 = vclz %v1500_v12  ;;  %v1600_v23 = vshrl.u32 %v4178_v63, 16  ;;  %v4198_v5 = vadd.s32 1, %v2779_v28  ;;  %v4202_v37 = vsel %vm1397_vm8, %v1519_v4, %v1495_v14 }
 0x17a   : > { %v1374_v62 = vadd.f32 1.0, %v1373_v46  ;;  %v1381_v2 = vadd.f32 1.0, %v1380_v25  ;;  %v1566_v13 = vshrl.u32 %v2965_v27, %v4129_v60  ;;  %v1593_v17 = vsel %vm1583_vm1, %v1590_v40, %v1592_v61 }
 0x17b   : > { %v2774_v16 = vadd.s32 4294967294, %v1501_v19  ;;  %v1597_v34 = vsel %vm1583_vm1, %v1594_v38, %v1596_v58  ;;  %v1522_v60 = vsel %vm4169_vm15, 0, %v4202_v37  ;;  %v1623_v57 = vand.u32 65535, %v1593_v17 }
 0x17c   : > { %v1382_v26 = vmul.f32 %v1381_v2, %v4125_v59  ;;  %v1391_v55 = vxor.u32 2147483648, %v1374_v62  ;;  %v1601_v14 = vand.u32 65535, %v1597_v34  ;;  %v1624_v56 = vshrl.u32 %v1593_v17, 16 }
 0x17d   : > { %vm2775_vm2 = vcmp.lt.s32.totalorder %v2774_v16, 0  ;;  %v1602_v51 = vshrl.u32 %v1597_v34, 16  ;;  %v1586_v54 = vsel %vm1582_vm10, %v1566_v13, %v4151_v21  ;;  %v1587_v20 = vsel %vm1585_vm11, %v1575_v49, 2102212464 }
 0x17e   : > { %v1388_v24 = vxor.u32 2147483648, %v1382_v26  ;;  %v1392_v59 = vsel %vm1390_vm7, %v1391_v55, %v1382_v26  ;;  %v1504_v47 = vsel %vm2775_vm2, 0, %v2774_v16  ;;  %v1605_v48 = vmul.u32 %v1601_v14, %v1600_v23 }
 0x17f   : > { %v1505_v39 = vsub.s32 32, %v1504_v47  ;;  %v1506_v30 = vshll.u32 %v4156_v45, %v1504_v47  ;;  %v1509_v42 = vsub.s32 4294967266, %v1504_v47  ;;  %v1603_v25 = vmul.u32 %v1601_v14, %v1599_v0 }
 0x180   : > { %v1389_v7 = vsel %vm1387_vm9, %v1374_v62, %v1388_v24  ;;  %v1604_v12 = vmul.u32 %v1602_v51, %v1599_v0  ;;  %v1606_v15 = vmul.u32 %v1602_v51, %v1600_v23  ;;  %v1626_v28 = vmul.u32 %v1624_v56, %v1599_v0 }
 0x181   : > { %v1393_v8 = vsel %vm1386_vm12, %v1389_v7, %v1392_v59  ;;  %v1507_v52 = vshrl.u32 %v1489_v43, %v1505_v39  ;;  %v1510_v11 = vadd.s32 127, %v1509_v42  ;;  %v1625_v43 = vmul.u32 %v1623_v57, %v1599_v0 }
 0x182   : > { %v1394_v45 = vsel %vm1383_vm14, nan, %v1393_v8  ;;  %v1627_v19 = vmul.u32 %v1623_v57, %v1600_v23  ;;  %v1607_v40 = vshll.u32 %v1604_v12, 16  ;;  %v1609_v62 = vshll.u32 %v1605_v48, 16 }
 0x183   : > { %v1508_v9 = vor.u32 %v1507_v52, %v1506_v30  ;;  %v1511_v46 = vshll.u32 %v1510_v11, 23  ;;  %2642 = vst [vmem:[%s3378_s17 + $0x38] sm:$0xff] %v1394_v45  ;;  %v1588_v21 = vsel %vm1584_vm0, %v4158_v10, %v1587_v20  ;;  %v1628_v2 = vmul.u32 %v1624_v56, %v1600_v23 }
 0x184   : > { %v1629_v49 = vshll.u32 %v1626_v28, 16  ;;  %v1631_v61 = vshll.u32 %v1627_v19, 16  ;;  %v1610_v16 = vshrl.u32 %v1605_v48, 16  ;;  %vm1611_vm3 = vc.u32 %v1603_v25, %v1607_v40 }
 0x185   : > { %v1512_v4 = vor.u32 4788187, %v1511_v46  ;;  %v1515_v3 = vcvt.s32.f32 %v1508_v9  ;;  %v1613_v38 = vadd.s32 %v1607_v40, %v1603_v25  ;;  %v1608_v58 = vshrl.u32 %v1604_v12, 16 }
 0x186   : > { %v1612_v26 = vsel %vm1611_vm3, 1, %v2971_v50  ;;  %vm1633_vm4 = vc.u32 %v1625_v43, %v1629_v49  ;;  %v1635_v0 = vadd.s32 %v1629_v49, %v1625_v43  ;;  %v1630_v10 = vshrl.u32 %v1626_v28, 16 }
 0x187   : > { %v1513_v18 = vand.u32 2147483647, %v1512_v4  ;;  %v1614_v37 = vadd.s32 %v1612_v26, %v1606_v15  ;;  %vm1615_vm5 = vc.u32 %v1613_v38, %v1609_v62  ;;  %v1634_v13 = vsel %vm1633_vm4, 1, %v2971_v50 }
 0x188   : > { %v1616_v17 = vsel %vm1615_vm5, 1, %v2971_v50  ;;  %v1636_v23 = vadd.s32 %v1634_v13, %v1628_v2  ;;  %vm1637_vm6 = vc.u32 %v1635_v0, %v1631_v61  ;;  %vm1716_vm7 = vcmp.gt.s32.totalorder %v4198_v5, 0 }
 0x189   : > { %v1516_v55 = vmul.f32 %v1515_v3, %v1513_v18  ;;  %v1618_v59 = vadd.s32 %v1616_v17, %v1614_v37  ;;  %v1638_v47 = vsel %vm1637_vm6, 1, %v2971_v50  ;;  %v1589_v34 = vsel %vm1583_vm1, %v1586_v54, %v1588_v21 }
 0x18a   : > { %v1632_v39 = vshrl.u32 %v1627_v19, 16  ;;  %v1640_v30 = vadd.s32 %v1638_v47, %v1636_v23  ;;  %v1717_v42 = vsel %vm1716_vm7, %v4198_v5, 0  ;;  %v4241_v57 = vadd.s32 %v1635_v0, %v1631_v61 }
 0x18b   : > { %v1517_v24 = vxor.u32 2147483648, %v1516_v55  ;;  %v1619_v7 = vadd.s32 %v1618_v59, %v1608_v58  ;;  %v1719_v56 = vand.u32 31, %v1717_v42  ;;  %v1712_v32 = vand.u32 8388607, %v1705_v36 }
 0x18c   : > { %v1641_v52 = vadd.s32 %v1640_v30, %v1630_v10  ;;  %v1539_v5 = vadd.s32 3, %v1522_v60  ;;  %v1643_v20 = vmul.u32 %v4178_v63, %v1589_v34  ;;  %v4253_v48 = vshrl.u32 %v1717_v42, 5 }
 0x18d   : > { %v1518_v14 = vsel %vm1397_vm8, %v1517_v24, %v1516_v55  ;;  %v4246_v51 = vadd.s32 %v1619_v7, %v1610_v16  ;;  %v4250_v45 = vsub.s32 32, %v1719_v56  ;;  %v1725_v12 = vshll.u32 %v2966_v29, %v1719_v56 }
 0x18e   : > { %v1521_v8 = vsel %vm4169_vm15, %v3843_v6, %v1518_v14  ;;  %v1642_v54 = vadd.s32 %v1641_v52, %v1632_v39  ;;  %v1722_v6 = vshll.u32 %v2965_v27, %v1719_v56  ;;  %v1731_v60 = vshll.u32 %v2968_v33, %v1719_v56 }
 0x18f   : > { %v1523_v11 = vmul.f32 %v1521_v8, %v1521_v8  ;;  %vm1645_vm8 = vc.u32 %v4246_v51, %v4241_v57  ;;  %v1723_v25 = vshrl.u32 %v2966_v29, %v4250_v45  ;;  %v1726_v63 = vshrl.u32 %v2967_v31, %v4250_v45 }
 0x190   : > { %v1646_v41 = vadd.s32 1, %v1642_v54  ;;  %v1732_v28 = vshrl.u32 %v2969_v35, %v4250_v45  ;;  %v1728_v4 = vshll.u32 %v2967_v31, %v1719_v56  ;;  %v1729_v3 = vshrl.u32 %v2968_v33, %v4250_v45 }
 0x191   : > { %v1524_v9 = vmul.f32 -0.001358992, %v1523_v11  ;;  %v1531_v46 = vmul.f32 -0.00019511016, %v1523_v11  ;;  %v1734_v40 = vshll.u32 %v2969_v35, %v1719_v56  ;;  %v1713_v49 = vor.u32 8388608, %v1712_v32 }
 0x192   : > { %v1647_v19 = vsel %vm1645_vm8, %v1646_v41, %v1642_v54  ;;  %v1540_v61 = vand.u32 3, %v1539_v5  ;;  %v4270_v18 = vor.u32 %v1723_v25, %v1722_v6  ;;  %v1733_v16 = vor.u32 %v1732_v28, %v1731_v60  ;;  %v2863_v6 = vld [vmem:[%s3076_s24 + $0x40] sm:$0xff] }
 0x193   : > { %v1525_v15 = vadd.f32 0.041655596, %v1524_v9  ;;  %v1532_v43 = vadd.f32 0.008332121, %v1531_v46  ;;  %v1648_v2 = vadd.s32 %v1647_v19, %v1643_v20  ;;  %v1735_v38 = vshrl.u32 %v2970_v44, %v4250_v45 }
 0x194   : > { %v4274_v55 = vor.u32 %v1726_v63, %v1725_v12  ;;  %v4276_v37 = vor.u32 %v1729_v3, %v1728_v4  ;;  %vm1737_vm9 = vcmp.lt.s32.totalorder %v4253_v48, 1  ;;  %vm1740_vm10 = vcmp.lt.s32.totalorder %v4253_v48, 4  ;;  %v4316_v3 = vld [vmem:[%s3076_s24 + $0x58] sm:$0xff] }
 0x195   : > { %v1526_v62 = vmul.f32 %v1525_v15, %v1523_v11  ;;  %v1533_v21 = vmul.f32 %v1532_v43, %v1523_v11  ;;  %v1649_v0 = vadd.s32 536870912, %v1648_v2  ;;  %v1736_v13 = vor.u32 %v1735_v38, %v1734_v40 }
 0x196   : > { %vm1739_vm11 = vcmp.lt.s32.totalorder %v4253_v48, 3  ;;  %vm1541_vm12 = vcmp.lt.s32.totalorder %v1540_v61, 2  ;;  %vm1738_vm13 = vcmp.lt.s32.totalorder %v4253_v48, 2  ;;  %v1746_v24 = vsel %vm1740_vm10, %v1733_v16, 920167782 }
 0x197   : > { %v1527_v58 = vadd.f32 -0.4999988, %v1526_v62  ;;  %v1534_v26 = vadd.f32 -0.16666654, %v1533_v21  ;;  %v4280_v23 = vshrl.u32 %v1649_v0, 30  ;;  %v4286_v59 = vshll.u32 %v1713_v49, 8 }
 0x198   : > { %v1745_v30 = vsel %vm1737_vm9, %v4270_v18, %v4274_v55  ;;  %vm1542_vm14 = vcmp.eq.s32.totalorder %v1540_v61, 0  ;;  %vm1545_vm15 = vcmp.eq.s32.totalorder %v1540_v61, 2  ;;  %v1747_v42 = vsel %vm1739_vm11, %v4276_v37, %v1746_v24 }
 0x199   : > { %v1528_v17 = vmul.f32 %v1527_v58, %v1523_v11  ;;  %v1535_v10 = vmul.f32 %v1534_v26, %v1523_v11  ;;  %v1651_v39 = vshll.u32 %v4280_v23, 30  ;;  %v1750_v14 = vsel %vm1740_vm10, %v1736_v13, 1326507024 }
 0x19a   : > { %v1749_v11 = vsel %vm1737_vm9, %v4274_v55, %v4276_v37  ;;  %v1748_v32 = vsel %vm1738_vm13, %v1745_v30, %v1747_v42  ;;  %v1751_v5 = vsel %vm1739_vm11, %v1733_v16, %v1750_v14  ;;  %v1754_v54 = vand.u32 65535, %v4286_v59 }
 0x19b   : > { %v1529_v47 = vadd.f32 1.0, %v1528_v17  ;;  %v1536_v34 = vadd.f32 1.0, %v1535_v10  ;;  %v1652_v52 = vsub.s32 %v1648_v2, %v1651_v39  ;;  %v1755_v20 = vshrl.u32 %v4286_v59, 16 }
 0x19c   : > { %vm1538_vm1 = vweird.f32 %v2863_v6  ;;  %v1752_v41 = vsel %vm1738_vm13, %v1749_v11, %v1751_v5  ;;  %v1779_v25 = vshrl.u32 %v1748_v32, 16  ;;  %v1778_v19 = vand.u32 65535, %v1748_v32 }
 0x19d   : > { %v1537_v7 = vmul.f32 %v1536_v34, %v1521_v8  ;;  %v1546_v56 = vxor.u32 2147483648, %v1529_v47  ;;  %vm1653_vm0 = vcmp.lt.s32.totalorder %v1652_v52, 0  ;;  %v1654_v46 = vsub.s32 0, %v1652_v52 }
 0x19e   : > { %v1756_v15 = vand.u32 65535, %v1752_v41  ;;  %v1757_v43 = vshrl.u32 %v1752_v41, 16  ;;  %v4313_v4 = vmul.u32 %v1779_v25, %v1754_v54  ;;  %vm1552_vm2 = vcmp.lt.s32.totalorder %v4082_v53, 0 }
 0x19f   : > { %v1543_v9 = vxor.u32 2147483648, %v1537_v7  ;;  %v1547_v8 = vsel %vm1545_vm15, %v1546_v56, %v1537_v7  ;;  %v1655_v60 = vsel %vm1653_vm0, %v1654_v46, %v1652_v52  ;;  %v1860_v16 = vand.u32 2147483647, %v4316_v3 }
 0x1a0   : > { %v1656_v28 = vclz %v1655_v60  ;;  %v1758_v62 = vmul.u32 %v1756_v15, %v1754_v54  ;;  %v1759_v21 = vmul.u32 %v1757_v43, %v1754_v54  ;;  %v1760_v2 = vmul.u32 %v1756_v15, %v1755_v20 }
 0x1a1   : > { %v1544_v12 = vsel %vm1542_vm14, %v1529_v47, %v1543_v9  ;;  %v1644_v61 = vadd.s32 %v4241_v57, %v4246_v51  ;;  %v1721_v38 = vshrl.u32 %v2965_v27, %v4250_v45  ;;  %v1761_v58 = vmul.u32 %v1757_v43, %v1755_v20 }
 0x1a2   : > { %v1548_v63 = vsel %vm1541_vm12, %v1544_v12, %v1547_v8  ;;  %v2777_v49 = vadd.s32 4294967294, %v1656_v28  ;;  %v1762_v26 = vshll.u32 %v1759_v21, 16  ;;  %v1764_v0 = vshll.u32 %v1760_v2, 16 }
 0x1a3   : > { %v1549_v40 = vsel %vm1538_vm1, nan, %v1548_v63  ;;  %v1780_v13 = vmul.u32 %v1778_v19, %v1754_v54  ;;  %v1782_v17 = vmul.u32 %v1778_v19, %v1755_v20  ;;  %vm4327_vm4 = vcmp.le.f32.partialorder %v1550_v22, 0.7853982 }
 0x1a4   : > { %2643 = vst [vmem:[%s3378_s17 + $0x40] sm:$0xff] %v1549_v40  ;;  %vm2778_vm3 = vcmp.lt.s32.totalorder %v2777_v49, 0  ;;  %vm1766_vm5 = vc.u32 %v1758_v62, %v1762_v26  ;;  %v1768_v47 = vadd.s32 %v1762_v26, %v1758_v62  ;;  %v1784_v57 = vshll.u32 %v4313_v4, 16 }
 0x1a5   : > { %v1659_v24 = vsel %vm2778_vm3, 0, %v2777_v49  ;;  %v1767_v39 = vsel %vm1766_vm5, 1, %v2971_v50  ;;  %v1674_v30 = vsub.s32 4, %v4280_v23  ;;  %v1783_v14 = vmul.u32 %v1779_v25, %v1755_v20 }
 0x1a6   : > { %v1660_v51 = vsub.s32 32, %v1659_v24  ;;  %v1661_v34 = vshll.u32 %v1652_v52, %v1659_v24  ;;  %v1664_v45 = vsub.s32 4294967266, %v1659_v24  ;;  %v1769_v42 = vadd.s32 %v1767_v39, %v1761_v58 }
 0x1a7   : > { %v1863_v7 = vand.u32 2139095040, %v4316_v3  ;;  %v1763_v11 = vshrl.u32 %v1759_v21, 16  ;;  %vm1770_vm6 = vc.u32 %v1768_v47, %v1764_v0  ;;  %v1742_v32 = vsel %vm1740_vm10, %v4276_v37, 2102212464 }
 0x1a8   : > { %v1662_v22 = vshrl.u32 %v1644_v61, %v1660_v51  ;;  %v1665_v56 = vadd.s32 127, %v1664_v45  ;;  %v1771_v5 = vsel %vm1770_vm6, 1, %v2971_v50  ;;  %v1786_v52 = vshll.u32 %v1782_v17, 16  ;;  %v4367_v51 = vld [vmem:[%s3076_s24 + $0x60] sm:$0xff] }
 0x1a9   : > { %vm1788_vm7 = vc.u32 %v1780_v13, %v1784_v57  ;;  %v1773_v8 = vadd.s32 %v1771_v5, %v1769_v42  ;;  %v1675_v20 = vsel %vm1552_vm2, %v1674_v30, %v4280_v23  ;;  %v1790_v6 = vadd.s32 %v1784_v57, %v1780_v13 }
 0x1aa   : > { %v1663_v54 = vor.u32 %v1662_v22, %v1661_v34  ;;  %v1666_v9 = vshll.u32 %v1665_v56, 23  ;;  %v1789_v46 = vsel %vm1788_vm7, 1, %v2971_v50  ;;  %v1864_v25 = vshrl.u32 %v1863_v7, 23 }
 0x1ab   : > { %v1791_v41 = vadd.s32 %v1789_v46, %v1783_v14  ;;  %v1765_v15 = vshrl.u32 %v1760_v2, 16  ;;  %v1774_v37 = vadd.s32 %v1773_v8, %v1763_v11  ;;  %v1741_v43 = vsel %vm1737_vm9, %v1721_v38, %v4270_v18 }
 0x1ac   : > { %v1667_v12 = vor.u32 4788187, %v1666_v9  ;;  %v1670_v60 = vcvt.s32.f32 %v1663_v54  ;;  %v1785_v63 = vshrl.u32 %v4313_v4, 16  ;;  %vm1792_vm8 = vc.u32 %v1790_v6, %v1786_v52 }
 0x1ad   : > { %v2782_v28 = vadd.s32 4294967169, %v1864_v25  ;;  %v1677_v40 = vsel %vm4327_vm4, 0, %v1675_v20  ;;  %v1743_v23 = vsel %vm1739_vm11, %v4274_v55, %v1742_v32  ;;  %v1793_v62 = vsel %vm1792_vm8, 1, %v2971_v50 }
 0x1ae   : > { %v1668_v19 = vand.u32 2147483647, %v1667_v12  ;;  %v1787_v21 = vshrl.u32 %v1782_v17, 16  ;;  %v1795_v2 = vadd.s32 %v1793_v62, %v1791_v41  ;;  %v4353_v18 = vadd.s32 %v1774_v37, %v1765_v15 }
 0x1af   : > { %v1870_v49 = vadd.s32 1, %v2782_v28  ;;  %v4355_v4 = vadd.s32 %v1790_v6, %v1786_v52  ;;  %v1694_v38 = vadd.s32 3, %v1677_v40  ;;  %v1744_v58 = vsel %vm1738_vm13, %v1741_v43, %v1743_v23 }
 0x1b0   : > { %v1671_v61 = vmul.f32 %v1670_v60, %v1668_v19  ;;  %v1796_v26 = vadd.s32 %v1795_v2, %v1785_v63  ;;  %v1867_v55 = vand.u32 8388607, %v1860_v16  ;;  %v1798_v57 = vmul.u32 %v4286_v59, %v1744_v58 }
 0x1b1   : > { %vm1871_vm9 = vcmp.gt.s32.totalorder %v1870_v49, 0  ;;  %vm1800_vm10 = vc.u32 %v4353_v18, %v4355_v4  ;;  %v4374_v34 = vand.u32 3, %v1694_v38  ;;  %v2015_v14 = vand.u32 2147483647, %v4367_v51 }
 0x1b2   : > { %v1672_v0 = vxor.u32 2147483648, %v1671_v61  ;;  %v1872_v13 = vsel %vm1871_vm9, %v1870_v49, 0  ;;  %v1797_v17 = vadd.s32 %v1796_v26, %v1787_v21  ;;  %v1868_v42 = vor.u32 8388608, %v1867_v55 }
 0x1b3   : > { %v1874_v24 = vand.u32 31, %v1872_v13  ;;  %v4384_v54 = vshrl.u32 %v1872_v13, 5  ;;  %v2018_v46 = vand.u32 2139095040, %v4367_v51  ;;  %vm1700_vm11 = vcmp.eq.s32.totalorder %v4374_v34, 2 }
 0x1b4   : > { %v1673_v47 = vsel %vm1552_vm2, %v1672_v0, %v1671_v61  ;;  %v1801_v45 = vadd.s32 1, %v1797_v17  ;;  %vm1697_vm12 = vcmp.eq.s32.totalorder %v4374_v34, 0  ;;  %v4400_v23 = vshll.u32 %v1868_v42, 8 }
 0x1b5   : > { %v4372_v48 = vsel %vm4327_vm4, %v4082_v53, %v1673_v47  ;;  %v1875_v39 = vsub.s32 32, %v1874_v24  ;;  %v1877_v59 = vshll.u32 %v2965_v27, %v1874_v24  ;;  %v1880_v56 = vshll.u32 %v2966_v29, %v1874_v24 }
 0x1b6   : > { %v1678_v30 = vmul.f32 %v4372_v48, %v4372_v48  ;;  %v1802_v7 = vsel %vm1800_vm10, %v1801_v45, %v1797_v17  ;;  %v1886_v52 = vshll.u32 %v2968_v33, %v1874_v24  ;;  %v1883_v9 = vshll.u32 %v2967_v31, %v1874_v24 }
 0x1b7   : > { %v1878_v22 = vshrl.u32 %v2966_v29, %v1875_v39  ;;  %v1881_v10 = vshrl.u32 %v2967_v31, %v1875_v39  ;;  %v1803_v5 = vadd.s32 %v1802_v7, %v1798_v57  ;;  %v1884_v8 = vshrl.u32 %v2968_v33, %v1875_v39 }
 0x1b8   : > { %v1679_v11 = vmul.f32 -0.001358992, %v1678_v30  ;;  %v1686_v32 = vmul.f32 -0.00019511016, %v1678_v30  ;;  %v1887_v25 = vshrl.u32 %v2969_v35, %v1875_v39  ;;  %v1889_v15 = vshll.u32 %v2969_v35, %v1874_v24 }
 0x1b9   : > { %v1804_v41 = vadd.s32 536870912, %v1803_v5  ;;  %v1879_v12 = vor.u32 %v1878_v22, %v1877_v59  ;;  %v4391_v60 = vor.u32 %v1881_v10, %v1880_v56  ;;  %v1890_v37 = vshrl.u32 %v2970_v44, %v1875_v39 }
 0x1ba   : > { %v1680_v20 = vadd.f32 0.041655596, %v1679_v11  ;;  %v1687_v6 = vadd.f32 0.008332121, %v1686_v32  ;;  %v1888_v19 = vor.u32 %v1887_v25, %v1886_v52  ;;  %v4396_v40 = vor.u32 %v1884_v8, %v1883_v9 }
 0x1bb   : > { %v1805_v28 = vshrl.u32 %v1804_v41, 30  ;;  %vm1892_vm13 = vcmp.lt.s32.totalorder %v4384_v54, 1  ;;  %vm1895_vm14 = vcmp.lt.s32.totalorder %v4384_v54, 4  ;;  %vm1696_vm15 = vcmp.lt.s32.totalorder %v4374_v34, 2 }
 0x1bc   : > { %v1681_v43 = vmul.f32 %v1680_v20, %v1678_v30  ;;  %v1688_v63 = vmul.f32 %v1687_v6, %v1678_v30  ;;  %vm1894_vm0 = vcmp.lt.s32.totalorder %v4384_v54, 3  ;;  %vm1693_vm1 = vweird.f32 %v4082_v53 }
 0x1bd   : > { %v1806_v2 = vshll.u32 %v1805_v28, 30  ;;  %v1891_v49 = vor.u32 %v1890_v37, %v1889_v15  ;;  %vm1893_vm2 = vcmp.lt.s32.totalorder %v4384_v54, 2  ;;  %v1901_v61 = vsel %vm1895_vm14, %v1888_v19, 920167782 }
 0x1be   : > { %v1682_v62 = vadd.f32 -0.4999988, %v1681_v43  ;;  %v1689_v21 = vadd.f32 -0.16666654, %v1688_v63  ;;  %v2019_v38 = vshrl.u32 %v2018_v46, 23  ;;  %vm1707_vm3 = vcmp.lt.s32.totalorder %v4116_v1, 0 }
 0x1bf   : > { %v1807_v0 = vsub.s32 %v1803_v5, %v1806_v2  ;;  %v1900_v55 = vsel %vm1892_vm13, %v1879_v12, %v4391_v60  ;;  %v1902_v13 = vsel %vm1894_vm0, %v4396_v40, %v1901_v61  ;;  %v1904_v17 = vsel %vm1892_vm13, %v4391_v60, %v4396_v40 }
 0x1c0   : > { %v1683_v58 = vmul.f32 %v1682_v62, %v1678_v30  ;;  %v1690_v26 = vmul.f32 %v1689_v21, %v1678_v30  ;;  %v1909_v24 = vand.u32 65535, %v4400_v23  ;;  %v1910_v47 = vshrl.u32 %v4400_v23, 16 }
 0x1c1   : > { %vm1808_vm4 = vcmp.lt.s32.totalorder %v1807_v0, 0  ;;  %v1809_v30 = vsub.s32 0, %v1807_v0  ;;  %vm4423_vm5 = vcmp.le.f32.partialorder %v1705_v36, 0.7853982  ;;  %v1876_v59 = vshrl.u32 %v2965_v27, %v1875_v39 }
 0x1c2   : > { %v1684_v57 = vadd.f32 1.0, %v1683_v58  ;;  %v1691_v45 = vadd.f32 1.0, %v1690_v26  ;;  %v1903_v7 = vsel %vm1893_vm2, %v1900_v55, %v1902_v13  ;;  %v1905_v22 = vsel %vm1895_vm14, %v1891_v49, 1326507024 }
 0x1c3   : > { %v2785_v56 = vadd.s32 4294967169, %v2019_v38  ;;  %v1810_v32 = vsel %vm1808_vm4, %v1809_v30, %v1807_v0  ;;  %v1906_v5 = vsel %vm1894_vm0, %v1888_v19, %v1905_v22  ;;  %v1829_v52 = vsub.s32 4, %v1805_v28 }
 0x1c4   : > { %v1692_v10 = vmul.f32 %v1691_v45, %v4372_v48  ;;  %v1701_v11 = vxor.u32 2147483648, %v1684_v57  ;;  %v1811_v36 = vclz %v1810_v32  ;;  %v1907_v9 = vsel %vm1893_vm2, %v1904_v17, %v1906_v5 }
 0x1c5   : > { %v1934_v39 = vshrl.u32 %v1903_v7, 16  ;;  %v1911_v20 = vand.u32 65535, %v1907_v9  ;;  %v1912_v6 = vshrl.u32 %v1907_v9, 16  ;;  %v1799_v48 = vadd.s32 %v4355_v4, %v4353_v18 }
 0x1c6   : > { %v1698_v8 = vxor.u32 2147483648, %v1692_v10  ;;  %v1702_v46 = vsel %vm1700_vm11, %v1701_v11, %v1692_v10  ;;  %v2780_v41 = vadd.s32 4294967294, %v1811_v36  ;;  %v4443_v25 = vand.u32 8388607, %v2015_v14 }
 0x1c7   : > { %v2025_v15 = vadd.s32 1, %v2785_v56  ;;  %v1896_v43 = vsel %vm1892_vm13, %v1876_v59, %v1879_v12  ;;  %v1914_v63 = vmul.u32 %v1912_v6, %v1909_v24  ;;  %v1933_v19 = vand.u32 65535, %v1903_v7 }
 0x1c8   : > { %v1699_v37 = vsel %vm1697_vm12, %v1684_v57, %v1698_v8  ;;  %vm2781_vm6 = vcmp.lt.s32.totalorder %v2780_v41, 0  ;;  %v1830_v18 = vsel %vm1707_vm3, %v1829_v52, %v1805_v28  ;;  %v1915_v4 = vmul.u32 %v1911_v20, %v1910_v47 }
 0x1c9   : > { %v1703_v62 = vsel %vm1696_vm15, %v1699_v37, %v1702_v46  ;;  %v1814_v2 = vsel %vm2781_vm6, 0, %v2780_v41  ;;  %v1913_v49 = vmul.u32 %v1911_v20, %v1909_v24  ;;  %v1936_v61 = vmul.u32 %v1934_v39, %v1909_v24 }
 0x1ca   : > { %v1704_v21 = vsel %vm1693_vm1, nan, %v1703_v62  ;;  %v1815_v38 = vsub.s32 32, %v1814_v2  ;;  %v1816_v58 = vshll.u32 %v1807_v0, %v1814_v2  ;;  %v1819_v26 = vsub.s32 4294967266, %v1814_v2 }
 0x1cb   : > { %v1917_v12 = vshll.u32 %v1914_v63, 16  ;;  %2644 = vst [vmem:[%s3378_s17 + $0x48] sm:$0xff] %v1704_v21  ;;  %v1832_v34 = vsel %vm4423_vm5, 0, %v1830_v18  ;;  %v1897_v55 = vsel %vm1895_vm14, %v4396_v40, 2102212464  ;;  %v1916_v28 = vmul.u32 %v1912_v6, %v1910_v47 }
 0x1cc   : > { %v1937_v13 = vmul.u32 %v1933_v19, %v1910_v47  ;;  %v1817_v17 = vshrl.u32 %v1799_v48, %v1815_v38  ;;  %v1820_v53 = vadd.s32 127, %v1819_v26  ;;  %v1919_v57 = vshll.u32 %v1915_v4, 16 }
 0x1cd   : > { %v1935_v45 = vmul.u32 %v1933_v19, %v1909_v24  ;;  %vm1921_vm7 = vc.u32 %v1913_v49, %v1917_v12  ;;  %v1923_v30 = vadd.s32 %v1917_v12, %v1913_v49  ;;  %v1939_v59 = vshll.u32 %v1936_v61, 16 }
 0x1ce   : > { %vm2026_vm8 = vcmp.gt.s32.totalorder %v2025_v15, 0  ;;  %v1818_v0 = vor.u32 %v1817_v17, %v1816_v58  ;;  %v1821_v7 = vshll.u32 %v1820_v53, 23  ;;  %v1922_v22 = vsel %vm1921_vm7, 1, %v2971_v50 }
 0x1cf   : > { %v1938_v56 = vmul.u32 %v1934_v39, %v1910_v47  ;;  %v1918_v10 = vshrl.u32 %v1914_v63, 16  ;;  %v1924_v11 = vadd.s32 %v1922_v22, %v1916_v28  ;;  %vm1925_vm9 = vc.u32 %v1923_v30, %v1919_v57 }
 0x1d0   : > { %v1941_v32 = vshll.u32 %v1937_v13, 16  ;;  %v1822_v40 = vor.u32 4788187, %v1821_v7  ;;  %v1825_v5 = vcvt.s32.f32 %v1818_v0  ;;  %v1926_v36 = vsel %vm1925_vm9, 1, %v2971_v50 }
 0x1d1   : > { %vm1943_vm10 = vc.u32 %v1935_v45, %v1939_v59  ;;  %v1898_v24 = vsel %vm1894_vm0, %v4391_v60, %v1897_v55  ;;  %v1928_v52 = vadd.s32 %v1926_v36, %v1924_v11  ;;  %v1945_v8 = vadd.s32 %v1939_v59, %v1935_v45 }
 0x1d2   : > { %v1944_v9 = vsel %vm1943_vm10, 1, %v2971_v50  ;;  %v1823_v46 = vand.u32 2147483647, %v1822_v40  ;;  %v1920_v20 = vshrl.u32 %v1915_v4, 16  ;;  %v2027_v39 = vsel %vm2026_vm8, %v2025_v15, 0 }
 0x1d3   : > { %v1946_v47 = vadd.s32 %v1944_v9, %v1938_v56  ;;  %v1929_v6 = vadd.s32 %v1928_v52, %v1918_v10  ;;  %v1940_v48 = vshrl.u32 %v1936_v61, 16  ;;  %vm1947_vm11 = vc.u32 %v1945_v8, %v1941_v32 }
 0x1d4   : > { %v2023_v41 = vor.u32 8388608, %v4443_v25  ;;  %v1826_v37 = vmul.f32 %v1825_v5, %v1823_v46  ;;  %v1899_v63 = vsel %vm1893_vm2, %v1896_v43, %v1898_v24  ;;  %v1948_v60 = vsel %vm1947_vm11, 1, %v2971_v50 }
 0x1d5   : > { %v2029_v19 = vand.u32 31, %v2027_v39  ;;  %v1849_v62 = vadd.s32 3, %v1832_v34  ;;  %v1942_v18 = vshrl.u32 %v1937_v13, 16  ;;  %v4472_v21 = vadd.s32 %v1945_v8, %v1941_v32 }
 0x1d6   : > { %v1950_v4 = vadd.s32 %v1948_v60, %v1946_v47  ;;  %v1827_v2 = vxor.u32 2147483648, %v1826_v37  ;;  %v4474_v49 = vadd.s32 %v1929_v6, %v1920_v20  ;;  %v1953_v38 = vmul.u32 %v4400_v23, %v1899_v63 }
 0x1d7   : > { %v4476_v15 = vsub.s32 32, %v2029_v19  ;;  %v2032_v61 = vshll.u32 %v2965_v27, %v2029_v19  ;;  %v4480_v54 = vshrl.u32 %v2027_v39, 5  ;;  %v2035_v43 = vshll.u32 %v2966_v29, %v2029_v19 }
 0x1d8   : > { %v1951_v25 = vadd.s32 %v1950_v4, %v1940_v48  ;;  %v1828_v58 = vsel %vm1707_vm3, %v1827_v2, %v1826_v37  ;;  %v2038_v34 = vshll.u32 %v2967_v31, %v2029_v19  ;;  %v2041_v13 = vshll.u32 %v2968_v33, %v2029_v19 }
 0x1d9   : > { %v2033_v26 = vshrl.u32 %v2966_v29, %v4476_v15  ;;  %v2036_v12 = vshrl.u32 %v2967_v31, %v4476_v15  ;;  %v1831_v55 = vsel %vm4423_vm5, %v4116_v1, %v1828_v58  ;;  %v2039_v28 = vshrl.u32 %v2968_v33, %v4476_v15 }
 0x1da   : > { %v1952_v23 = vadd.s32 %v1951_v25, %v1942_v18  ;;  %v1833_v17 = vmul.f32 %v1831_v55, %v1831_v55  ;;  %vm1955_vm12 = vc.u32 %v4474_v49, %v4472_v21  ;;  %v2042_v57 = vshrl.u32 %v2969_v35, %v4476_v15 }
 0x1db   : > { %v4498_v53 = vor.u32 %v2033_v26, %v2032_v61  ;;  %v4502_v30 = vor.u32 %v2036_v12, %v2035_v43  ;;  %v2044_v42 = vshll.u32 %v2969_v35, %v2029_v19  ;;  %v2045_v59 = vshrl.u32 %v2970_v44, %v4476_v15 }
 0x1dc   : > { %v1956_v45 = vadd.s32 1, %v1952_v23  ;;  %v1834_v0 = vmul.f32 -0.001358992, %v1833_v17  ;;  %v1841_v7 = vmul.f32 -0.00019511016, %v1833_v17  ;;  %v2043_v22 = vor.u32 %v2042_v57, %v2041_v13 }
 0x1dd   : > { %vm2047_vm13 = vcmp.lt.s32.totalorder %v4480_v54, 1  ;;  %v4508_v10 = vor.u32 %v2039_v28, %v2038_v34  ;;  %v2046_v11 = vor.u32 %v2045_v59, %v2044_v42  ;;  %vm2050_vm14 = vcmp.lt.s32.totalorder %v4480_v54, 4 }
 0x1de   : > { %v1957_v56 = vsel %vm1955_vm12, %v1956_v45, %v1952_v23  ;;  %v1835_v32 = vadd.f32 0.041655596, %v1834_v0  ;;  %v1842_v40 = vadd.f32 0.008332121, %v1841_v7  ;;  %vm2049_vm15 = vcmp.lt.s32.totalorder %v4480_v54, 3 }
 0x1df   : > { %v1958_v5 = vadd.s32 %v1957_v56, %v1953_v38  ;;  %vm2048_vm0 = vcmp.lt.s32.totalorder %v4480_v54, 2  ;;  %v2055_v36 = vsel %vm2047_vm13, %v4498_v53, %v4502_v30  ;;  %v2056_v24 = vsel %vm2050_vm14, %v2043_v22, 920167782 }
 0x1e0   : > { %v4519_v52 = vshll.u32 %v2023_v41, 8  ;;  %v1836_v9 = vmul.f32 %v1835_v32, %v1833_v17  ;;  %v1843_v8 = vmul.f32 %v1842_v40, %v1833_v17  ;;  %v1850_v20 = vand.u32 3, %v1849_v62 }
 0x1e1   : > { %v1959_v46 = vadd.s32 536870912, %v1958_v5  ;;  %v2057_v47 = vsel %vm2049_vm15, %v4508_v10, %v2056_v24  ;;  %v2059_v39 = vsel %vm2047_vm13, %v4502_v30, %v4508_v10  ;;  %v2060_v6 = vsel %vm2050_vm14, %v2046_v11, 1326507024 }
 0x1e2   : > { %v1837_v48 = vadd.f32 -0.4999988, %v1836_v9  ;;  %v1844_v37 = vadd.f32 -0.16666654, %v1843_v8  ;;  %v2058_v63 = vsel %vm2048_vm0, %v2055_v36, %v2057_v47  ;;  %v2061_v60 = vsel %vm2049_vm15, %v2043_v22, %v2060_v6 }
 0x1e3   : > { %v4530_v41 = vshrl.u32 %v1959_v46, 30  ;;  %v2064_v19 = vand.u32 65535, %v4519_v52  ;;  %v2089_v62 = vshrl.u32 %v2058_v63, 16  ;;  %vm1848_vm1 = vweird.f32 %v4116_v1 }
 0x1e4   : > { %v1838_v18 = vmul.f32 %v1837_v48, %v1833_v17  ;;  %v1845_v4 = vmul.f32 %v1844_v37, %v1833_v17  ;;  %vm1851_vm2 = vcmp.lt.s32.totalorder %v1850_v20, 2  ;;  %v2062_v61 = vsel %vm2048_vm0, %v2059_v39, %v2061_v60  ;;  %v4556_v60 = vld [vmem:[%s3076_s24 + $0x68] sm:$0xff] }
 0x1e5   : > { %v1961_v2 = vshll.u32 %v4530_v41, 30  ;;  %v2065_v25 = vshrl.u32 %v4519_v52, 16  ;;  %vm1855_vm3 = vcmp.eq.s32.totalorder %v1850_v20, 2  ;;  %v2066_v26 = vand.u32 65535, %v2062_v61 }
 0x1e6   : > { %v1839_v38 = vadd.f32 1.0, %v1838_v18  ;;  %v1846_v43 = vadd.f32 1.0, %v1845_v4  ;;  %v2067_v12 = vshrl.u32 %v2062_v61, 16  ;;  %v2088_v34 = vand.u32 65535, %v2058_v63 }
 0x1e7   : > { %v1962_v58 = vsub.s32 %v1958_v5, %v1961_v2  ;;  %v4542_v23 = vmul.u32 %v2089_v62, %v2064_v19  ;;  %vm1852_vm5 = vcmp.eq.s32.totalorder %v1850_v20, 0  ;;  %v2068_v57 = vmul.u32 %v2066_v26, %v2064_v19 }
 0x1e8   : > { %v1847_v28 = vmul.f32 %v1846_v43, %v1831_v55  ;;  %v1856_v13 = vxor.u32 2147483648, %v1839_v38  ;;  %v2069_v45 = vmul.u32 %v2067_v12, %v2064_v19  ;;  %v2070_v42 = vmul.u32 %v2066_v26, %v2065_v25 }
 0x1e9   : > { %vm1963_vm4 = vcmp.lt.s32.totalorder %v1962_v58, 0  ;;  %v1964_v17 = vsub.s32 0, %v1962_v58  ;;  %vm1862_vm6 = vcmp.lt.s32.totalorder %v4316_v3, 0  ;;  %v1954_v7 = vadd.s32 %v4472_v21, %v4474_v49 }
 0x1ea   : > { %v1853_v59 = vxor.u32 2147483648, %v1847_v28  ;;  %v1857_v0 = vsel %vm1855_vm3, %v1856_v13, %v1847_v28  ;;  %v2071_v11 = vmul.u32 %v2067_v12, %v2065_v25  ;;  %v2072_v32 = vshll.u32 %v2069_v45, 16 }
 0x1eb   : > { %v1965_v22 = vsel %vm1963_vm4, %v1964_v17, %v1962_v58  ;;  %v2074_v40 = vshll.u32 %v2070_v42, 16  ;;  %v2090_v5 = vmul.u32 %v2088_v34, %v2064_v19  ;;  %v2092_v36 = vmul.u32 %v2088_v34, %v2065_v25 }
 0x1ec   : > { %v1966_v56 = vclz %v1965_v22  ;;  %v1854_v55 = vsel %vm1852_vm5, %v1839_v38, %v1853_v59  ;;  %v2094_v24 = vshll.u32 %v4542_v23, 16  ;;  %vm2076_vm7 = vc.u32 %v2068_v57, %v2072_v32 }
 0x1ed   : > { %v1858_v9 = vsel %vm1851_vm2, %v1854_v55, %v1857_v0  ;;  %v2078_v46 = vadd.s32 %v2072_v32, %v2068_v57  ;;  %v1984_v49 = vsub.s32 4, %v4530_v41  ;;  %v2077_v47 = vsel %vm2076_vm7, 1, %v2971_v50 }
 0x1ee   : > { %v2783_v8 = vadd.s32 4294967294, %v1966_v56  ;;  %v1859_v21 = vsel %vm1848_vm1, nan, %v1858_v9  ;;  %v2093_v39 = vmul.u32 %v2089_v62, %v2065_v25  ;;  %v2073_v6 = vshrl.u32 %v2069_v45, 16 }
 0x1ef   : > { %v2079_v48 = vadd.s32 %v2077_v47, %v2071_v11  ;;  %vm2080_vm9 = vc.u32 %v2078_v46, %v2074_v40  ;;  %2645 = vst [vmem:[%s3378_s17 + $0x50] sm:$0xff] %v1859_v21  ;;  %v2096_v63 = vshll.u32 %v2092_v36, 16  ;;  %vm2098_vm10 = vc.u32 %v2090_v5, %v2094_v24  ;;  %v4597_v47 = vld [vmem:[%s3076_s24 + $0x70] sm:$0xff] }
 0x1f0   : > { %vm2784_vm8 = vcmp.lt.s32.totalorder %v2783_v8, 0  ;;  %v2081_v20 = vsel %vm2080_vm9, 1, %v2971_v50  ;;  %vm4560_vm11 = vcmp.le.f32.partialorder %v1860_v16, 0.7853982  ;;  %v2031_v2 = vshrl.u32 %v2965_v27, %v4476_v15 }
 0x1f1   : > { %v1969_v37 = vsel %vm2784_vm8, 0, %v2783_v8  ;;  %v2083_v4 = vadd.s32 %v2081_v20, %v2079_v48  ;;  %v2052_v61 = vsel %vm2050_vm14, %v4508_v10, 2102212464  ;;  %v2099_v25 = vsel %vm2098_vm10, 1, %v2971_v50 }
 0x1f2   : > { %v1970_v19 = vsub.s32 32, %v1969_v37  ;;  %v1971_v1 = vshll.u32 %v1962_v58, %v1969_v37  ;;  %v1974_v18 = vsub.s32 4294967266, %v1969_v37  ;;  %v1985_v58 = vsel %vm1862_vm6, %v1984_v49, %v4530_v41 }
 0x1f3   : > { %v2100_v26 = vadd.s32 %v2094_v24, %v2090_v5  ;;  %v2075_v16 = vshrl.u32 %v2070_v42, 16  ;;  %v2084_v12 = vadd.s32 %v2083_v4, %v2073_v6  ;;  %v2101_v34 = vadd.s32 %v2099_v25, %v2093_v39 }
 0x1f4   : > { %v1972_v38 = vshrl.u32 %v1954_v7, %v1970_v19  ;;  %v1975_v43 = vadd.s32 127, %v1974_v18  ;;  %v2173_v28 = vand.u32 2139095040, %v4556_v60  ;;  %v2095_v17 = vshrl.u32 %v4542_v23, 16 }
 0x1f5   : > { %vm2102_vm12 = vc.u32 %v2100_v26, %v2096_v63  ;;  %v2051_v10 = vsel %vm2047_vm13, %v2031_v2, %v4498_v53  ;;  %v2053_v57 = vsel %vm2049_vm15, %v4502_v30, %v2052_v61  ;;  %v2097_v0 = vshrl.u32 %v2092_v36, 16 }
 0x1f6   : > { %v1973_v13 = vor.u32 %v1972_v38, %v1971_v1  ;;  %v1976_v15 = vshll.u32 %v1975_v43, 23  ;;  %v2103_v41 = vsel %vm2102_vm12, 1, %v2971_v50  ;;  %v2174_v45 = vshrl.u32 %v2173_v28, 23 }
 0x1f7   : > { %v2105_v7 = vadd.s32 %v2103_v41, %v2101_v34  ;;  %v1987_v22 = vsel %vm4560_vm11, 0, %v1985_v58  ;;  %v4584_v23 = vadd.s32 %v2084_v12, %v2075_v16  ;;  %v4586_v56 = vadd.s32 %v2100_v26, %v2096_v63 }
 0x1f8   : > { %v1977_v42 = vor.u32 4788187, %v1976_v15  ;;  %v1980_v59 = vcvt.s32.f32 %v1973_v13  ;;  %v2788_v11 = vadd.s32 4294967169, %v2174_v45  ;;  %v2054_v30 = vsel %vm2048_vm0, %v2051_v10, %v2053_v57 }
 0x1f9   : > { %v2106_v32 = vadd.s32 %v2105_v7, %v2095_v17  ;;  %v2170_v40 = vand.u32 2147483647, %v4556_v60  ;;  %v2004_v36 = vadd.s32 3, %v1987_v22  ;;  %v2108_v9 = vmul.u32 %v4519_v52, %v2054_v30 }
 0x1fa   : > { %v1978_v53 = vand.u32 2147483647, %v1977_v42  ;;  %v2180_v55 = vadd.s32 1, %v2788_v11  ;;  %vm2110_vm13 = vc.u32 %v4584_v23, %v4586_v56  ;;  %v2325_v63 = vand.u32 2147483647, %v4597_v47 }
 0x1fb   : > { %v2107_v24 = vadd.s32 %v2106_v32, %v2097_v0  ;;  %v2177_v54 = vand.u32 8388607, %v2170_v40  ;;  %v4601_v6 = vand.u32 3, %v2004_v36  ;;  %v2328_v28 = vand.u32 2139095040, %v4597_v47 }
 0x1fc   : > { %v1981_v5 = vmul.f32 %v1980_v59, %v1978_v53  ;;  %vm2181_vm14 = vcmp.gt.s32.totalorder %v2180_v55, 0  ;;  %vm2017_vm8 = vcmp.lt.s32.totalorder %v4367_v51, 0  ;;  %vm4672_vm9 = vcmp.le.f32.partialorder %v2015_v14, 0.7853982 }
 0x1fd   : > { %v2111_v46 = vadd.s32 1, %v2107_v24  ;;  %v2182_v21 = vsel %vm2181_vm14, %v2180_v55, 0  ;;  %v2178_v1 = vor.u32 8388608, %v2177_v54  ;;  %vm2010_vm15 = vcmp.eq.s32.totalorder %v4601_v6, 2 }
 0x1fe   : > { %v1982_v8 = vxor.u32 2147483648, %v1981_v5  ;;  %v2184_v49 = vand.u32 31, %v2182_v21  ;;  %v4613_v18 = vshrl.u32 %v2182_v21, 5  ;;  %vm2007_vm1 = vcmp.eq.s32.totalorder %v4601_v6, 0 }
 0x1ff   : > { %v2112_v48 = vsel %vm2110_vm13, %v2111_v46, %v2107_v24  ;;  %v4632_v10 = vshll.u32 %v2178_v1, 8  ;;  %v2329_v53 = vshrl.u32 %v2328_v28, 23  ;;  %vm2006_vm3 = vcmp.lt.s32.totalorder %v4601_v6, 2 }
 0x200   : > { %v1983_v39 = vsel %vm1862_vm6, %v1982_v8, %v1981_v5  ;;  %v2113_v37 = vadd.s32 %v2112_v48, %v2108_v9  ;;  %v4608_v20 = vsub.s32 32, %v2184_v49  ;;  %v2187_v4 = vshll.u32 %v2965_v27, %v2184_v49 }
 0x201   : > { %v4606_v52 = vsel %vm4560_vm11, %v4316_v3, %v1983_v39  ;;  %v2190_v62 = vshll.u32 %v2966_v29, %v2184_v49  ;;  %v2196_v58 = vshll.u32 %v2968_v33, %v2184_v49  ;;  %v2193_v12 = vshll.u32 %v2967_v31, %v2184_v49 }
 0x202   : > { %v1988_v19 = vmul.f32 %v4606_v52, %v4606_v52  ;;  %v2114_v2 = vadd.s32 536870912, %v2113_v37  ;;  %v2188_v61 = vshrl.u32 %v2966_v29, %v4608_v20  ;;  %v2191_v25 = vshrl.u32 %v2967_v31, %v4608_v20 }
 0x203   : > { %v2197_v26 = vshrl.u32 %v2969_v35, %v4608_v20  ;;  %v2194_v34 = vshrl.u32 %v2968_v33, %v4608_v20  ;;  %v2199_v45 = vshll.u32 %v2969_v35, %v2184_v49  ;;  %v2200_v42 = vshrl.u32 %v2970_v44, %v4608_v20 }
 0x204   : > { %v1989_v38 = vmul.f32 -0.001358992, %v1988_v19  ;;  %v1996_v43 = vmul.f32 -0.00019511016, %v1988_v19  ;;  %v4624_v16 = vshrl.u32 %v2114_v2, 30  ;;  %v4630_v17 = vor.u32 %v2188_v61, %v2187_v4 }
 0x205   : > { %v4636_v41 = vor.u32 %v2191_v25, %v2190_v62  ;;  %v2198_v7 = vor.u32 %v2197_v26, %v2196_v58  ;;  %vm2202_vm0 = vcmp.lt.s32.totalorder %v4613_v18, 1  ;;  %v2195_v11 = vor.u32 %v2194_v34, %v2193_v12 }
 0x206   : > { %v1990_v13 = vadd.f32 0.041655596, %v1989_v38  ;;  %v1997_v15 = vadd.f32 0.008332121, %v1996_v43  ;;  %v2116_v57 = vshll.u32 %v4624_v16, 30  ;;  %vm2205_vm2 = vcmp.lt.s32.totalorder %v4613_v18, 4 }
 0x207   : > { %vm2203_vm4 = vcmp.lt.s32.totalorder %v4613_v18, 2  ;;  %vm2204_vm5 = vcmp.lt.s32.totalorder %v4613_v18, 3  ;;  %vm2003_vm6 = vweird.f32 %v4316_v3  ;;  %v2201_v5 = vor.u32 %v2200_v42, %v2199_v45 }
 0x208   : > { %v1991_v59 = vmul.f32 %v1990_v13, %v1988_v19  ;;  %v1998_v0 = vmul.f32 %v1997_v15, %v1988_v19  ;;  %v4643_v22 = vsub.s32 %v2113_v37, %v2116_v57  ;;  %v2210_v36 = vsel %vm2202_vm0, %v4630_v17, %v4636_v41 }
 0x209   : > { %v2109_v8 = vadd.s32 %v4586_v56, %v4584_v23  ;;  %v2211_v46 = vsel %vm2205_vm2, %v2198_v7, 920167782  ;;  %v2791_v49 = vadd.s32 4294967169, %v2329_v53  ;;  %v4666_v39 = vand.u32 8388607, %v2325_v63 }
 0x20a   : > { %v1992_v30 = vadd.f32 -0.4999988, %v1991_v59  ;;  %v1999_v32 = vadd.f32 -0.16666654, %v1998_v0  ;;  %vm2118_vm7 = vcmp.lt.s32.totalorder %v4643_v22, 0  ;;  %v2119_v55 = vsub.s32 0, %v4643_v22 }
 0x20b   : > { %v2212_v21 = vsel %vm2204_vm5, %v2195_v11, %v2211_v46  ;;  %v2215_v56 = vsel %vm2205_vm2, %v2201_v5, 1326507024  ;;  %v2219_v4 = vand.u32 65535, %v4632_v10  ;;  %v2220_v2 = vshrl.u32 %v4632_v10, 16 }
 0x20c   : > { %v1993_v24 = vmul.f32 %v1992_v30, %v1988_v19  ;;  %v2000_v9 = vmul.f32 %v1999_v32, %v1988_v19  ;;  %v2120_v54 = vsel %vm2118_vm7, %v2119_v55, %v4643_v22  ;;  %v2213_v1 = vsel %vm2203_vm4, %v2210_v36, %v2212_v21 }
 0x20d   : > { %v2121_v19 = vclz %v2120_v54  ;;  %v2244_v61 = vshrl.u32 %v2213_v1, 16  ;;  %v2214_v43 = vsel %vm2202_vm0, %v4636_v41, %v2195_v11  ;;  %v2139_v14 = vsub.s32 4, %v4624_v16 }
 0x20e   : > { %v1994_v48 = vadd.f32 1.0, %v1993_v24  ;;  %v2001_v37 = vadd.f32 1.0, %v2000_v9  ;;  %v2186_v58 = vshrl.u32 %v2965_v27, %v4608_v20  ;;  %v2216_v26 = vsel %vm2204_vm5, %v2198_v7, %v2215_v56 }
 0x20f   : > { %v2786_v38 = vadd.s32 4294967294, %v2121_v19  ;;  %v2335_v12 = vadd.s32 1, %v2791_v49  ;;  %v2217_v15 = vsel %vm2203_vm4, %v2214_v43, %v2216_v26  ;;  %v2243_v57 = vand.u32 65535, %v2213_v1 }
 0x210   : > { %v2002_v62 = vmul.f32 %v2001_v37, %v4606_v52  ;;  %v2011_v25 = vxor.u32 2147483648, %v1994_v48  ;;  %v2207_v52 = vsel %vm2205_vm2, %v2195_v11, 2102212464  ;;  %v2246_v45 = vmul.u32 %v2244_v61, %v2219_v4 }
 0x211   : > { %vm2787_vm10 = vcmp.lt.s32.totalorder %v2786_v38, 0  ;;  %v2140_v11 = vsel %vm2017_vm8, %v2139_v14, %v4624_v16  ;;  %v2206_v53 = vsel %vm2202_vm0, %v2186_v58, %v4630_v17  ;;  %v2208_v30 = vsel %vm2204_vm5, %v4636_v41, %v2207_v52 }
 0x212   : > { %v2008_v34 = vxor.u32 2147483648, %v2002_v62  ;;  %v2012_v28 = vsel %vm2010_vm15, %v2011_v25, %v2002_v62  ;;  %v2124_v13 = vsel %vm2787_vm10, 0, %v2786_v38  ;;  %v2221_v5 = vand.u32 65535, %v2217_v15 }
 0x213   : > { %v2125_v42 = vsub.s32 32, %v2124_v13  ;;  %v2126_v59 = vshll.u32 %v4643_v22, %v2124_v13  ;;  %v2129_v0 = vsub.s32 4294967266, %v2124_v13  ;;  %v2222_v6 = vshrl.u32 %v2217_v15, 16 }
 0x214   : > { %v2009_v20 = vsel %vm2007_vm1, %v1994_v48, %v2008_v34  ;;  %v2245_v36 = vmul.u32 %v2243_v57, %v2219_v4  ;;  %v2247_v24 = vmul.u32 %v2243_v57, %v2220_v2  ;;  %v2249_v9 = vshll.u32 %v2246_v45, 16 }
 0x215   : > { %v2013_v7 = vsel %vm2006_vm3, %v2009_v20, %v2012_v28  ;;  %v2127_v22 = vshrl.u32 %v2109_v8, %v2125_v42  ;;  %v2130_v55 = vadd.s32 127, %v2129_v0  ;;  %v2142_v17 = vsel %vm4672_vm9, 0, %v2140_v11 }
 0x216   : > { %v2014_v32 = vsel %vm2003_vm6, nan, %v2013_v7  ;;  %v2225_v54 = vmul.u32 %v2221_v5, %v2220_v2  ;;  %v4716_v41 = vsel %vm2203_vm4, %v2206_v53, %v2208_v30  ;;  %v2223_v3 = vmul.u32 %v2221_v5, %v2219_v4 }
 0x217   : > { %2646 = vst [vmem:[%s3378_s17 + $0x58] sm:$0xff] %v2014_v32  ;;  %v2128_v16 = vor.u32 %v2127_v22, %v2126_v59  ;;  %v2131_v46 = vshll.u32 %v2130_v55, 23  ;;  %v2224_v21 = vmul.u32 %v2222_v6, %v2219_v4  ;;  %v2248_v8 = vmul.u32 %v2244_v61, %v2220_v2 }
 0x218   : > { %v2226_v37 = vmul.u32 %v2222_v6, %v2220_v2  ;;  %v2251_v19 = vshll.u32 %v2247_v24, 16  ;;  %v2229_v56 = vshll.u32 %v2225_v54, 16  ;;  %v2250_v62 = vshrl.u32 %v2246_v45, 16 }
 0x219   : > { %v2132_v49 = vor.u32 4788187, %v2131_v46  ;;  %v2135_v48 = vcvt.s32.f32 %v2128_v16  ;;  %v2227_v1 = vshll.u32 %v2224_v21, 16  ;;  %vm2253_vm11 = vc.u32 %v2245_v36, %v2249_v9 }
 0x21a   : > { %v2254_v38 = vsel %vm2253_vm11, 1, %v2971_v50  ;;  %v2255_v43 = vadd.s32 %v2249_v9, %v2245_v36  ;;  %vm2336_vm12 = vcmp.gt.s32.totalorder %v2335_v12, 0  ;;  %v2228_v4 = vshrl.u32 %v2224_v21, 16 }
 0x21b   : > { %v2133_v25 = vand.u32 2147483647, %v2132_v49  ;;  %vm2231_vm13 = vc.u32 %v2223_v3, %v2227_v1  ;;  %v2233_v18 = vadd.s32 %v2227_v1, %v2223_v3  ;;  %v2256_v14 = vadd.s32 %v2254_v38, %v2248_v8 }
 0x21c   : > { %v2337_v58 = vsel %vm2336_vm12, %v2335_v12, 0  ;;  %v2232_v61 = vsel %vm2231_vm13, 1, %v2971_v50  ;;  %vm2257_vm14 = vc.u32 %v2255_v43, %v2251_v19  ;;  %v2252_v34 = vshrl.u32 %v2247_v24, 16 }
 0x21d   : > { %v2136_v26 = vmul.f32 %v2135_v48, %v2133_v25  ;;  %v2234_v2 = vadd.s32 %v2232_v61, %v2226_v37  ;;  %vm2235_vm15 = vc.u32 %v2233_v18, %v2229_v56  ;;  %v2258_v28 = vsel %vm2257_vm14, 1, %v2971_v50 }
 0x21e   : > { %v2236_v13 = vsel %vm2235_vm15, 1, %v2971_v50  ;;  %v2260_v15 = vadd.s32 %v2258_v28, %v2256_v14  ;;  %v2339_v57 = vand.u32 31, %v2337_v58  ;;  %v2159_v45 = vadd.s32 3, %v2142_v17 }
 0x21f   : > { %v2137_v52 = vxor.u32 2147483648, %v2136_v26  ;;  %v2230_v20 = vshrl.u32 %v2225_v54, 16  ;;  %v2238_v42 = vadd.s32 %v2236_v13, %v2234_v2  ;;  %v2263_v12 = vmul.u32 %v4632_v10, %v4716_v41 }
 0x220   : > { %v4726_v0 = vadd.s32 %v2255_v43, %v2251_v19  ;;  %v2261_v7 = vadd.s32 %v2260_v15, %v2250_v62  ;;  %v4728_v11 = vsub.s32 32, %v2339_v57  ;;  %v4733_v32 = vshrl.u32 %v2337_v58, 5 }
 0x221   : > { %v2138_v59 = vsel %vm2017_vm8, %v2137_v52, %v2136_v26  ;;  %v2239_v30 = vadd.s32 %v2238_v42, %v2228_v4  ;;  %v2342_v22 = vshll.u32 %v2965_v27, %v2339_v57  ;;  %v2345_v6 = vshll.u32 %v2966_v29, %v2339_v57 }
 0x222   : > { %v2141_v53 = vsel %vm4672_vm9, %v4367_v51, %v2138_v59  ;;  %v2262_v5 = vadd.s32 %v2261_v7, %v2252_v34  ;;  %v2343_v10 = vshrl.u32 %v2966_v29, %v4728_v11  ;;  %v2346_v24 = vshrl.u32 %v2967_v31, %v4728_v11 }
 0x223   : > { %v2143_v55 = vmul.f32 %v2141_v53, %v2141_v53  ;;  %v4739_v36 = vadd.s32 %v2239_v30, %v2230_v20  ;;  %v2348_v23 = vshll.u32 %v2967_v31, %v2339_v57  ;;  %v2349_v51 = vshrl.u32 %v2968_v33, %v4728_v11 }
 0x224   : > { %v2266_v46 = vadd.s32 1, %v2262_v5  ;;  %v2351_v17 = vshll.u32 %v2968_v33, %v2339_v57  ;;  %v4747_v54 = vand.u32 3, %v2159_v45  ;;  %v4751_v41 = vor.u32 %v2343_v10, %v2342_v22 }
 0x225   : > { %v2144_v9 = vmul.f32 -0.001358992, %v2143_v55  ;;  %v2151_v16 = vmul.f32 -0.00019511016, %v2143_v55  ;;  %vm2265_vm0 = vc.u32 %v4739_v36, %v4726_v0  ;;  %vm2357_vm1 = vcmp.lt.s32.totalorder %v4733_v32, 1 }
 0x226   : > { %v2267_v8 = vsel %vm2265_vm0, %v2266_v46, %v2262_v5  ;;  %v2352_v49 = vshrl.u32 %v2969_v35, %v4728_v11  ;;  %v4756_v37 = vor.u32 %v2346_v24, %v2345_v6  ;;  %v2354_v19 = vshll.u32 %v2969_v35, %v2339_v57 }
 0x227   : > { %v2145_v3 = vadd.f32 0.041655596, %v2144_v9  ;;  %v2152_v21 = vadd.f32 0.008332121, %v2151_v16  ;;  %v2268_v48 = vadd.s32 %v2267_v8, %v2263_v12  ;;  %v2355_v1 = vshrl.u32 %v2970_v44, %v4728_v11  ;;  %v2864_v16 = vld [vmem:[%s3076_s24 + $0x60] sm:$0xff] }
 0x228   : > { %v2350_v25 = vor.u32 %v2349_v51, %v2348_v23  ;;  %v2353_v38 = vor.u32 %v2352_v49, %v2351_v17  ;;  %vm2359_vm2 = vcmp.lt.s32.totalorder %v4733_v32, 3  ;;  %vm2360_vm3 = vcmp.lt.s32.totalorder %v4733_v32, 4 }
 0x229   : > { %v2146_v56 = vmul.f32 %v2145_v3, %v2143_v55  ;;  %v2153_v62 = vmul.f32 %v2152_v21, %v2143_v55  ;;  %v2269_v43 = vadd.s32 536870912, %v2268_v48  ;;  %v2356_v18 = vor.u32 %v2355_v1, %v2354_v19 }
 0x22a   : > { %v2333_v26 = vor.u32 8388608, %v4666_v39  ;;  %vm2358_vm4 = vcmp.lt.s32.totalorder %v4733_v32, 2  ;;  %v2365_v61 = vsel %vm2357_vm1, %v4751_v41, %v4756_v37  ;;  %v2366_v2 = vsel %vm2360_vm3, %v2353_v38, 920167782 }
 0x22b   : > { %v2147_v14 = vadd.f32 -0.4999988, %v2146_v56  ;;  %v2154_v58 = vadd.f32 -0.16666654, %v2153_v62  ;;  %v4764_v4 = vshrl.u32 %v2269_v43, 30  ;;  %v2367_v52 = vsel %vm2359_vm2, %v2350_v25, %v2366_v2 }
 0x22c   : > { %v2369_v39 = vsel %vm2357_vm1, %v4756_v37, %v2350_v25  ;;  %vm2161_vm5 = vcmp.lt.s32.totalorder %v4747_v54, 2  ;;  %v2370_v15 = vsel %vm2360_vm3, %v2356_v18, 1326507024  ;;  %v4784_v42 = vshll.u32 %v2333_v26, 8 }
 0x22d   : > { %v2148_v34 = vmul.f32 %v2147_v14, %v2143_v55  ;;  %v2155_v28 = vmul.f32 %v2154_v58, %v2143_v55  ;;  %v2271_v13 = vshll.u32 %v4764_v4, 30  ;;  %v2371_v20 = vsel %vm2359_vm2, %v2353_v38, %v2370_v15 }
 0x22e   : > { %vm2165_vm6 = vcmp.eq.s32.totalorder %v4747_v54, 2  ;;  %v2368_v59 = vsel %vm2358_vm4, %v2365_v61, %v2367_v52  ;;  %v2372_v7 = vsel %vm2358_vm4, %v2369_v39, %v2371_v20  ;;  %vm2162_vm7 = vcmp.eq.s32.totalorder %v4747_v54, 0 }
 0x22f   : > { %v2149_v57 = vadd.f32 1.0, %v2148_v34  ;;  %v2156_v45 = vadd.f32 1.0, %v2155_v28  ;;  %v2272_v12 = vsub.s32 %v2268_v48, %v2271_v13  ;;  %v2374_v55 = vand.u32 65535, %v4784_v42 }
 0x230   : > { %v2375_v10 = vshrl.u32 %v4784_v42, 16  ;;  %v2376_v6 = vand.u32 65535, %v2372_v7  ;;  %v2377_v51 = vshrl.u32 %v2372_v7, 16  ;;  %v2399_v9 = vshrl.u32 %v2368_v59, 16 }
 0x231   : > { %v2157_v30 = vmul.f32 %v2156_v45, %v2141_v53  ;;  %v2166_v22 = vxor.u32 2147483648, %v2149_v57  ;;  %vm2273_vm8 = vcmp.lt.s32.totalorder %v2272_v12, 0  ;;  %v2274_v5 = vsub.s32 0, %v2272_v12 }
 0x232   : > { %vm2158_vm9 = vweird.f32 %v2864_v16  ;;  %v2380_v17 = vmul.u32 %v2376_v6, %v2375_v10  ;;  %v2398_v53 = vand.u32 65535, %v2368_v59  ;;  %v2378_v8 = vmul.u32 %v2376_v6, %v2374_v55 }
 0x233   : > { %v2163_v24 = vxor.u32 2147483648, %v2157_v30  ;;  %v2167_v23 = vsel %vm2165_vm6, %v2166_v22, %v2157_v30  ;;  %v2275_v46 = vsel %vm2273_vm8, %v2274_v5, %v2272_v12  ;;  %v2379_v49 = vmul.u32 %v2377_v51, %v2374_v55  ;;  %v4815_v30 = vld [vmem:[%s3076_s24 + $0x78] sm:$0xff] }
 0x234   : > { %v2276_v21 = vclz %v2275_v46  ;;  %v2401_v19 = vmul.u32 %v2399_v9, %v2374_v55  ;;  %v2381_v62 = vmul.u32 %v2377_v51, %v2375_v10  ;;  %v2264_v43 = vadd.s32 %v4726_v0, %v4739_v36 }
 0x235   : > { %v2164_v3 = vsel %vm2162_vm7, %v2149_v57, %v2163_v24  ;;  %v2382_v38 = vshll.u32 %v2379_v49, 16  ;;  %v2341_v18 = vshrl.u32 %v2965_v27, %v4728_v11  ;;  %v2362_v14 = vsel %vm2360_vm3, %v2350_v25, 2102212464 }
 0x236   : > { %v2168_v48 = vsel %vm2161_vm5, %v2164_v3, %v2167_v23  ;;  %v2789_v56 = vadd.s32 4294967294, %v2276_v21  ;;  %v2384_v58 = vshll.u32 %v2380_v17, 16  ;;  %v2402_v26 = vmul.u32 %v2398_v53, %v2375_v10 }
 0x237   : > { %v2169_v1 = vsel %vm2158_vm9, nan, %v2168_v48  ;;  %vm2386_vm11 = vc.u32 %v2378_v8, %v2382_v38  ;;  %v2388_v54 = vadd.s32 %v2382_v38, %v2378_v8  ;;  %v2400_v34 = vmul.u32 %v2398_v53, %v2374_v55 }
 0x238   : > { %2647 = vst [vmem:[%s3378_s17 + $0x60] sm:$0xff] %v2169_v1  ;;  %vm2790_vm10 = vcmp.lt.s32.totalorder %v2789_v56, 0  ;;  %v2387_v2 = vsel %vm2386_vm11, 1, %v2971_v50  ;;  %v2404_v28 = vshll.u32 %v2401_v19, 16  ;;  %v2361_v11 = vsel %vm2357_vm1, %v2341_v18, %v4751_v41 }
 0x239   : > { %v2279_v61 = vsel %vm2790_vm10, 0, %v2789_v56  ;;  %v2389_v39 = vadd.s32 %v2387_v2, %v2381_v62  ;;  %v2383_v25 = vshrl.u32 %v2379_v49, 16  ;;  %vm2390_vm12 = vc.u32 %v2388_v54, %v2384_v58 }
 0x23a   : > { %v2280_v52 = vsub.s32 32, %v2279_v61  ;;  %v2281_v0 = vshll.u32 %v2272_v12, %v2279_v61  ;;  %v2284_v36 = vsub.s32 4294967266, %v2279_v61  ;;  %v2403_v13 = vmul.u32 %v2399_v9, %v2375_v10 }
 0x23b   : > { %v2391_v45 = vsel %vm2390_vm12, 1, %v2971_v50  ;;  %v2406_v20 = vshll.u32 %v2402_v26, 16  ;;  %v2363_v59 = vsel %vm2359_vm2, %v4756_v37, %v2362_v14  ;;  %vm2408_vm13 = vc.u32 %v2400_v34, %v2404_v28 }
 0x23c   : > { %v2282_v15 = vshrl.u32 %v2264_v43, %v2280_v52  ;;  %v2285_v57 = vadd.s32 127, %v2284_v36  ;;  %v2393_v7 = vadd.s32 %v2391_v45, %v2389_v39  ;;  %v2410_v12 = vadd.s32 %v2404_v28, %v2400_v34 }
 0x23d   : > { %v2385_v41 = vshrl.u32 %v2380_v17, 16  ;;  %v2409_v5 = vsel %vm2408_vm13, 1, %v2971_v50  ;;  %v2405_v6 = vshrl.u32 %v2401_v19, 16  ;;  %v2294_v9 = vsub.s32 4, %v4764_v4 }
 0x23e   : > { %v2283_v22 = vor.u32 %v2282_v15, %v2281_v0  ;;  %v2286_v55 = vshll.u32 %v2285_v57, 23  ;;  %v2394_v10 = vadd.s32 %v2393_v7, %v2383_v25  ;;  %v2411_v24 = vadd.s32 %v2409_v5, %v2403_v13 }
 0x23f   : > { %vm2412_vm14 = vc.u32 %v2410_v12, %v2406_v20  ;;  %v2407_v16 = vshrl.u32 %v2402_v26, 16  ;;  %v2483_v53 = vand.u32 2139095040, %v4815_v30  ;;  %v4823_v17 = vadd.s32 %v2410_v12, %v2406_v20 }
 0x240   : > { %v2287_v23 = vor.u32 4788187, %v2286_v55  ;;  %v2290_v51 = vcvt.s32.f32 %v2283_v22  ;;  %v2413_v37 = vsel %vm2412_vm14, 1, %v2971_v50  ;;  %v4821_v21 = vadd.s32 %v2394_v10, %v2385_v41 }
 0x241   : > { %v2415_v46 = vadd.s32 %v2413_v37, %v2411_v24  ;;  %vm2172_vm15 = vcmp.lt.s32.totalorder %v4556_v60, 0  ;;  %v2364_v8 = vsel %vm2358_vm4, %v2361_v11, %v2363_v59  ;;  %v2484_v48 = vshrl.u32 %v2483_v53, 23 }
 0x242   : > { %v2288_v3 = vand.u32 2147483647, %v2287_v23  ;;  %v2295_v1 = vsel %vm2172_vm15, %v2294_v9, %v4764_v4  ;;  %vm2171_vm0 = vcmp.le.f32.partialorder %v2170_v40, 0.7853982  ;;  %v2418_v43 = vmul.u32 %v4784_v42, %v2364_v8 }
 0x243   : > { %v2416_v49 = vadd.s32 %v2415_v46, %v2405_v6  ;;  %v2794_v62 = vadd.s32 4294967169, %v2484_v48  ;;  %vm2420_vm1 = vc.u32 %v4821_v21, %v4823_v17  ;;  %v2297_v18 = vsel %vm2171_vm0, 0, %v2295_v1 }
 0x244   : > { %v2291_v19 = vmul.f32 %v2290_v51, %v2288_v3  ;;  %v2480_v4 = vand.u32 2147483647, %v4815_v30  ;;  %v2314_v2 = vadd.s32 3, %v2297_v18  ;;  %vm2313_vm11 = vweird.f32 %v4556_v60 }
 0x245   : > { %v2417_v56 = vadd.s32 %v2416_v49, %v2407_v16  ;;  %v2490_v32 = vadd.s32 1, %v2794_v62  ;;  %vm2327_vm13 = vcmp.lt.s32.totalorder %v4597_v47, 0  ;;  %vm4903_vm14 = vcmp.le.f32.partialorder %v2325_v63, 0.7853982 }
 0x246   : > { %v2292_v38 = vxor.u32 2147483648, %v2291_v19  ;;  %v2487_v36 = vand.u32 8388607, %v2480_v4  ;;  %v2315_v13 = vand.u32 3, %v2314_v2 }
 0x247   : > { %v2421_v14 = vadd.s32 1, %v2417_v56  ;;  %vm2491_vm2 = vcmp.gt.s32.totalorder %v2490_v32, 0 }
 0x248   : > { %v2293_v58 = vsel %vm2172_vm15, %v2292_v38, %v2291_v19  ;;  %v2492_v40 = vsel %vm2491_vm2, %v2490_v32, 0  ;;  %v2488_v9 = vor.u32 8388608, %v2487_v36  ;;  %vm2317_vm7 = vcmp.eq.s32.totalorder %v2315_v13, 0 }
 0x249   : > { %v2296_v54 = vsel %vm2171_vm0, %v4556_v60, %v2293_v58  ;;  %v2422_v26 = vsel %vm2420_vm1, %v2421_v14, %v2417_v56  ;;  %v2494_v28 = vand.u32 31, %v2492_v40  ;;  %v4842_v57 = vshrl.u32 %v2492_v40, 5 }
 0x24a   : > { %v2298_v61 = vmul.f32 %v2296_v54, %v2296_v54  ;;  %v2423_v34 = vadd.s32 %v2422_v26, %v2418_v43  ;;  %vm2320_vm8 = vcmp.eq.s32.totalorder %v2315_v13, 2  ;;  %vm2316_vm10 = vcmp.lt.s32.totalorder %v2315_v13, 2 }
 0x24b   : > { %v4838_v39 = vsub.s32 32, %v2494_v28  ;;  %v2497_v45 = vshll.u32 %v2965_v27, %v2494_v28  ;;  %v2506_v59 = vshll.u32 %v2968_v33, %v2494_v28  ;;  %v2500_v55 = vshll.u32 %v2966_v29, %v2494_v28 }
 0x24c   : > { %v2299_v52 = vmul.f32 -0.001358992, %v2298_v61  ;;  %v2306_v42 = vmul.f32 -0.00019511016, %v2298_v61  ;;  %v2424_v0 = vadd.s32 536870912, %v2423_v34  ;;  %v2503_v5 = vshll.u32 %v2967_v31, %v2494_v28 }
 0x24d   : > { %v2498_v20 = vshrl.u32 %v2966_v29, %v4838_v39  ;;  %v2501_v41 = vshrl.u32 %v2967_v31, %v4838_v39  ;;  %v2504_v10 = vshrl.u32 %v2968_v33, %v4838_v39  ;;  %v2507_v6 = vshrl.u32 %v2969_v35, %v4838_v39 }
 0x24e   : > { %v2300_v11 = vadd.f32 0.041655596, %v2299_v52  ;;  %v2307_v25 = vadd.f32 0.008332121, %v2306_v42  ;;  %v4840_v15 = vshrl.u32 %v2424_v0, 30  ;;  %v2509_v29 = vshll.u32 %v2969_v35, %v2494_v28 }
 0x24f   : > { %v4857_v37 = vor.u32 %v2498_v20, %v2497_v45  ;;  %v2508_v16 = vor.u32 %v2507_v6, %v2506_v59  ;;  %v2510_v46 = vshrl.u32 %v2970_v44, %v4838_v39  ;;  %v4862_v33 = vor.u32 %v2501_v41, %v2500_v55 }
 0x250   : > { %v2301_v7 = vmul.f32 %v2300_v11, %v2298_v61  ;;  %v2308_v12 = vmul.f32 %v2307_v25, %v2298_v61  ;;  %v2426_v22 = vshll.u32 %v4840_v15, 30  ;;  %v4864_v8 = vor.u32 %v2504_v10, %v2503_v5 }
 0x251   : > { %vm2512_vm4 = vcmp.lt.s32.totalorder %v4842_v57, 1  ;;  %vm2514_vm5 = vcmp.lt.s32.totalorder %v4842_v57, 3  ;;  %vm2515_vm6 = vcmp.lt.s32.totalorder %v4842_v57, 4  ;;  %v2511_v56 = vor.u32 %v2510_v46, %v2509_v29 }
 0x252   : > { %v2302_v24 = vadd.f32 -0.4999988, %v2301_v7  ;;  %v2309_v23 = vadd.f32 -0.16666654, %v2308_v12  ;;  %v2427_v51 = vsub.s32 %v2423_v34, %v2426_v22  ;;  %v2521_v62 = vsel %vm2515_vm6, %v2508_v16, 920167782 }
 0x253   : > { %vm2513_vm9 = vcmp.lt.s32.totalorder %v4842_v57, 2  ;;  %v2520_v43 = vsel %vm2512_vm4, %v4857_v37, %v4862_v33  ;;  %v2522_v18 = vsel %vm2514_vm5, %v4864_v8, %v2521_v62  ;;  %v4879_v58 = vshll.u32 %v2488_v9, 8 }
 0x254   : > { %v2303_v53 = vmul.f32 %v2302_v24, %v2298_v61  ;;  %v2310_v31 = vmul.f32 %v2309_v23, %v2298_v61  ;;  %vm2428_vm3 = vcmp.lt.s32.totalorder %v2427_v51, 0  ;;  %v2429_v3 = vsub.s32 0, %v2427_v51 }
 0x255   : > { %v2524_v26 = vsel %vm2512_vm4, %v4862_v33, %v4864_v8  ;;  %v2523_v34 = vsel %vm2513_vm9, %v2520_v43, %v2522_v18  ;;  %v2525_v40 = vsel %vm2515_vm6, %v2511_v56, 1326507024  ;;  %v2529_v42 = vand.u32 65535, %v4879_v58 }
 0x256   : > { %v2304_v49 = vadd.f32 1.0, %v2303_v53  ;;  %v2311_v48 = vadd.f32 1.0, %v2310_v31  ;;  %v2430_v19 = vsel %vm2428_vm3, %v2429_v3, %v2427_v51  ;;  %v2530_v0 = vshrl.u32 %v4879_v58, 16 }
 0x257   : > { %v2431_v35 = vclz %v2430_v19  ;;  %v2526_v25 = vsel %vm2514_vm5, %v2508_v16, %v2525_v40  ;;  %v2553_v13 = vand.u32 65535, %v2523_v34  ;;  %v2554_v20 = vshrl.u32 %v2523_v34, 16 }
 0x258   : > { %v2312_v44 = vmul.f32 %v2311_v48, %v2296_v54  ;;  %v2321_v1 = vxor.u32 2147483648, %v2304_v49  ;;  %v2419_v54 = vadd.s32 %v4823_v17, %v4821_v21  ;;  %v2527_v45 = vsel %vm2513_vm9, %v2524_v26, %v2526_v25 }
 0x259   : > { %v2792_v38 = vadd.s32 4294967294, %v2431_v35  ;;  %v2531_v12 = vand.u32 65535, %v2527_v45  ;;  %v2532_v22 = vshrl.u32 %v2527_v45, 16  ;;  %v2555_v41 = vmul.u32 %v2553_v13, %v2529_v42 }
 0x25a   : > { %v2318_v14 = vxor.u32 2147483648, %v2312_v44  ;;  %v2322_v32 = vsel %vm2320_vm8, %v2321_v1, %v2312_v44  ;;  %v2556_v5 = vmul.u32 %v2554_v20, %v2529_v42  ;;  %v2557_v10 = vmul.u32 %v2553_v13, %v2530_v0 }
 0x25b   : > { %vm2793_vm12 = vcmp.lt.s32.totalorder %v2792_v38, 0  ;;  %v2533_v23 = vmul.u32 %v2531_v12, %v2529_v42  ;;  %v2496_v9 = vshrl.u32 %v2965_v27, %v4838_v39  ;;  %v2535_v16 = vmul.u32 %v2531_v12, %v2530_v0 }
 0x25c   : > { %v2319_v61 = vsel %vm2317_vm7, %v2304_v49, %v2318_v14  ;;  %v2434_v2 = vsel %vm2793_vm12, 0, %v2792_v38  ;;  %v2558_v29 = vmul.u32 %v2554_v20, %v2530_v0  ;;  %v2559_v46 = vshll.u32 %v2556_v5, 16 }
 0x25d   : > { %v2323_v60 = vsel %vm2316_vm10, %v2319_v61, %v2322_v32  ;;  %v2435_v28 = vsub.s32 32, %v2434_v2  ;;  %v2436_v52 = vshll.u32 %v2427_v51, %v2434_v2  ;;  %v2439_v21 = vsub.s32 4294967266, %v2434_v2 }
 0x25e   : > { %v2324_v17 = vsel %vm2313_vm11, nan, %v2323_v60  ;;  %v2534_v51 = vmul.u32 %v2532_v22, %v2529_v42  ;;  %v2449_v31 = vsub.s32 4, %v4840_v15  ;;  %v2536_v63 = vmul.u32 %v2532_v22, %v2530_v0 }
 0x25f   : > { %v2437_v36 = vshrl.u32 %v2419_v54, %v2435_v28  ;;  %v2440_v11 = vadd.s32 127, %v2439_v21  ;;  %2648 = vst [vmem:[%s3378_s17 + $0x68] sm:$0xff] %v2324_v17  ;;  %v2517_v49 = vsel %vm2515_vm6, %v4864_v8, 2102212464  ;;  %v2539_v48 = vshll.u32 %v2535_v16, 16 }
 0x260   : > { %v2537_v3 = vshll.u32 %v2534_v51, 16  ;;  %v2561_v19 = vshll.u32 %v2557_v10, 16  ;;  %vm2563_vm15 = vc.u32 %v2555_v41, %v2559_v46  ;;  %v2516_v39 = vsel %vm2512_vm4, %v2496_v9, %v4857_v37 }
 0x261   : > { %v2438_v59 = vor.u32 %v2437_v36, %v2436_v52  ;;  %v2441_v7 = vshll.u32 %v2440_v11, 23  ;;  %v2564_v27 = vsel %vm2563_vm15, 1, %v2971_v50  ;;  %v2565_v56 = vadd.s32 %v2559_v46, %v2555_v41 }
 0x262   : > { %vm2541_vm0 = vc.u32 %v2533_v23, %v2537_v3  ;;  %v2543_v44 = vadd.s32 %v2537_v3, %v2533_v23  ;;  %v2566_v62 = vadd.s32 %v2564_v27, %v2558_v29  ;;  %v2538_v43 = vshrl.u32 %v2534_v51, 16 }
 0x263   : > { %v2442_v6 = vor.u32 4788187, %v2441_v7  ;;  %v2445_v24 = vcvt.s32.f32 %v2438_v59  ;;  %v2542_v1 = vsel %vm2541_vm0, 1, %v2971_v50  ;;  %v2518_v8 = vsel %vm2514_vm5, %v4862_v33, %v2517_v49 }
 0x264   : > { %v2544_v18 = vadd.s32 %v2542_v1, %v2536_v63  ;;  %vm2545_vm1 = vc.u32 %v2543_v44, %v2539_v48  ;;  %v2560_v32 = vshrl.u32 %v2556_v5, 16  ;;  %vm2567_vm2 = vc.u32 %v2565_v56, %v2561_v19 }
 0x265   : > { %v2443_v53 = vand.u32 2147483647, %v2442_v6  ;;  %v2546_v14 = vsel %vm2545_vm1, 1, %v2971_v50  ;;  %v2540_v37 = vshrl.u32 %v2535_v16, 16  ;;  %v2568_v61 = vsel %vm2567_vm2, 1, %v2971_v50 }
 0x266   : > { %v2548_v26 = vadd.s32 %v2546_v14, %v2544_v18  ;;  %v2450_v2 = vsel %vm2327_vm13, %v2449_v31, %v4840_v15  ;;  %v2562_v33 = vshrl.u32 %v2557_v10, 16  ;;  %v2570_v40 = vadd.s32 %v2568_v61, %v2566_v62 }
 0x267   : > { %v2446_v35 = vmul.f32 %v2445_v24, %v2443_v53  ;;  %v2569_v52 = vadd.s32 %v2565_v56, %v2561_v19  ;;  %v2519_v21 = vsel %vm2513_vm9, %v2516_v39, %v2518_v8  ;;  %v2452_v50 = vsel %vm4903_vm14, 0, %v2450_v2 }
 0x268   : > { %v2549_v28 = vadd.s32 %v2548_v26, %v2538_v43  ;;  %v2571_v17 = vadd.s32 %v2570_v40, %v2560_v32  ;;  %v2573_v13 = vmul.u32 %v4879_v58, %v2519_v21  ;;  %v2469_v45 = vadd.s32 3, %v2452_v50 }
 0x269   : > { %v2447_v38 = vxor.u32 2147483648, %v2446_v35  ;;  %vm2468_vm7 = vweird.f32 %v4597_v47  ;;  %vm2482_vm10 = vcmp.lt.s32.totalorder %v4815_v30, 0  ;;  %vm2481_vm11 = vcmp.le.f32.partialorder %v2480_v4, 0.7853982 }
 0x26a   : > { %v2550_v36 = vadd.s32 %v2549_v28, %v2540_v37  ;;  %v2572_v15 = vadd.s32 %v2571_v17, %v2562_v33  ;;  %v2470_v5 = vand.u32 3, %v2469_v45  ;;  %vm2623_vm15 = vweird.f32 %v4815_v30 }
 0x26b   : > { %v2448_v54 = vsel %vm2327_vm13, %v2447_v38, %v2446_v35 }
 0x26c   : > { %v2451_v34 = vsel %vm4903_vm14, %v4597_v47, %v2448_v54  ;;  %vm2575_vm3 = vc.u32 %v2550_v36, %v2569_v52  ;;  %v2576_v20 = vadd.s32 1, %v2572_v15  ;;  %vm2475_vm4 = vcmp.eq.s32.totalorder %v2470_v5, 2 }
 0x26d   : > { %v2453_v60 = vmul.f32 %v2451_v34, %v2451_v34  ;;  %vm2472_vm5 = vcmp.eq.s32.totalorder %v2470_v5, 0  ;;  %vm2471_vm6 = vcmp.lt.s32.totalorder %v2470_v5, 2  ;;  %v2574_v44 = vadd.s32 %v2569_v52, %v2550_v36 }
 0x26e   : > { %v2577_v12 = vsel %vm2575_vm3, %v2576_v20, %v2572_v15 }
 0x26f   : > { %v2454_v42 = vmul.f32 -0.001358992, %v2453_v60  ;;  %v2461_v0 = vmul.f32 -0.00019511016, %v2453_v60  ;;  %v2578_v41 = vadd.s32 %v2577_v12, %v2573_v13 }
 0x271   : > { %v2455_v11 = vadd.f32 0.041655596, %v2454_v42  ;;  %v2462_v25 = vadd.f32 0.008332121, %v2461_v0  ;;  %v2579_v6 = vadd.s32 536870912, %v2578_v41 }
 0x273   : > { %v2456_v59 = vmul.f32 %v2455_v11, %v2453_v60  ;;  %v2463_v7 = vmul.f32 %v2462_v25, %v2453_v60  ;;  %v2580_v51 = vshrl.u32 %v2579_v6, 30 }
 0x275   : > { %v2457_v57 = vadd.f32 -0.4999988, %v2456_v59  ;;  %v2464_v22 = vadd.f32 -0.16666654, %v2463_v7  ;;  %v2581_v16 = vshll.u32 %v2580_v51, 30  ;;  %v2604_v54 = vsub.s32 4, %v2580_v51 }
 0x277   : > { %v2458_v55 = vmul.f32 %v2457_v57, %v2453_v60  ;;  %v2465_v10 = vmul.f32 %v2464_v22, %v2453_v60  ;;  %v2582_v53 = vsub.s32 %v2578_v41, %v2581_v16  ;;  %v2605_v61 = vsel %vm2482_vm10, %v2604_v54, %v2580_v51 }
 0x278   : > { %v2607_v33 = vsel %vm2481_vm11, 0, %v2605_v61 }
 0x279   : > { %v2459_v24 = vadd.f32 1.0, %v2458_v55  ;;  %v2466_v23 = vadd.f32 1.0, %v2465_v10  ;;  %vm2583_vm8 = vcmp.lt.s32.totalorder %v2582_v53, 0  ;;  %v2584_v63 = vsub.s32 0, %v2582_v53 }
 0x27a   : > { %v2624_v21 = vadd.s32 3, %v2607_v33 }
 0x27b   : > { %v2467_v9 = vmul.f32 %v2466_v23, %v2451_v34  ;;  %v2476_v58 = vxor.u32 2147483648, %v2459_v24  ;;  %v2585_v48 = vsel %vm2583_vm8, %v2584_v63, %v2582_v53 }
 0x27c   : > { %v2586_v19 = vclz %v2585_v48  ;;  %v2625_v36 = vand.u32 3, %v2624_v21 }
 0x27d   : > { %v2473_v29 = vxor.u32 2147483648, %v2467_v9  ;;  %v2477_v46 = vsel %vm2475_vm4, %v2476_v58, %v2467_v9 }
 0x27e   : > { %v2795_v35 = vadd.s32 4294967294, %v2586_v19  ;;  %vm2630_vm12 = vcmp.eq.s32.totalorder %v2625_v36, 2  ;;  %vm2627_vm13 = vcmp.eq.s32.totalorder %v2625_v36, 0  ;;  %vm2626_vm14 = vcmp.lt.s32.totalorder %v2625_v36, 2 }
 0x27f   : > { %v2474_v31 = vsel %vm2472_vm5, %v2459_v24, %v2473_v29 }
 0x280   : > { %v2478_v3 = vsel %vm2471_vm6, %v2474_v31, %v2477_v46  ;;  %vm2796_vm9 = vcmp.lt.s32.totalorder %v2795_v35, 0 }
 0x281   : > { %v2479_v49 = vsel %vm2468_vm7, nan, %v2478_v3  ;;  %v2589_v27 = vsel %vm2796_vm9, 0, %v2795_v35 }
 0x282   : > { %2649 = vst [vmem:[%s3378_s17 + $0x70] sm:$0xff] %v2479_v49  ;;  %v2590_v39 = vsub.s32 32, %v2589_v27  ;;  %v2591_v1 = vshll.u32 %v2582_v53, %v2589_v27  ;;  %v2594_v56 = vsub.s32 4294967266, %v2589_v27 }
 0x284   : > { %v2592_v62 = vshrl.u32 %v2574_v44, %v2590_v39  ;;  %v2595_v38 = vadd.s32 127, %v2594_v56 }
 0x286   : > { %v2593_v43 = vor.u32 %v2592_v62, %v2591_v1  ;;  %v2596_v18 = vshll.u32 %v2595_v38, 23 }
 0x288   : > { %v2597_v47 = vor.u32 4788187, %v2596_v18  ;;  %v2600_v8 = vcvt.s32.f32 %v2593_v43 }
 0x28a   : > { %v2598_v14 = vand.u32 2147483647, %v2597_v47 }
 0x28c   : > { %v2601_v32 = vmul.f32 %v2600_v8, %v2598_v14 }
 0x28e   : > { %v2602_v37 = vxor.u32 2147483648, %v2601_v32 }
 0x290   : > { %v2603_v26 = vsel %vm2482_vm10, %v2602_v37, %v2601_v32 }
 0x291   : > { %v2606_v2 = vsel %vm2481_vm11, %v4815_v30, %v2603_v26 }
 0x292   : > { %v2608_v34 = vmul.f32 %v2606_v2, %v2606_v2 }
 0x294   : > { %v2609_v40 = vmul.f32 -0.001358992, %v2608_v34  ;;  %v2616_v60 = vmul.f32 -0.00019511016, %v2608_v34 }
 0x296   : > { %v2610_v28 = vadd.f32 0.041655596, %v2609_v40  ;;  %v2617_v52 = vadd.f32 0.008332121, %v2616_v60 }
 0x298   : > { %v2611_v17 = vmul.f32 %v2610_v28, %v2608_v34  ;;  %v2618_v50 = vmul.f32 %v2617_v52, %v2608_v34 }
 0x29a   : > { %v2612_v42 = vadd.f32 -0.4999988, %v2611_v17  ;;  %v2619_v0 = vadd.f32 -0.16666654, %v2618_v50 }
 0x29c   : > { %v2613_v4 = vmul.f32 %v2612_v42, %v2608_v34  ;;  %v2620_v15 = vmul.f32 %v2619_v0, %v2608_v34 }
 0x29e   : > { %v2614_v11 = vadd.f32 1.0, %v2613_v4  ;;  %v2621_v25 = vadd.f32 1.0, %v2620_v15 }
 0x2a0   : > { %v2622_v13 = vmul.f32 %v2621_v25, %v2606_v2  ;;  %v2631_v45 = vxor.u32 2147483648, %v2614_v11 }
 0x2a2   : > { %v2628_v20 = vxor.u32 2147483648, %v2622_v13  ;;  %v2632_v59 = vsel %vm2630_vm12, %v2631_v45, %v2622_v13 }
 0x2a4   : > { %v2629_v7 = vsel %vm2627_vm13, %v2614_v11, %v2628_v20 }
 0x2a5   : > { %v2633_v12 = vsel %vm2626_vm14, %v2629_v7, %v2632_v59 }
 0x2a6   : > { %v2634_v57 = vsel %vm2623_vm15, nan, %v2633_v12 }
 0x2a7   : > { %2650 = vst [vmem:[%s3378_s17 + $0x78] sm:$0xff] %v2634_v57 }
 0x2a8   : > { %2922 = shalt.err (!%p2919_p4)
}
 0x2a9   : > { %s2972_s16 = smov 128   ;;  %s2973_s20 = smov 8  }
 0x2aa   : > { %2806 = dma.vmem_to_hbm [thread:$0]  (%p3034_p11), %s2665_s29, 2048, %s2667_s30, %s2652_s10, %s2972_s16, %s2972_s16, %s2973_s20  }
 0x2ab PF: > { %s2681_s21 = sand.u32 1, %s2949_s6   ;;  %p5013_p7 = scmp.ge.s32.totalorder %s2961_s9, 2 }
 0x2ac   : > { %s2682_s22 = scalar_lea.sflag [#allocation4], %s2681_s21 }
 0x2ad   : > { %p2813_p5 = pnand %p5013_p7, %p3038_p12 }
 0x2af   : > { %p2814_p8 = pneg %p2813_p5 }
 0x2b1   : > { %2944 = dma.done.wait (%p2814_p8), %s2682_s22, 2048  }
 0x2b2   : > { %2946 = vsyncadd (%p2814_p8), %s2682_s22, 4294965248  ;;  %p14_p10 = scmp.ge.s32.totalorder %s3009_s12, 4   ;;  %s5014_s6 = smov %s2953_s7 }
 0x2b3   : > { %s5015_s7 = smov %s2957_s8  ;;  %s5016_s8 = smov %s3021_s15 }
 0x2b4   : > { %s5017_s9 = smov %s3009_s12  ;;  %16 = sbr.rel (!%p14_p10) target bundleno = 5 (0x5), region = 69 }
 0x2b9   :  { %2688 = vsyncpa [#allocation3], 1 }
 0x2ba   :  { %2690 = vsyncpa [#allocation3 + $0x1], 1 }
 0x2bb   :  { %2691 = vsyncpa [#allocation4], 1 }
 0x2bc   :  { %2693 = vsyncpa [#allocation4 + $0x1], 1 }

</bundles_post_ra>
